<compile_context>
chip_gen: v7x
topology: tpu7x:2x2x1
jax: 0.10.0
libtpu: 0.0.40
codegen_flags: <defaults>
</compile_context>

<pallas_src>
import random

import jax
import jax.numpy as jnp
from jax.experimental import pallas as pl
from jax.experimental.pallas import tpu as pltpu


# ----------------------------------------------------------------------------
# Pallas kernel: single invocation, full decode loop inside.
# ----------------------------------------------------------------------------
def decoder_kernel(
    # SMEM per-step schedule (ring-buffer slot indices + coefficients)
    w1_ref, gslot_ref, gcoef_ref, pslot_ref, pcoef_ref, oslot_ref, wslot_ref,
    # VMEM inputs (all lane-padded: Hp, Xp are multiples of 128)
    h_enc_ref,          # (Bp, Hp)
    w_big_ref,          # (Xp+Hp, 4*Hp)  fused [r | z | n_x | n_h] block weight
    b_rz_ref,           # (1, 2*Hp)      (b_ih_r+b_hh_r) | (b_ih_z+b_hh_z)
    b_in_ref,           # (1, Hp)        b_ih_n
    b_hn_ref,           # (1, Hp)        b_hh_n
    w_lin_ref,          # (Hp, Xp)
    b_lin_ref,          # (1, Xp)
    # output
    out_ref,            # (T, Bp, Xp)  resident, written back to HBM once
    # scratch
    hist_ref,           # (R, Bp, Hp)  ring buffer of hidden states
):
    Bp, Hp = h_enc_ref.shape
    T = out_ref.shape[0]
    Xp = out_ref.shape[2]

    # ring slot 0 <- h_enc (also the target of all coef==0 "zero" reads,
    # guaranteeing they only ever see finite data).
    hist_ref[0] = h_enc_ref[...]

    # Hoisted bias broadcasts: computed once, reused every step
    # (JAX does not CSE broadcast_in_dim inside the loop body).
    b_rz = jnp.broadcast_to(b_rz_ref[...], (Bp, 2 * Hp))
    b_in = jnp.broadcast_to(b_in_ref[...], (Bp, Hp))
    b_hn = jnp.broadcast_to(b_hn_ref[...], (Bp, Hp))
    b_lin = jnp.broadcast_to(b_lin_ref[...], (Bp, Xp))

    def step(t, prev):
        # "original" hidden for step t (h_enc at t=0, else GRU output of t-1)
        orig = hist_ref[oslot_ref[t]]                                   # (Bp,Hp)

        # masked hidden fed to the GRU cell
        h_in = orig * w1_ref[t] + hist_ref[gslot_ref[t]] * gcoef_ref[t]

        # single fused gate matmul (one MXU round-trip per step instead of 6).
        # prev and h_in are both 128-lane aligned, so the concat is free.
        u = jnp.concatenate([prev, h_in], axis=-1)                      # (Bp,Xp+Hp)
        g = jnp.dot(u, w_big_ref[...], preferred_element_type=jnp.float32)

        # all slices below are 128-lane-aligned, full-tile-width — no shuffles
        rz = jax.nn.sigmoid(g[:, :2 * Hp] + b_rz)
        r = rz[:, :Hp]
        z = rz[:, Hp:]
        n = jnp.tanh(g[:, 2 * Hp:3 * Hp] + b_in
                     + r * (g[:, 3 * Hp:] + b_hn))
        h_new = (1.0 - z) * n + z * h_in                                # (Bp,Hp)

        # write BEFORE the projection read (the schedule may reference the
        # just-written slot, exactly as the torch list indexing does).
        hist_ref[wslot_ref[t]] = h_new

        # projection: linear(h_i_originals[i] + h_i_skips[i - skip_size])
        proj_in = orig + hist_ref[pslot_ref[t]] * pcoef_ref[t]
        proj = (jnp.dot(proj_in, w_lin_ref[...],
                        preferred_element_type=jnp.float32) + b_lin)    # (Bp,Xp)

        # lane-dense, unmasked store straight into the resident output block
        out_ref[t] = proj
        return proj                                                     # (Bp,Xp)

    jax.lax.fori_loop(0, T, step, jnp.zeros((Bp, Xp), jnp.float32),
                      unroll=True if T <= 16 else 4)


# ----------------------------------------------------------------------------
# One-time parameter fusion / lane-padding (6 gate matmuls -> 1 per step)
# ----------------------------------------------------------------------------
def _fuse_params(params, Hp, Xp):
    w_ih, w_hh = params["w_ih"], params["w_hh"]      # (3,X,H), (3,H,H)
    b_ih, b_hh = params["b_ih"], params["b_hh"]      # (3,1,H), (3,1,H)
    X, H = w_ih.shape[1], w_ih.shape[2]

    w_big = jnp.zeros((Xp + Hp, 4 * Hp), jnp.float32)
    # r block (cols [0, Hp))       : pre-summed  prev@W_ih_r + h_in@W_hh_r
    w_big = w_big.at[:X, 0:H].set(w_ih[0])
    w_big = w_big.at[Xp:Xp + H, 0:H].set(w_hh[0])
    # z block (cols [Hp, 2Hp))     : pre-summed  prev@W_ih_z + h_in@W_hh_z
    w_big = w_big.at[:X, Hp:Hp + H].set(w_ih[1])
    w_big = w_big.at[Xp:Xp + H, Hp:Hp + H].set(w_hh[1])
    # n_x block (cols [2Hp, 3Hp))  : prev@W_ih_n only
    w_big = w_big.at[:X, 2 * Hp:2 * Hp + H].set(w_ih[2])
    # n_h block (cols [3Hp, 4Hp))  : h_in@W_hh_n only
    w_big = w_big.at[Xp:Xp + H, 3 * Hp:3 * Hp + H].set(w_hh[2])

    b_rz = jnp.zeros((1, 2 * Hp), jnp.float32)
    b_rz = b_rz.at[0, 0:H].set(b_ih[0, 0] + b_hh[0, 0])
    b_rz = b_rz.at[0, Hp:Hp + H].set(b_ih[1, 0] + b_hh[1, 0])
    b_in = jnp.zeros((1, Hp), jnp.float32).at[0, :H].set(b_ih[2, 0])
    b_hn = jnp.zeros((1, Hp), jnp.float32).at[0, :H].set(b_hh[2, 0])

    w_lin_p = jnp.zeros((Hp, Xp), jnp.float32).at[:H, :X].set(params["w_lin"])
    b_lin_p = jnp.zeros((1, Xp), jnp.float32).at[0, :X].set(params["b_lin"][0])
    return w_big, b_rz, b_in, b_hn, w_lin_p, b_lin_p


# ----------------------------------------------------------------------------
# Wrapper
# ----------------------------------------------------------------------------
def decoder_forward(h_enc, params, schedule, seq_len):
    B, H = h_enc.shape
    X = params["w_lin"].shape[1]
    (w1, gslot, gcoef, pslot, pcoef, oslot, wslot, ring) = schedule

    # lane-pad hidden / x dims to a full 128-lane tile, batch to a sublane tile
    Hp = -(-H // 128) * 128
    Xp = -(-X // 128) * 128
    Bp = max(8, -(-B // 8) * 8)

    w_big, b_rz, b_in, b_hn, w_lin_p, b_lin_p = _fuse_params(params, Hp, Xp)
    h_enc_p = jnp.pad(h_enc, ((0, Bp - B), (0, Hp - H)))

    smem = pl.BlockSpec(memory_space=pltpu.MemorySpace.SMEM)
    vmem = pl.BlockSpec(memory_space=pltpu.MemorySpace.VMEM)

    out_full = pl.pallas_call(
        decoder_kernel,
        out_shape=jax.ShapeDtypeStruct((seq_len, Bp, Xp), jnp.float32),
        in_specs=[smem] * 7 + [vmem] * 7,
        out_specs=vmem,
        scratch_shapes=[
            pltpu.VMEM((ring, Bp, Hp), jnp.float32),   # O(skip_size) history
        ],
    )(w1, gslot, gcoef, pslot, pcoef, oslot, wslot,
      h_enc_p, w_big, b_rz, b_in, b_hn, w_lin_p, b_lin_p)

    # slice off the batch/lane padding and go to the torch (B, T, X) layout
    return jnp.transpose(out_full[:, :B, :X], (1, 0, 2))


# ----------------------------------------------------------------------------
# Static schedule: exact replication of the PyTorch list/negative-index logic,
# mapped onto a ring buffer of depth min(T, 2*skip_size) + 1.
# ----------------------------------------------------------------------------
def build_schedule(seq_len, skip_size, masks):
    # absolute hist index: 0 = h_enc, j+1 = GRU output of step j
    h_skip_tags = ["zero"] * skip_size

    def abs_of(tag):
        return 0 if tag == "zero" else tag[1] + 1

    w1, gcoef, pcoef, g_abs, p_abs = [], [], [], [], []
    for i in range(seq_len):
        w1.append(float(masks[i][0]))
        gtag = h_skip_tags[i - skip_size]          # before appends (torch order)
        g_abs.append(abs_of(gtag))
        gcoef.append(float(masks[i][1]) if gtag != "zero" else 0.0)

        h_skip_tags.append(("h", i))

        ptag = h_skip_tags[i - skip_size]          # after append (torch order)
        p_abs.append(abs_of(ptag))
        pcoef.append(1.0 if ptag != "zero" else 0.0)

    o_abs = list(range(seq_len))                   # orig at step i  = abs i
    w_abs = [i + 1 for i in range(seq_len)]        # write at step i = abs i+1

    # ring depth: max backward slot distance is 2*skip_size (incl. the
    # negative-index cases) — verified below.
    ring = min(seq_len, 2 * skip_size) + 1

    last_read = {}

    def note(a, i):
        last_read[a] = max(last_read.get(a, -1), i)

    for i in range(seq_len):
        note(o_abs[i], i)
        if gcoef[i] != 0.0:
            note(g_abs[i], i)
        if pcoef[i] != 0.0:
            note(p_abs[i], i)
    for a, r in last_read.items():
        # abs (a + ring) is written at step a + ring - 1; it must come strictly
        # after the last meaningful read of abs a.
        assert a + ring - 1 > r, "history ring buffer too small for schedule"

    def ring_idx(xs):
        return jnp.asarray([x % ring for x in xs], jnp.int32)

    return (jnp.asarray(w1, jnp.float32),
            ring_idx(g_abs), jnp.asarray(gcoef, jnp.float32),
            ring_idx(p_abs), jnp.asarray(pcoef, jnp.float32),
            ring_idx(o_abs), ring_idx(w_abs),
            ring)


# ----------------------------------------------------------------------------
# Pure-JAX reference (direct transcription of the torch forward)
# ----------------------------------------------------------------------------
def decoder_ref(h_enc, params, masks, skip_size, seq_len, x_dim):
    B, H = h_enc.shape
    w_ih, w_hh = params["w_ih"], params["w_hh"]
    b_ih, b_hh = params["b_ih"], params["b_hh"]
    w_lin, b_lin = params["w_lin"], params["b_lin"]

    def gru(x, h):
        r = jax.nn.sigmoid(x @ w_ih[0] + b_ih[0] + h @ w_hh[0] + b_hh[0])
        z = jax.nn.sigmoid(x @ w_ih[1] + b_ih[1] + h @ w_hh[1] + b_hh[1])
        n = jnp.tanh(x @ w_ih[2] + b_ih[2] + r * (h @ w_hh[2] + b_hh[2]))
        return (1.0 - z) * n + z * h

    GO = jnp.zeros((B, x_dim), jnp.float32)
    h_origs = [h_enc]
    h_skips = [jnp.zeros((B, H), jnp.float32) for _ in range(skip_size)]
    outs = []
    for i in range(seq_len):
        x = GO if i == 0 else outs[i - 1]
        h_new = gru(x, h_origs[i] * masks[i][0]
                    + h_skips[i - skip_size] * masks[i][1])
        h_origs.append(h_new)
        h_skips.append(h_new)
        outs.append((h_origs[i] + h_skips[i - skip_size]) @ w_lin + b_lin)
    return jnp.transpose(jnp.stack(outs), (1, 0, 2))


if __name__ == "__main__":
    # Small, module-consistent shapes
    B, T, x_dim, h_dim = 2, 8, 4, 32

    # Deterministic "random" module hyper-params (skip_size, masks), as in __init__
    random.seed(0)
    skip_size = random.randint(1, 10)
    masks = []
    for _ in range(T):
        W_1 = random.randint(0, 1)
        W_2 = 1 if W_1 == 0 else random.randint(0, 1)
        masks.append((W_1, W_2))

    # Deterministic parameter init (PyTorch-style uniform(-1/sqrt(H), 1/sqrt(H)))
    key = jax.random.PRNGKey(0)
    ks = jax.random.split(key, 8)
    s = 1.0 / (h_dim ** 0.5)
    params = {
        "w_ih": jax.random.uniform(ks[0], (3, x_dim, h_dim), jnp.float32, -s, s),
        "w_hh": jax.random.uniform(ks[1], (3, h_dim, h_dim), jnp.float32, -s, s),
        "b_ih": jax.random.uniform(ks[2], (3, 1, h_dim), jnp.float32, -s, s),
        "b_hh": jax.random.uniform(ks[3], (3, 1, h_dim), jnp.float32, -s, s),
        "w_lin": jax.random.uniform(ks[4], (h_dim, x_dim), jnp.float32, -s, s),
        "b_lin": jax.random.uniform(ks[5], (1, x_dim), jnp.float32, -s, s),
    }
    h_enc = jax.random.normal(ks[6], (B, h_dim), jnp.float32)
    # `input` is only used for its shape (B, T) in the torch forward.
    x_input = jax.random.normal(ks[7], (B, T, x_dim), jnp.float32)  # noqa: F841

    schedule = build_schedule(T, skip_size, masks)

    out = decoder_forward(h_enc, params, schedule, T)
    out = jax.block_until_ready(out)

    ref = decoder_ref(h_enc, params, masks, skip_size, T, x_dim)
    assert out.shape == (B, T, x_dim)
    err = float(jnp.max(jnp.abs(out - ref)))
    assert err < 1e-3, f"mismatch vs reference: {err}"

    print("KERNEL_OK")
</pallas_src>

<mosaic_0001>
module attributes {stable_mosaic.version = 11 : i64} {
  func.func @decoder_kernel(%arg0: memref<8xf32, #tpu.memory_space<smem>>, %arg1: memref<8xi32, #tpu.memory_space<smem>>, %arg2: memref<8xf32, #tpu.memory_space<smem>>, %arg3: memref<8xi32, #tpu.memory_space<smem>>, %arg4: memref<8xf32, #tpu.memory_space<smem>>, %arg5: memref<8xi32, #tpu.memory_space<smem>>, %arg6: memref<8xi32, #tpu.memory_space<smem>>, %arg7: memref<8x128xf32, #tpu.memory_space<vmem>>, %arg8: memref<256x512xf32, #tpu.memory_space<vmem>>, %arg9: memref<1x256xf32, #tpu.memory_space<vmem>>, %arg10: memref<1x128xf32, #tpu.memory_space<vmem>>, %arg11: memref<1x128xf32, #tpu.memory_space<vmem>>, %arg12: memref<128x128xf32, #tpu.memory_space<vmem>>, %arg13: memref<1x128xf32, #tpu.memory_space<vmem>>, %arg14: memref<8x8x128xf32, #tpu.memory_space<vmem>>, %arg15: memref<9x8x128xf32, #tpu.memory_space<vmem>>) attributes {dimension_semantics = [], scalar_prefetch = 0 : i64, scratch_operands = 1 : i64, tpu.core_type = #tpu.core_type<tc>} {
    %c0 = arith.constant 0 : index
    %c0_0 = arith.constant 0 : index
    %0 = vector.load %arg7[%c0, %c0_0] : memref<8x128xf32, #tpu.memory_space<vmem>>, vector<8x128xf32>
    %c0_1 = arith.constant 0 : index
    %c0_2 = arith.constant 0 : index
    %c0_3 = arith.constant 0 : index
    %1 = vector.load %arg15[%c0_1, %c0_2, %c0_3] : memref<9x8x128xf32, #tpu.memory_space<vmem>>, vector<1x8x128xf32>
    %2 = vector.shape_cast %1 : vector<1x8x128xf32> to vector<8x128xf32>
    %3 = vector.shape_cast %0 : vector<8x128xf32> to vector<1x8x128xf32>
    tpu.vector_store %arg15[%c0_1, %c0_2, %c0_3], %3 {strides = array<i32>} : memref<9x8x128xf32, #tpu.memory_space<vmem>>, vector<1x8x128xf32>,
    %c0_4 = arith.constant 0 : index
    %c0_5 = arith.constant 0 : index
    %4 = vector.load %arg9[%c0_4, %c0_5] : memref<1x256xf32, #tpu.memory_space<vmem>>, vector<1x256xf32>
    %5 = vector.shape_cast %4 : vector<1x256xf32> to vector<1x256xf32>
    %6 = vector.broadcast %5 : vector<1x256xf32> to vector<8x256xf32>
    %c0_6 = arith.constant 0 : index
    %c0_7 = arith.constant 0 : index
    %7 = vector.load %arg10[%c0_6, %c0_7] : memref<1x128xf32, #tpu.memory_space<vmem>>, vector<1x128xf32>
    %8 = vector.shape_cast %7 : vector<1x128xf32> to vector<1x128xf32>
    %9 = vector.broadcast %8 : vector<1x128xf32> to vector<8x128xf32>
    %c0_8 = arith.constant 0 : index
    %c0_9 = arith.constant 0 : index
    %10 = vector.load %arg11[%c0_8, %c0_9] : memref<1x128xf32, #tpu.memory_space<vmem>>, vector<1x128xf32>
    %11 = vector.shape_cast %10 : vector<1x128xf32> to vector<1x128xf32>
    %12 = vector.broadcast %11 : vector<1x128xf32> to vector<8x128xf32>
    %c0_10 = arith.constant 0 : index
    %c0_11 = arith.constant 0 : index
    %13 = vector.load %arg13[%c0_10, %c0_11] : memref<1x128xf32, #tpu.memory_space<vmem>>, vector<1x128xf32>
    %14 = vector.shape_cast %13 : vector<1x128xf32> to vector<1x128xf32>
    %15 = vector.broadcast %14 : vector<1x128xf32> to vector<8x128xf32>
    %cst = arith.constant 0.000000e+00 : f32
    %16 = vector.broadcast %cst : f32 to vector<8x128xf32>
    %c0_i32 = arith.constant 0 : i32
    %17 = arith.index_cast %c0_i32 : i32 to index
    %18 = memref.load %arg5[%17] : memref<8xi32, #tpu.memory_space<smem>>
    %19 = arith.index_cast %18 : i32 to index
    %c0_12 = arith.constant 0 : index
    %c0_13 = arith.constant 0 : index
    %20 = vector.load %arg15[%19, %c0_12, %c0_13] : memref<9x8x128xf32, #tpu.memory_space<vmem>>, vector<1x8x128xf32>
    %21 = vector.shape_cast %20 : vector<1x8x128xf32> to vector<8x128xf32>
    %22 = arith.index_cast %c0_i32 : i32 to index
    %23 = memref.load %arg0[%22] : memref<8xf32, #tpu.memory_space<smem>>
    %24 = vector.broadcast %23 : f32 to vector<8x128xf32>
    %25 = arith.mulf %21, %24 : vector<8x128xf32>
    %26 = arith.index_cast %c0_i32 : i32 to index
    %27 = memref.load %arg1[%26] : memref<8xi32, #tpu.memory_space<smem>>
    %28 = arith.index_cast %27 : i32 to index
    %c0_14 = arith.constant 0 : index
    %c0_15 = arith.constant 0 : index
    %29 = vector.load %arg15[%28, %c0_14, %c0_15] : memref<9x8x128xf32, #tpu.memory_space<vmem>>, vector<1x8x128xf32>
    %30 = vector.shape_cast %29 : vector<1x8x128xf32> to vector<8x128xf32>
    %31 = arith.index_cast %c0_i32 : i32 to index
    %32 = memref.load %arg2[%31] : memref<8xf32, #tpu.memory_space<smem>>
    %33 = vector.broadcast %32 : f32 to vector<8x128xf32>
    %34 = arith.mulf %30, %33 : vector<8x128xf32>
    %35 = arith.addf %25, %34 : vector<8x128xf32>
    %36 = tpu.concatenate %16, %35 in 1 : vector<8x128xf32>, vector<8x128xf32> -> vector<8x256xf32>
    %c0_16 = arith.constant 0 : index
    %c0_17 = arith.constant 0 : index
    %37 = vector.load %arg8[%c0_16, %c0_17] : memref<256x512xf32, #tpu.memory_space<vmem>>, vector<256x512xf32>
    %cst_18 = arith.constant dense<0.000000e+00> : vector<8x512xf32>
    %38 = tpu.matmul %36, %37, %cst_18 {dimension_numbers = #tpu.dot_dimension_numbers<[1], [0], [0], [1], [0, 0, 1, 1], [], []>} : vector<8x256xf32>, vector<256x512xf32>, vector<8x512xf32> -> vector<8x512xf32>
    %39 = vector.extract_strided_slice %38 {offsets = [0, 0], sizes = [8, 256], strides = [1, 1]} : vector<8x512xf32> to vector<8x256xf32>
    %40 = arith.addf %39, %6 : vector<8x256xf32>
    %41 = arith.negf %40 : vector<8x256xf32>
    %42 = math.exp %41 : vector<8x256xf32>
    %cst_19 = arith.constant 1.000000e+00 : f32
    %43 = vector.broadcast %cst_19 : f32 to vector<8x256xf32>
    %44 = arith.addf %43, %42 : vector<8x256xf32>
    %45 = arith.divf %43, %44 : vector<8x256xf32>
    %46 = vector.extract_strided_slice %45 {offsets = [0, 0], sizes = [8, 128], strides = [1, 1]} : vector<8x256xf32> to vector<8x128xf32>
    %47 = vector.extract_strided_slice %45 {offsets = [0, 128], sizes = [8, 128], strides = [1, 1]} : vector<8x256xf32> to vector<8x128xf32>
    %48 = vector.extract_strided_slice %38 {offsets = [0, 256], sizes = [8, 128], strides = [1, 1]} : vector<8x512xf32> to vector<8x128xf32>
    %49 = arith.addf %48, %9 : vector<8x128xf32>
    %50 = vector.extract_strided_slice %38 {offsets = [0, 384], sizes = [8, 128], strides = [1, 1]} : vector<8x512xf32> to vector<8x128xf32>
    %51 = arith.addf %50, %12 : vector<8x128xf32>
    %52 = arith.mulf %46, %51 : vector<8x128xf32>
    %53 = arith.addf %49, %52 : vector<8x128xf32>
    %54 = math.tanh %53 : vector<8x128xf32>
    %cst_20 = arith.constant 1.000000e+00 : f32
    %55 = vector.broadcast %cst_20 : f32 to vector<8x128xf32>
    %56 = arith.subf %55, %47 : vector<8x128xf32>
    %57 = arith.mulf %56, %54 : vector<8x128xf32>
    %58 = arith.mulf %47, %35 : vector<8x128xf32>
    %59 = arith.addf %57, %58 : vector<8x128xf32>
    %60 = arith.index_cast %c0_i32 : i32 to index
    %61 = memref.load %arg6[%60] : memref<8xi32, #tpu.memory_space<smem>>
    %62 = arith.index_cast %61 : i32 to index
    %c0_21 = arith.constant 0 : index
    %c0_22 = arith.constant 0 : index
    %63 = vector.load %arg15[%62, %c0_21, %c0_22] : memref<9x8x128xf32, #tpu.memory_space<vmem>>, vector<1x8x128xf32>
    %64 = vector.shape_cast %63 : vector<1x8x128xf32> to vector<8x128xf32>
    %65 = vector.shape_cast %59 : vector<8x128xf32> to vector<1x8x128xf32>
    tpu.vector_store %arg15[%62, %c0_21, %c0_22], %65 {strides = array<i32>} : memref<9x8x128xf32, #tpu.memory_space<vmem>>, vector<1x8x128xf32>,
    %66 = arith.index_cast %c0_i32 : i32 to index
    %67 = memref.load %arg3[%66] : memref<8xi32, #tpu.memory_space<smem>>
    %68 = arith.index_cast %67 : i32 to index
    %c0_23 = arith.constant 0 : index
    %c0_24 = arith.constant 0 : index
    %69 = vector.load %arg15[%68, %c0_23, %c0_24] : memref<9x8x128xf32, #tpu.memory_space<vmem>>, vector<1x8x128xf32>
    %70 = vector.shape_cast %69 : vector<1x8x128xf32> to vector<8x128xf32>
    %71 = arith.index_cast %c0_i32 : i32 to index
    %72 = memref.load %arg4[%71] : memref<8xf32, #tpu.memory_space<smem>>
    %73 = vector.broadcast %72 : f32 to vector<8x128xf32>
    %74 = arith.mulf %70, %73 : vector<8x128xf32>
    %75 = arith.addf %21, %74 : vector<8x128xf32>
    %c0_25 = arith.constant 0 : index
    %c0_26 = arith.constant 0 : index
    %76 = vector.load %arg12[%c0_25, %c0_26] : memref<128x128xf32, #tpu.memory_space<vmem>>, vector<128x128xf32>
    %cst_27 = arith.constant dense<0.000000e+00> : vector<8x128xf32>
    %77 = tpu.matmul %75, %76, %cst_27 {dimension_numbers = #tpu.dot_dimension_numbers<[1], [0], [0], [1], [0, 0, 1, 1], [], []>} : vector<8x128xf32>, vector<128x128xf32>, vector<8x128xf32> -> vector<8x128xf32>
    %78 = arith.addf %77, %15 : vector<8x128xf32>
    %79 = arith.index_cast %c0_i32 : i32 to index
    %c0_28 = arith.constant 0 : index
    %c0_29 = arith.constant 0 : index
    %80 = vector.load %arg14[%79, %c0_28, %c0_29] : memref<8x8x128xf32, #tpu.memory_space<vmem>>, vector<1x8x128xf32>
    %81 = vector.shape_cast %80 : vector<1x8x128xf32> to vector<8x128xf32>
    %82 = vector.shape_cast %78 : vector<8x128xf32> to vector<1x8x128xf32>
    tpu.vector_store %arg14[%79, %c0_28, %c0_29], %82 {strides = array<i32>} : memref<8x8x128xf32, #tpu.memory_space<vmem>>, vector<1x8x128xf32>,
    %c1_i32 = arith.constant 1 : i32
    %83 = arith.index_cast %c1_i32 : i32 to index
    %84 = memref.load %arg5[%83] : memref<8xi32, #tpu.memory_space<smem>>
    %85 = arith.index_cast %84 : i32 to index
    %c0_30 = arith.constant 0 : index
    %c0_31 = arith.constant 0 : index
    %86 = vector.load %arg15[%85, %c0_30, %c0_31] : memref<9x8x128xf32, #tpu.memory_space<vmem>>, vector<1x8x128xf32>
    %87 = vector.shape_cast %86 : vector<1x8x128xf32> to vector<8x128xf32>
    %88 = arith.index_cast %c1_i32 : i32 to index
    %89 = memref.load %arg0[%88] : memref<8xf32, #tpu.memory_space<smem>>
    %90 = vector.broadcast %89 : f32 to vector<8x128xf32>
    %91 = arith.mulf %87, %90 : vector<8x128xf32>
    %92 = arith.index_cast %c1_i32 : i32 to index
    %93 = memref.load %arg1[%92] : memref<8xi32, #tpu.memory_space<smem>>
    %94 = arith.index_cast %93 : i32 to index
    %c0_32 = arith.constant 0 : index
    %c0_33 = arith.constant 0 : index
    %95 = vector.load %arg15[%94, %c0_32, %c0_33] : memref<9x8x128xf32, #tpu.memory_space<vmem>>, vector<1x8x128xf32>
    %96 = vector.shape_cast %95 : vector<1x8x128xf32> to vector<8x128xf32>
    %97 = arith.index_cast %c1_i32 : i32 to index
    %98 = memref.load %arg2[%97] : memref<8xf32, #tpu.memory_space<smem>>
    %99 = vector.broadcast %98 : f32 to vector<8x128xf32>
    %100 = arith.mulf %96, %99 : vector<8x128xf32>
    %101 = arith.addf %91, %100 : vector<8x128xf32>
    %102 = tpu.concatenate %78, %101 in 1 : vector<8x128xf32>, vector<8x128xf32> -> vector<8x256xf32>
    %c0_34 = arith.constant 0 : index
    %c0_35 = arith.constant 0 : index
    %103 = vector.load %arg8[%c0_34, %c0_35] : memref<256x512xf32, #tpu.memory_space<vmem>>, vector<256x512xf32>
    %cst_36 = arith.constant dense<0.000000e+00> : vector<8x512xf32>
    %104 = tpu.matmul %102, %103, %cst_36 {dimension_numbers = #tpu.dot_dimension_numbers<[1], [0], [0], [1], [0, 0, 1, 1], [], []>} : vector<8x256xf32>, vector<256x512xf32>, vector<8x512xf32> -> vector<8x512xf32>
    %105 = vector.extract_strided_slice %104 {offsets = [0, 0], sizes = [8, 256], strides = [1, 1]} : vector<8x512xf32> to vector<8x256xf32>
    %106 = arith.addf %105, %6 : vector<8x256xf32>
    %107 = arith.negf %106 : vector<8x256xf32>
    %108 = math.exp %107 : vector<8x256xf32>
    %cst_37 = arith.constant 1.000000e+00 : f32
    %109 = vector.broadcast %cst_37 : f32 to vector<8x256xf32>
    %110 = arith.addf %109, %108 : vector<8x256xf32>
    %111 = arith.divf %109, %110 : vector<8x256xf32>
    %112 = vector.extract_strided_slice %111 {offsets = [0, 0], sizes = [8, 128], strides = [1, 1]} : vector<8x256xf32> to vector<8x128xf32>
    %113 = vector.extract_strided_slice %111 {offsets = [0, 128], sizes = [8, 128], strides = [1, 1]} : vector<8x256xf32> to vector<8x128xf32>
    %114 = vector.extract_strided_slice %104 {offsets = [0, 256], sizes = [8, 128], strides = [1, 1]} : vector<8x512xf32> to vector<8x128xf32>
    %115 = arith.addf %114, %9 : vector<8x128xf32>
    %116 = vector.extract_strided_slice %104 {offsets = [0, 384], sizes = [8, 128], strides = [1, 1]} : vector<8x512xf32> to vector<8x128xf32>
    %117 = arith.addf %116, %12 : vector<8x128xf32>
    %118 = arith.mulf %112, %117 : vector<8x128xf32>
    %119 = arith.addf %115, %118 : vector<8x128xf32>
    %120 = math.tanh %119 : vector<8x128xf32>
    %cst_38 = arith.constant 1.000000e+00 : f32
    %121 = vector.broadcast %cst_38 : f32 to vector<8x128xf32>
    %122 = arith.subf %121, %113 : vector<8x128xf32>
    %123 = arith.mulf %122, %120 : vector<8x128xf32>
    %124 = arith.mulf %113, %101 : vector<8x128xf32>
    %125 = arith.addf %123, %124 : vector<8x128xf32>
    %126 = arith.index_cast %c1_i32 : i32 to index
    %127 = memref.load %arg6[%126] : memref<8xi32, #tpu.memory_space<smem>>
    %128 = arith.index_cast %127 : i32 to index
    %c0_39 = arith.constant 0 : index
    %c0_40 = arith.constant 0 : index
    %129 = vector.load %arg15[%128, %c0_39, %c0_40] : memref<9x8x128xf32, #tpu.memory_space<vmem>>, vector<1x8x128xf32>
    %130 = vector.shape_cast %129 : vector<1x8x128xf32> to vector<8x128xf32>
    %131 = vector.shape_cast %125 : vector<8x128xf32> to vector<1x8x128xf32>
    tpu.vector_store %arg15[%128, %c0_39, %c0_40], %131 {strides = array<i32>} : memref<9x8x128xf32, #tpu.memory_space<vmem>>, vector<1x8x128xf32>,
    %132 = arith.index_cast %c1_i32 : i32 to index
    %133 = memref.load %arg3[%132] : memref<8xi32, #tpu.memory_space<smem>>
    %134 = arith.index_cast %133 : i32 to index
    %c0_41 = arith.constant 0 : index
    %c0_42 = arith.constant 0 : index
    %135 = vector.load %arg15[%134, %c0_41, %c0_42] : memref<9x8x128xf32, #tpu.memory_space<vmem>>, vector<1x8x128xf32>
    %136 = vector.shape_cast %135 : vector<1x8x128xf32> to vector<8x128xf32>
    %137 = arith.index_cast %c1_i32 : i32 to index
    %138 = memref.load %arg4[%137] : memref<8xf32, #tpu.memory_space<smem>>
    %139 = vector.broadcast %138 : f32 to vector<8x128xf32>
    %140 = arith.mulf %136, %139 : vector<8x128xf32>
    %141 = arith.addf %87, %140 : vector<8x128xf32>
    %c0_43 = arith.constant 0 : index
    %c0_44 = arith.constant 0 : index
    %142 = vector.load %arg12[%c0_43, %c0_44] : memref<128x128xf32, #tpu.memory_space<vmem>>, vector<128x128xf32>
    %cst_45 = arith.constant dense<0.000000e+00> : vector<8x128xf32>
    %143 = tpu.matmul %141, %142, %cst_45 {dimension_numbers = #tpu.dot_dimension_numbers<[1], [0], [0], [1], [0, 0, 1, 1], [], []>} : vector<8x128xf32>, vector<128x128xf32>, vector<8x128xf32> -> vector<8x128xf32>
    %144 = arith.addf %143, %15 : vector<8x128xf32>
    %145 = arith.index_cast %c1_i32 : i32 to index
    %c0_46 = arith.constant 0 : index
    %c0_47 = arith.constant 0 : index
    %146 = vector.load %arg14[%145, %c0_46, %c0_47] : memref<8x8x128xf32, #tpu.memory_space<vmem>>, vector<1x8x128xf32>
    %147 = vector.shape_cast %146 : vector<1x8x128xf32> to vector<8x128xf32>
    %148 = vector.shape_cast %144 : vector<8x128xf32> to vector<1x8x128xf32>
    tpu.vector_store %arg14[%145, %c0_46, %c0_47], %148 {strides = array<i32>} : memref<8x8x128xf32, #tpu.memory_space<vmem>>, vector<1x8x128xf32>,
    %c2_i32 = arith.constant 2 : i32
    %149 = arith.index_cast %c2_i32 : i32 to index
    %150 = memref.load %arg5[%149] : memref<8xi32, #tpu.memory_space<smem>>
    %151 = arith.index_cast %150 : i32 to index
    %c0_48 = arith.constant 0 : index
    %c0_49 = arith.constant 0 : index
    %152 = vector.load %arg15[%151, %c0_48, %c0_49] : memref<9x8x128xf32, #tpu.memory_space<vmem>>, vector<1x8x128xf32>
    %153 = vector.shape_cast %152 : vector<1x8x128xf32> to vector<8x128xf32>
    %154 = arith.index_cast %c2_i32 : i32 to index
    %155 = memref.load %arg0[%154] : memref<8xf32, #tpu.memory_space<smem>>
    %156 = vector.broadcast %155 : f32 to vector<8x128xf32>
    %157 = arith.mulf %153, %156 : vector<8x128xf32>
    %158 = arith.index_cast %c2_i32 : i32 to index
    %159 = memref.load %arg1[%158] : memref<8xi32, #tpu.memory_space<smem>>
    %160 = arith.index_cast %159 : i32 to index
    %c0_50 = arith.constant 0 : index
    %c0_51 = arith.constant 0 : index
    %161 = vector.load %arg15[%160, %c0_50, %c0_51] : memref<9x8x128xf32, #tpu.memory_space<vmem>>, vector<1x8x128xf32>
    %162 = vector.shape_cast %161 : vector<1x8x128xf32> to vector<8x128xf32>
    %163 = arith.index_cast %c2_i32 : i32 to index
    %164 = memref.load %arg2[%163] : memref<8xf32, #tpu.memory_space<smem>>
    %165 = vector.broadcast %164 : f32 to vector<8x128xf32>
    %166 = arith.mulf %162, %165 : vector<8x128xf32>
    %167 = arith.addf %157, %166 : vector<8x128xf32>
    %168 = tpu.concatenate %144, %167 in 1 : vector<8x128xf32>, vector<8x128xf32> -> vector<8x256xf32>
    %c0_52 = arith.constant 0 : index
    %c0_53 = arith.constant 0 : index
    %169 = vector.load %arg8[%c0_52, %c0_53] : memref<256x512xf32, #tpu.memory_space<vmem>>, vector<256x512xf32>
    %cst_54 = arith.constant dense<0.000000e+00> : vector<8x512xf32>
    %170 = tpu.matmul %168, %169, %cst_54 {dimension_numbers = #tpu.dot_dimension_numbers<[1], [0], [0], [1], [0, 0, 1, 1], [], []>} : vector<8x256xf32>, vector<256x512xf32>, vector<8x512xf32> -> vector<8x512xf32>
    %171 = vector.extract_strided_slice %170 {offsets = [0, 0], sizes = [8, 256], strides = [1, 1]} : vector<8x512xf32> to vector<8x256xf32>
    %172 = arith.addf %171, %6 : vector<8x256xf32>
    %173 = arith.negf %172 : vector<8x256xf32>
    %174 = math.exp %173 : vector<8x256xf32>
    %cst_55 = arith.constant 1.000000e+00 : f32
    %175 = vector.broadcast %cst_55 : f32 to vector<8x256xf32>
    %176 = arith.addf %175, %174 : vector<8x256xf32>
    %177 = arith.divf %175, %176 : vector<8x256xf32>
    %178 = vector.extract_strided_slice %177 {offsets = [0, 0], sizes = [8, 128], strides = [1, 1]} : vector<8x256xf32> to vector<8x128xf32>
    %179 = vector.extract_strided_slice %177 {offsets = [0, 128], sizes = [8, 128], strides = [1, 1]} : vector<8x256xf32> to vector<8x128xf32>
    %180 = vector.extract_strided_slice %170 {offsets = [0, 256], sizes = [8, 128], strides = [1, 1]} : vector<8x512xf32> to vector<8x128xf32>
    %181 = arith.addf %180, %9 : vector<8x128xf32>
    %182 = vector.extract_strided_slice %170 {offsets = [0, 384], sizes = [8, 128], strides = [1, 1]} : vector<8x512xf32> to vector<8x128xf32>
    %183 = arith.addf %182, %12 : vector<8x128xf32>
    %184 = arith.mulf %178, %183 : vector<8x128xf32>
    %185 = arith.addf %181, %184 : vector<8x128xf32>
    %186 = math.tanh %185 : vector<8x128xf32>
    %cst_56 = arith.constant 1.000000e+00 : f32
    %187 = vector.broadcast %cst_56 : f32 to vector<8x128xf32>
    %188 = arith.subf %187, %179 : vector<8x128xf32>
    %189 = arith.mulf %188, %186 : vector<8x128xf32>
    %190 = arith.mulf %179, %167 : vector<8x128xf32>
    %191 = arith.addf %189, %190 : vector<8x128xf32>
    %192 = arith.index_cast %c2_i32 : i32 to index
    %193 = memref.load %arg6[%192] : memref<8xi32, #tpu.memory_space<smem>>
    %194 = arith.index_cast %193 : i32 to index
    %c0_57 = arith.constant 0 : index
    %c0_58 = arith.constant 0 : index
    %195 = vector.load %arg15[%194, %c0_57, %c0_58] : memref<9x8x128xf32, #tpu.memory_space<vmem>>, vector<1x8x128xf32>
    %196 = vector.shape_cast %195 : vector<1x8x128xf32> to vector<8x128xf32>
    %197 = vector.shape_cast %191 : vector<8x128xf32> to vector<1x8x128xf32>
    tpu.vector_store %arg15[%194, %c0_57, %c0_58], %197 {strides = array<i32>} : memref<9x8x128xf32, #tpu.memory_space<vmem>>, vector<1x8x128xf32>,
    %198 = arith.index_cast %c2_i32 : i32 to index
    %199 = memref.load %arg3[%198] : memref<8xi32, #tpu.memory_space<smem>>
    %200 = arith.index_cast %199 : i32 to index
    %c0_59 = arith.constant 0 : index
    %c0_60 = arith.constant 0 : index
    %201 = vector.load %arg15[%200, %c0_59, %c0_60] : memref<9x8x128xf32, #tpu.memory_space<vmem>>, vector<1x8x128xf32>
    %202 = vector.shape_cast %201 : vector<1x8x128xf32> to vector<8x128xf32>
    %203 = arith.index_cast %c2_i32 : i32 to index
    %204 = memref.load %arg4[%203] : memref<8xf32, #tpu.memory_space<smem>>
    %205 = vector.broadcast %204 : f32 to vector<8x128xf32>
    %206 = arith.mulf %202, %205 : vector<8x128xf32>
    %207 = arith.addf %153, %206 : vector<8x128xf32>
    %c0_61 = arith.constant 0 : index
    %c0_62 = arith.constant 0 : index
    %208 = vector.load %arg12[%c0_61, %c0_62] : memref<128x128xf32, #tpu.memory_space<vmem>>, vector<128x128xf32>
    %cst_63 = arith.constant dense<0.000000e+00> : vector<8x128xf32>
    %209 = tpu.matmul %207, %208, %cst_63 {dimension_numbers = #tpu.dot_dimension_numbers<[1], [0], [0], [1], [0, 0, 1, 1], [], []>} : vector<8x128xf32>, vector<128x128xf32>, vector<8x128xf32> -> vector<8x128xf32>
    %210 = arith.addf %209, %15 : vector<8x128xf32>
    %211 = arith.index_cast %c2_i32 : i32 to index
    %c0_64 = arith.constant 0 : index
    %c0_65 = arith.constant 0 : index
    %212 = vector.load %arg14[%211, %c0_64, %c0_65] : memref<8x8x128xf32, #tpu.memory_space<vmem>>, vector<1x8x128xf32>
    %213 = vector.shape_cast %212 : vector<1x8x128xf32> to vector<8x128xf32>
    %214 = vector.shape_cast %210 : vector<8x128xf32> to vector<1x8x128xf32>
    tpu.vector_store %arg14[%211, %c0_64, %c0_65], %214 {strides = array<i32>} : memref<8x8x128xf32, #tpu.memory_space<vmem>>, vector<1x8x128xf32>,
    %c3_i32 = arith.constant 3 : i32
    %215 = arith.index_cast %c3_i32 : i32 to index
    %216 = memref.load %arg5[%215] : memref<8xi32, #tpu.memory_space<smem>>
    %217 = arith.index_cast %216 : i32 to index
    %c0_66 = arith.constant 0 : index
    %c0_67 = arith.constant 0 : index
    %218 = vector.load %arg15[%217, %c0_66, %c0_67] : memref<9x8x128xf32, #tpu.memory_space<vmem>>, vector<1x8x128xf32>
    %219 = vector.shape_cast %218 : vector<1x8x128xf32> to vector<8x128xf32>
    %220 = arith.index_cast %c3_i32 : i32 to index
    %221 = memref.load %arg0[%220] : memref<8xf32, #tpu.memory_space<smem>>
    %222 = vector.broadcast %221 : f32 to vector<8x128xf32>
    %223 = arith.mulf %219, %222 : vector<8x128xf32>
    %224 = arith.index_cast %c3_i32 : i32 to index
    %225 = memref.load %arg1[%224] : memref<8xi32, #tpu.memory_space<smem>>
    %226 = arith.index_cast %225 : i32 to index
    %c0_68 = arith.constant 0 : index
    %c0_69 = arith.constant 0 : index
    %227 = vector.load %arg15[%226, %c0_68, %c0_69] : memref<9x8x128xf32, #tpu.memory_space<vmem>>, vector<1x8x128xf32>
    %228 = vector.shape_cast %227 : vector<1x8x128xf32> to vector<8x128xf32>
    %229 = arith.index_cast %c3_i32 : i32 to index
    %230 = memref.load %arg2[%229] : memref<8xf32, #tpu.memory_space<smem>>
    %231 = vector.broadcast %230 : f32 to vector<8x128xf32>
    %232 = arith.mulf %228, %231 : vector<8x128xf32>
    %233 = arith.addf %223, %232 : vector<8x128xf32>
    %234 = tpu.concatenate %210, %233 in 1 : vector<8x128xf32>, vector<8x128xf32> -> vector<8x256xf32>
    %c0_70 = arith.constant 0 : index
    %c0_71 = arith.constant 0 : index
    %235 = vector.load %arg8[%c0_70, %c0_71] : memref<256x512xf32, #tpu.memory_space<vmem>>, vector<256x512xf32>
    %cst_72 = arith.constant dense<0.000000e+00> : vector<8x512xf32>
    %236 = tpu.matmul %234, %235, %cst_72 {dimension_numbers = #tpu.dot_dimension_numbers<[1], [0], [0], [1], [0, 0, 1, 1], [], []>} : vector<8x256xf32>, vector<256x512xf32>, vector<8x512xf32> -> vector<8x512xf32>
    %237 = vector.extract_strided_slice %236 {offsets = [0, 0], sizes = [8, 256], strides = [1, 1]} : vector<8x512xf32> to vector<8x256xf32>
    %238 = arith.addf %237, %6 : vector<8x256xf32>
    %239 = arith.negf %238 : vector<8x256xf32>
    %240 = math.exp %239 : vector<8x256xf32>
    %cst_73 = arith.constant 1.000000e+00 : f32
    %241 = vector.broadcast %cst_73 : f32 to vector<8x256xf32>
    %242 = arith.addf %241, %240 : vector<8x256xf32>
    %243 = arith.divf %241, %242 : vector<8x256xf32>
    %244 = vector.extract_strided_slice %243 {offsets = [0, 0], sizes = [8, 128], strides = [1, 1]} : vector<8x256xf32> to vector<8x128xf32>
    %245 = vector.extract_strided_slice %243 {offsets = [0, 128], sizes = [8, 128], strides = [1, 1]} : vector<8x256xf32> to vector<8x128xf32>
    %246 = vector.extract_strided_slice %236 {offsets = [0, 256], sizes = [8, 128], strides = [1, 1]} : vector<8x512xf32> to vector<8x128xf32>
    %247 = arith.addf %246, %9 : vector<8x128xf32>
    %248 = vector.extract_strided_slice %236 {offsets = [0, 384], sizes = [8, 128], strides = [1, 1]} : vector<8x512xf32> to vector<8x128xf32>
    %249 = arith.addf %248, %12 : vector<8x128xf32>
    %250 = arith.mulf %244, %249 : vector<8x128xf32>
    %251 = arith.addf %247, %250 : vector<8x128xf32>
    %252 = math.tanh %251 : vector<8x128xf32>
    %cst_74 = arith.constant 1.000000e+00 : f32
    %253 = vector.broadcast %cst_74 : f32 to vector<8x128xf32>
    %254 = arith.subf %253, %245 : vector<8x128xf32>
    %255 = arith.mulf %254, %252 : vector<8x128xf32>
    %256 = arith.mulf %245, %233 : vector<8x128xf32>
    %257 = arith.addf %255, %256 : vector<8x128xf32>
    %258 = arith.index_cast %c3_i32 : i32 to index
    %259 = memref.load %arg6[%258] : memref<8xi32, #tpu.memory_space<smem>>
    %260 = arith.index_cast %259 : i32 to index
    %c0_75 = arith.constant 0 : index
    %c0_76 = arith.constant 0 : index
    %261 = vector.load %arg15[%260, %c0_75, %c0_76] : memref<9x8x128xf32, #tpu.memory_space<vmem>>, vector<1x8x128xf32>
    %262 = vector.shape_cast %261 : vector<1x8x128xf32> to vector<8x128xf32>
    %263 = vector.shape_cast %257 : vector<8x128xf32> to vector<1x8x128xf32>
    tpu.vector_store %arg15[%260, %c0_75, %c0_76], %263 {strides = array<i32>} : memref<9x8x128xf32, #tpu.memory_space<vmem>>, vector<1x8x128xf32>,
    %264 = arith.index_cast %c3_i32 : i32 to index
    %265 = memref.load %arg3[%264] : memref<8xi32, #tpu.memory_space<smem>>
    %266 = arith.index_cast %265 : i32 to index
    %c0_77 = arith.constant 0 : index
    %c0_78 = arith.constant 0 : index
    %267 = vector.load %arg15[%266, %c0_77, %c0_78] : memref<9x8x128xf32, #tpu.memory_space<vmem>>, vector<1x8x128xf32>
    %268 = vector.shape_cast %267 : vector<1x8x128xf32> to vector<8x128xf32>
    %269 = arith.index_cast %c3_i32 : i32 to index
    %270 = memref.load %arg4[%269] : memref<8xf32, #tpu.memory_space<smem>>
    %271 = vector.broadcast %270 : f32 to vector<8x128xf32>
    %272 = arith.mulf %268, %271 : vector<8x128xf32>
    %273 = arith.addf %219, %272 : vector<8x128xf32>
    %c0_79 = arith.constant 0 : index
    %c0_80 = arith.constant 0 : index
    %274 = vector.load %arg12[%c0_79, %c0_80] : memref<128x128xf32, #tpu.memory_space<vmem>>, vector<128x128xf32>
    %cst_81 = arith.constant dense<0.000000e+00> : vector<8x128xf32>
    %275 = tpu.matmul %273, %274, %cst_81 {dimension_numbers = #tpu.dot_dimension_numbers<[1], [0], [0], [1], [0, 0, 1, 1], [], []>} : vector<8x128xf32>, vector<128x128xf32>, vector<8x128xf32> -> vector<8x128xf32>
    %276 = arith.addf %275, %15 : vector<8x128xf32>
    %277 = arith.index_cast %c3_i32 : i32 to index
    %c0_82 = arith.constant 0 : index
    %c0_83 = arith.constant 0 : index
    %278 = vector.load %arg14[%277, %c0_82, %c0_83] : memref<8x8x128xf32, #tpu.memory_space<vmem>>, vector<1x8x128xf32>
    %279 = vector.shape_cast %278 : vector<1x8x128xf32> to vector<8x128xf32>
    %280 = vector.shape_cast %276 : vector<8x128xf32> to vector<1x8x128xf32>
    tpu.vector_store %arg14[%277, %c0_82, %c0_83], %280 {strides = array<i32>} : memref<8x8x128xf32, #tpu.memory_space<vmem>>, vector<1x8x128xf32>,
    %c4_i32 = arith.constant 4 : i32
    %281 = arith.index_cast %c4_i32 : i32 to index
    %282 = memref.load %arg5[%281] : memref<8xi32, #tpu.memory_space<smem>>
    %283 = arith.index_cast %282 : i32 to index
    %c0_84 = arith.constant 0 : index
    %c0_85 = arith.constant 0 : index
    %284 = vector.load %arg15[%283, %c0_84, %c0_85] : memref<9x8x128xf32, #tpu.memory_space<vmem>>, vector<1x8x128xf32>
    %285 = vector.shape_cast %284 : vector<1x8x128xf32> to vector<8x128xf32>
    %286 = arith.index_cast %c4_i32 : i32 to index
    %287 = memref.load %arg0[%286] : memref<8xf32, #tpu.memory_space<smem>>
    %288 = vector.broadcast %287 : f32 to vector<8x128xf32>
    %289 = arith.mulf %285, %288 : vector<8x128xf32>
    %290 = arith.index_cast %c4_i32 : i32 to index
    %291 = memref.load %arg1[%290] : memref<8xi32, #tpu.memory_space<smem>>
    %292 = arith.index_cast %291 : i32 to index
    %c0_86 = arith.constant 0 : index
    %c0_87 = arith.constant 0 : index
    %293 = vector.load %arg15[%292, %c0_86, %c0_87] : memref<9x8x128xf32, #tpu.memory_space<vmem>>, vector<1x8x128xf32>
    %294 = vector.shape_cast %293 : vector<1x8x128xf32> to vector<8x128xf32>
    %295 = arith.index_cast %c4_i32 : i32 to index
    %296 = memref.load %arg2[%295] : memref<8xf32, #tpu.memory_space<smem>>
    %297 = vector.broadcast %296 : f32 to vector<8x128xf32>
    %298 = arith.mulf %294, %297 : vector<8x128xf32>
    %299 = arith.addf %289, %298 : vector<8x128xf32>
    %300 = tpu.concatenate %276, %299 in 1 : vector<8x128xf32>, vector<8x128xf32> -> vector<8x256xf32>
    %c0_88 = arith.constant 0 : index
    %c0_89 = arith.constant 0 : index
    %301 = vector.load %arg8[%c0_88, %c0_89] : memref<256x512xf32, #tpu.memory_space<vmem>>, vector<256x512xf32>
    %cst_90 = arith.constant dense<0.000000e+00> : vector<8x512xf32>
    %302 = tpu.matmul %300, %301, %cst_90 {dimension_numbers = #tpu.dot_dimension_numbers<[1], [0], [0], [1], [0, 0, 1, 1], [], []>} : vector<8x256xf32>, vector<256x512xf32>, vector<8x512xf32> -> vector<8x512xf32>
    %303 = vector.extract_strided_slice %302 {offsets = [0, 0], sizes = [8, 256], strides = [1, 1]} : vector<8x512xf32> to vector<8x256xf32>
    %304 = arith.addf %303, %6 : vector<8x256xf32>
    %305 = arith.negf %304 : vector<8x256xf32>
    %306 = math.exp %305 : vector<8x256xf32>
    %cst_91 = arith.constant 1.000000e+00 : f32
    %307 = vector.broadcast %cst_91 : f32 to vector<8x256xf32>
    %308 = arith.addf %307, %306 : vector<8x256xf32>
    %309 = arith.divf %307, %308 : vector<8x256xf32>
    %310 = vector.extract_strided_slice %309 {offsets = [0, 0], sizes = [8, 128], strides = [1, 1]} : vector<8x256xf32> to vector<8x128xf32>
    %311 = vector.extract_strided_slice %309 {offsets = [0, 128], sizes = [8, 128], strides = [1, 1]} : vector<8x256xf32> to vector<8x128xf32>
    %312 = vector.extract_strided_slice %302 {offsets = [0, 256], sizes = [8, 128], strides = [1, 1]} : vector<8x512xf32> to vector<8x128xf32>
    %313 = arith.addf %312, %9 : vector<8x128xf32>
    %314 = vector.extract_strided_slice %302 {offsets = [0, 384], sizes = [8, 128], strides = [1, 1]} : vector<8x512xf32> to vector<8x128xf32>
    %315 = arith.addf %314, %12 : vector<8x128xf32>
    %316 = arith.mulf %310, %315 : vector<8x128xf32>
    %317 = arith.addf %313, %316 : vector<8x128xf32>
    %318 = math.tanh %317 : vector<8x128xf32>
    %cst_92 = arith.constant 1.000000e+00 : f32
    %319 = vector.broadcast %cst_92 : f32 to vector<8x128xf32>
    %320 = arith.subf %319, %311 : vector<8x128xf32>
    %321 = arith.mulf %320, %318 : vector<8x128xf32>
    %322 = arith.mulf %311, %299 : vector<8x128xf32>
    %323 = arith.addf %321, %322 : vector<8x128xf32>
    %324 = arith.index_cast %c4_i32 : i32 to index
    %325 = memref.load %arg6[%324] : memref<8xi32, #tpu.memory_space<smem>>
    %326 = arith.index_cast %325 : i32 to index
    %c0_93 = arith.constant 0 : index
    %c0_94 = arith.constant 0 : index
    %327 = vector.load %arg15[%326, %c0_93, %c0_94] : memref<9x8x128xf32, #tpu.memory_space<vmem>>, vector<1x8x128xf32>
    %328 = vector.shape_cast %327 : vector<1x8x128xf32> to vector<8x128xf32>
    %329 = vector.shape_cast %323 : vector<8x128xf32> to vector<1x8x128xf32>
    tpu.vector_store %arg15[%326, %c0_93, %c0_94], %329 {strides = array<i32>} : memref<9x8x128xf32, #tpu.memory_space<vmem>>, vector<1x8x128xf32>,
    %330 = arith.index_cast %c4_i32 : i32 to index
    %331 = memref.load %arg3[%330] : memref<8xi32, #tpu.memory_space<smem>>
    %332 = arith.index_cast %331 : i32 to index
    %c0_95 = arith.constant 0 : index
    %c0_96 = arith.constant 0 : index
    %333 = vector.load %arg15[%332, %c0_95, %c0_96] : memref<9x8x128xf32, #tpu.memory_space<vmem>>, vector<1x8x128xf32>
    %334 = vector.shape_cast %333 : vector<1x8x128xf32> to vector<8x128xf32>
    %335 = arith.index_cast %c4_i32 : i32 to index
    %336 = memref.load %arg4[%335] : memref<8xf32, #tpu.memory_space<smem>>
    %337 = vector.broadcast %336 : f32 to vector<8x128xf32>
    %338 = arith.mulf %334, %337 : vector<8x128xf32>
    %339 = arith.addf %285, %338 : vector<8x128xf32>
    %c0_97 = arith.constant 0 : index
    %c0_98 = arith.constant 0 : index
    %340 = vector.load %arg12[%c0_97, %c0_98] : memref<128x128xf32, #tpu.memory_space<vmem>>, vector<128x128xf32>
    %cst_99 = arith.constant dense<0.000000e+00> : vector<8x128xf32>
    %341 = tpu.matmul %339, %340, %cst_99 {dimension_numbers = #tpu.dot_dimension_numbers<[1], [0], [0], [1], [0, 0, 1, 1], [], []>} : vector<8x128xf32>, vector<128x128xf32>, vector<8x128xf32> -> vector<8x128xf32>
    %342 = arith.addf %341, %15 : vector<8x128xf32>
    %343 = arith.index_cast %c4_i32 : i32 to index
    %c0_100 = arith.constant 0 : index
    %c0_101 = arith.constant 0 : index
    %344 = vector.load %arg14[%343, %c0_100, %c0_101] : memref<8x8x128xf32, #tpu.memory_space<vmem>>, vector<1x8x128xf32>
    %345 = vector.shape_cast %344 : vector<1x8x128xf32> to vector<8x128xf32>
    %346 = vector.shape_cast %342 : vector<8x128xf32> to vector<1x8x128xf32>
    tpu.vector_store %arg14[%343, %c0_100, %c0_101], %346 {strides = array<i32>} : memref<8x8x128xf32, #tpu.memory_space<vmem>>, vector<1x8x128xf32>,
    %c5_i32 = arith.constant 5 : i32
    %347 = arith.index_cast %c5_i32 : i32 to index
    %348 = memref.load %arg5[%347] : memref<8xi32, #tpu.memory_space<smem>>
    %349 = arith.index_cast %348 : i32 to index
    %c0_102 = arith.constant 0 : index
    %c0_103 = arith.constant 0 : index
    %350 = vector.load %arg15[%349, %c0_102, %c0_103] : memref<9x8x128xf32, #tpu.memory_space<vmem>>, vector<1x8x128xf32>
    %351 = vector.shape_cast %350 : vector<1x8x128xf32> to vector<8x128xf32>
    %352 = arith.index_cast %c5_i32 : i32 to index
    %353 = memref.load %arg0[%352] : memref<8xf32, #tpu.memory_space<smem>>
    %354 = vector.broadcast %353 : f32 to vector<8x128xf32>
    %355 = arith.mulf %351, %354 : vector<8x128xf32>
    %356 = arith.index_cast %c5_i32 : i32 to index
    %357 = memref.load %arg1[%356] : memref<8xi32, #tpu.memory_space<smem>>
    %358 = arith.index_cast %357 : i32 to index
    %c0_104 = arith.constant 0 : index
    %c0_105 = arith.constant 0 : index
    %359 = vector.load %arg15[%358, %c0_104, %c0_105] : memref<9x8x128xf32, #tpu.memory_space<vmem>>, vector<1x8x128xf32>
    %360 = vector.shape_cast %359 : vector<1x8x128xf32> to vector<8x128xf32>
    %361 = arith.index_cast %c5_i32 : i32 to index
    %362 = memref.load %arg2[%361] : memref<8xf32, #tpu.memory_space<smem>>
    %363 = vector.broadcast %362 : f32 to vector<8x128xf32>
    %364 = arith.mulf %360, %363 : vector<8x128xf32>
    %365 = arith.addf %355, %364 : vector<8x128xf32>
    %366 = tpu.concatenate %342, %365 in 1 : vector<8x128xf32>, vector<8x128xf32> -> vector<8x256xf32>
    %c0_106 = arith.constant 0 : index
    %c0_107 = arith.constant 0 : index
    %367 = vector.load %arg8[%c0_106, %c0_107] : memref<256x512xf32, #tpu.memory_space<vmem>>, vector<256x512xf32>
    %cst_108 = arith.constant dense<0.000000e+00> : vector<8x512xf32>
    %368 = tpu.matmul %366, %367, %cst_108 {dimension_numbers = #tpu.dot_dimension_numbers<[1], [0], [0], [1], [0, 0, 1, 1], [], []>} : vector<8x256xf32>, vector<256x512xf32>, vector<8x512xf32> -> vector<8x512xf32>
    %369 = vector.extract_strided_slice %368 {offsets = [0, 0], sizes = [8, 256], strides = [1, 1]} : vector<8x512xf32> to vector<8x256xf32>
    %370 = arith.addf %369, %6 : vector<8x256xf32>
    %371 = arith.negf %370 : vector<8x256xf32>
    %372 = math.exp %371 : vector<8x256xf32>
    %cst_109 = arith.constant 1.000000e+00 : f32
    %373 = vector.broadcast %cst_109 : f32 to vector<8x256xf32>
    %374 = arith.addf %373, %372 : vector<8x256xf32>
    %375 = arith.divf %373, %374 : vector<8x256xf32>
    %376 = vector.extract_strided_slice %375 {offsets = [0, 0], sizes = [8, 128], strides = [1, 1]} : vector<8x256xf32> to vector<8x128xf32>
    %377 = vector.extract_strided_slice %375 {offsets = [0, 128], sizes = [8, 128], strides = [1, 1]} : vector<8x256xf32> to vector<8x128xf32>
    %378 = vector.extract_strided_slice %368 {offsets = [0, 256], sizes = [8, 128], strides = [1, 1]} : vector<8x512xf32> to vector<8x128xf32>
    %379 = arith.addf %378, %9 : vector<8x128xf32>
    %380 = vector.extract_strided_slice %368 {offsets = [0, 384], sizes = [8, 128], strides = [1, 1]} : vector<8x512xf32> to vector<8x128xf32>
    %381 = arith.addf %380, %12 : vector<8x128xf32>
    %382 = arith.mulf %376, %381 : vector<8x128xf32>
    %383 = arith.addf %379, %382 : vector<8x128xf32>
    %384 = math.tanh %383 : vector<8x128xf32>
    %cst_110 = arith.constant 1.000000e+00 : f32
    %385 = vector.broadcast %cst_110 : f32 to vector<8x128xf32>
    %386 = arith.subf %385, %377 : vector<8x128xf32>
    %387 = arith.mulf %386, %384 : vector<8x128xf32>
    %388 = arith.mulf %377, %365 : vector<8x128xf32>
    %389 = arith.addf %387, %388 : vector<8x128xf32>
    %390 = arith.index_cast %c5_i32 : i32 to index
    %391 = memref.load %arg6[%390] : memref<8xi32, #tpu.memory_space<smem>>
    %392 = arith.index_cast %391 : i32 to index
    %c0_111 = arith.constant 0 : index
    %c0_112 = arith.constant 0 : index
    %393 = vector.load %arg15[%392, %c0_111, %c0_112] : memref<9x8x128xf32, #tpu.memory_space<vmem>>, vector<1x8x128xf32>
    %394 = vector.shape_cast %393 : vector<1x8x128xf32> to vector<8x128xf32>
    %395 = vector.shape_cast %389 : vector<8x128xf32> to vector<1x8x128xf32>
    tpu.vector_store %arg15[%392, %c0_111, %c0_112], %395 {strides = array<i32>} : memref<9x8x128xf32, #tpu.memory_space<vmem>>, vector<1x8x128xf32>,
    %396 = arith.index_cast %c5_i32 : i32 to index
    %397 = memref.load %arg3[%396] : memref<8xi32, #tpu.memory_space<smem>>
    %398 = arith.index_cast %397 : i32 to index
    %c0_113 = arith.constant 0 : index
    %c0_114 = arith.constant 0 : index
    %399 = vector.load %arg15[%398, %c0_113, %c0_114] : memref<9x8x128xf32, #tpu.memory_space<vmem>>, vector<1x8x128xf32>
    %400 = vector.shape_cast %399 : vector<1x8x128xf32> to vector<8x128xf32>
    %401 = arith.index_cast %c5_i32 : i32 to index
    %402 = memref.load %arg4[%401] : memref<8xf32, #tpu.memory_space<smem>>
    %403 = vector.broadcast %402 : f32 to vector<8x128xf32>
    %404 = arith.mulf %400, %403 : vector<8x128xf32>
    %405 = arith.addf %351, %404 : vector<8x128xf32>
    %c0_115 = arith.constant 0 : index
    %c0_116 = arith.constant 0 : index
    %406 = vector.load %arg12[%c0_115, %c0_116] : memref<128x128xf32, #tpu.memory_space<vmem>>, vector<128x128xf32>
    %cst_117 = arith.constant dense<0.000000e+00> : vector<8x128xf32>
    %407 = tpu.matmul %405, %406, %cst_117 {dimension_numbers = #tpu.dot_dimension_numbers<[1], [0], [0], [1], [0, 0, 1, 1], [], []>} : vector<8x128xf32>, vector<128x128xf32>, vector<8x128xf32> -> vector<8x128xf32>
    %408 = arith.addf %407, %15 : vector<8x128xf32>
    %409 = arith.index_cast %c5_i32 : i32 to index
    %c0_118 = arith.constant 0 : index
    %c0_119 = arith.constant 0 : index
    %410 = vector.load %arg14[%409, %c0_118, %c0_119] : memref<8x8x128xf32, #tpu.memory_space<vmem>>, vector<1x8x128xf32>
    %411 = vector.shape_cast %410 : vector<1x8x128xf32> to vector<8x128xf32>
    %412 = vector.shape_cast %408 : vector<8x128xf32> to vector<1x8x128xf32>
    tpu.vector_store %arg14[%409, %c0_118, %c0_119], %412 {strides = array<i32>} : memref<8x8x128xf32, #tpu.memory_space<vmem>>, vector<1x8x128xf32>,
    %c6_i32 = arith.constant 6 : i32
    %413 = arith.index_cast %c6_i32 : i32 to index
    %414 = memref.load %arg5[%413] : memref<8xi32, #tpu.memory_space<smem>>
    %415 = arith.index_cast %414 : i32 to index
    %c0_120 = arith.constant 0 : index
    %c0_121 = arith.constant 0 : index
    %416 = vector.load %arg15[%415, %c0_120, %c0_121] : memref<9x8x128xf32, #tpu.memory_space<vmem>>, vector<1x8x128xf32>
    %417 = vector.shape_cast %416 : vector<1x8x128xf32> to vector<8x128xf32>
    %418 = arith.index_cast %c6_i32 : i32 to index
    %419 = memref.load %arg0[%418] : memref<8xf32, #tpu.memory_space<smem>>
    %420 = vector.broadcast %419 : f32 to vector<8x128xf32>
    %421 = arith.mulf %417, %420 : vector<8x128xf32>
    %422 = arith.index_cast %c6_i32 : i32 to index
    %423 = memref.load %arg1[%422] : memref<8xi32, #tpu.memory_space<smem>>
    %424 = arith.index_cast %423 : i32 to index
    %c0_122 = arith.constant 0 : index
    %c0_123 = arith.constant 0 : index
    %425 = vector.load %arg15[%424, %c0_122, %c0_123] : memref<9x8x128xf32, #tpu.memory_space<vmem>>, vector<1x8x128xf32>
    %426 = vector.shape_cast %425 : vector<1x8x128xf32> to vector<8x128xf32>
    %427 = arith.index_cast %c6_i32 : i32 to index
    %428 = memref.load %arg2[%427] : memref<8xf32, #tpu.memory_space<smem>>
    %429 = vector.broadcast %428 : f32 to vector<8x128xf32>
    %430 = arith.mulf %426, %429 : vector<8x128xf32>
    %431 = arith.addf %421, %430 : vector<8x128xf32>
    %432 = tpu.concatenate %408, %431 in 1 : vector<8x128xf32>, vector<8x128xf32> -> vector<8x256xf32>
    %c0_124 = arith.constant 0 : index
    %c0_125 = arith.constant 0 : index
    %433 = vector.load %arg8[%c0_124, %c0_125] : memref<256x512xf32, #tpu.memory_space<vmem>>, vector<256x512xf32>
    %cst_126 = arith.constant dense<0.000000e+00> : vector<8x512xf32>
    %434 = tpu.matmul %432, %433, %cst_126 {dimension_numbers = #tpu.dot_dimension_numbers<[1], [0], [0], [1], [0, 0, 1, 1], [], []>} : vector<8x256xf32>, vector<256x512xf32>, vector<8x512xf32> -> vector<8x512xf32>
    %435 = vector.extract_strided_slice %434 {offsets = [0, 0], sizes = [8, 256], strides = [1, 1]} : vector<8x512xf32> to vector<8x256xf32>
    %436 = arith.addf %435, %6 : vector<8x256xf32>
    %437 = arith.negf %436 : vector<8x256xf32>
    %438 = math.exp %437 : vector<8x256xf32>
    %cst_127 = arith.constant 1.000000e+00 : f32
    %439 = vector.broadcast %cst_127 : f32 to vector<8x256xf32>
    %440 = arith.addf %439, %438 : vector<8x256xf32>
    %441 = arith.divf %439, %440 : vector<8x256xf32>
    %442 = vector.extract_strided_slice %441 {offsets = [0, 0], sizes = [8, 128], strides = [1, 1]} : vector<8x256xf32> to vector<8x128xf32>
    %443 = vector.extract_strided_slice %441 {offsets = [0, 128], sizes = [8, 128], strides = [1, 1]} : vector<8x256xf32> to vector<8x128xf32>
    %444 = vector.extract_strided_slice %434 {offsets = [0, 256], sizes = [8, 128], strides = [1, 1]} : vector<8x512xf32> to vector<8x128xf32>
    %445 = arith.addf %444, %9 : vector<8x128xf32>
    %446 = vector.extract_strided_slice %434 {offsets = [0, 384], sizes = [8, 128], strides = [1, 1]} : vector<8x512xf32> to vector<8x128xf32>
    %447 = arith.addf %446, %12 : vector<8x128xf32>
    %448 = arith.mulf %442, %447 : vector<8x128xf32>
    %449 = arith.addf %445, %448 : vector<8x128xf32>
    %450 = math.tanh %449 : vector<8x128xf32>
    %cst_128 = arith.constant 1.000000e+00 : f32
    %451 = vector.broadcast %cst_128 : f32 to vector<8x128xf32>
    %452 = arith.subf %451, %443 : vector<8x128xf32>
    %453 = arith.mulf %452, %450 : vector<8x128xf32>
    %454 = arith.mulf %443, %431 : vector<8x128xf32>
    %455 = arith.addf %453, %454 : vector<8x128xf32>
    %456 = arith.index_cast %c6_i32 : i32 to index
    %457 = memref.load %arg6[%456] : memref<8xi32, #tpu.memory_space<smem>>
    %458 = arith.index_cast %457 : i32 to index
    %c0_129 = arith.constant 0 : index
    %c0_130 = arith.constant 0 : index
    %459 = vector.load %arg15[%458, %c0_129, %c0_130] : memref<9x8x128xf32, #tpu.memory_space<vmem>>, vector<1x8x128xf32>
    %460 = vector.shape_cast %459 : vector<1x8x128xf32> to vector<8x128xf32>
    %461 = vector.shape_cast %455 : vector<8x128xf32> to vector<1x8x128xf32>
    tpu.vector_store %arg15[%458, %c0_129, %c0_130], %461 {strides = array<i32>} : memref<9x8x128xf32, #tpu.memory_space<vmem>>, vector<1x8x128xf32>,
    %462 = arith.index_cast %c6_i32 : i32 to index
    %463 = memref.load %arg3[%462] : memref<8xi32, #tpu.memory_space<smem>>
    %464 = arith.index_cast %463 : i32 to index
    %c0_131 = arith.constant 0 : index
    %c0_132 = arith.constant 0 : index
    %465 = vector.load %arg15[%464, %c0_131, %c0_132] : memref<9x8x128xf32, #tpu.memory_space<vmem>>, vector<1x8x128xf32>
    %466 = vector.shape_cast %465 : vector<1x8x128xf32> to vector<8x128xf32>
    %467 = arith.index_cast %c6_i32 : i32 to index
    %468 = memref.load %arg4[%467] : memref<8xf32, #tpu.memory_space<smem>>
    %469 = vector.broadcast %468 : f32 to vector<8x128xf32>
    %470 = arith.mulf %466, %469 : vector<8x128xf32>
    %471 = arith.addf %417, %470 : vector<8x128xf32>
    %c0_133 = arith.constant 0 : index
    %c0_134 = arith.constant 0 : index
    %472 = vector.load %arg12[%c0_133, %c0_134] : memref<128x128xf32, #tpu.memory_space<vmem>>, vector<128x128xf32>
    %cst_135 = arith.constant dense<0.000000e+00> : vector<8x128xf32>
    %473 = tpu.matmul %471, %472, %cst_135 {dimension_numbers = #tpu.dot_dimension_numbers<[1], [0], [0], [1], [0, 0, 1, 1], [], []>} : vector<8x128xf32>, vector<128x128xf32>, vector<8x128xf32> -> vector<8x128xf32>
    %474 = arith.addf %473, %15 : vector<8x128xf32>
    %475 = arith.index_cast %c6_i32 : i32 to index
    %c0_136 = arith.constant 0 : index
    %c0_137 = arith.constant 0 : index
    %476 = vector.load %arg14[%475, %c0_136, %c0_137] : memref<8x8x128xf32, #tpu.memory_space<vmem>>, vector<1x8x128xf32>
    %477 = vector.shape_cast %476 : vector<1x8x128xf32> to vector<8x128xf32>
    %478 = vector.shape_cast %474 : vector<8x128xf32> to vector<1x8x128xf32>
    tpu.vector_store %arg14[%475, %c0_136, %c0_137], %478 {strides = array<i32>} : memref<8x8x128xf32, #tpu.memory_space<vmem>>, vector<1x8x128xf32>,
    %c7_i32 = arith.constant 7 : i32
    %479 = arith.index_cast %c7_i32 : i32 to index
    %480 = memref.load %arg5[%479] : memref<8xi32, #tpu.memory_space<smem>>
    %481 = arith.index_cast %480 : i32 to index
    %c0_138 = arith.constant 0 : index
    %c0_139 = arith.constant 0 : index
    %482 = vector.load %arg15[%481, %c0_138, %c0_139] : memref<9x8x128xf32, #tpu.memory_space<vmem>>, vector<1x8x128xf32>
    %483 = vector.shape_cast %482 : vector<1x8x128xf32> to vector<8x128xf32>
    %484 = arith.index_cast %c7_i32 : i32 to index
    %485 = memref.load %arg0[%484] : memref<8xf32, #tpu.memory_space<smem>>
    %486 = vector.broadcast %485 : f32 to vector<8x128xf32>
    %487 = arith.mulf %483, %486 : vector<8x128xf32>
    %488 = arith.index_cast %c7_i32 : i32 to index
    %489 = memref.load %arg1[%488] : memref<8xi32, #tpu.memory_space<smem>>
    %490 = arith.index_cast %489 : i32 to index
    %c0_140 = arith.constant 0 : index
    %c0_141 = arith.constant 0 : index
    %491 = vector.load %arg15[%490, %c0_140, %c0_141] : memref<9x8x128xf32, #tpu.memory_space<vmem>>, vector<1x8x128xf32>
    %492 = vector.shape_cast %491 : vector<1x8x128xf32> to vector<8x128xf32>
    %493 = arith.index_cast %c7_i32 : i32 to index
    %494 = memref.load %arg2[%493] : memref<8xf32, #tpu.memory_space<smem>>
    %495 = vector.broadcast %494 : f32 to vector<8x128xf32>
    %496 = arith.mulf %492, %495 : vector<8x128xf32>
    %497 = arith.addf %487, %496 : vector<8x128xf32>
    %498 = tpu.concatenate %474, %497 in 1 : vector<8x128xf32>, vector<8x128xf32> -> vector<8x256xf32>
    %c0_142 = arith.constant 0 : index
    %c0_143 = arith.constant 0 : index
    %499 = vector.load %arg8[%c0_142, %c0_143] : memref<256x512xf32, #tpu.memory_space<vmem>>, vector<256x512xf32>
    %cst_144 = arith.constant dense<0.000000e+00> : vector<8x512xf32>
    %500 = tpu.matmul %498, %499, %cst_144 {dimension_numbers = #tpu.dot_dimension_numbers<[1], [0], [0], [1], [0, 0, 1, 1], [], []>} : vector<8x256xf32>, vector<256x512xf32>, vector<8x512xf32> -> vector<8x512xf32>
    %501 = vector.extract_strided_slice %500 {offsets = [0, 0], sizes = [8, 256], strides = [1, 1]} : vector<8x512xf32> to vector<8x256xf32>
    %502 = arith.addf %501, %6 : vector<8x256xf32>
    %503 = arith.negf %502 : vector<8x256xf32>
    %504 = math.exp %503 : vector<8x256xf32>
    %cst_145 = arith.constant 1.000000e+00 : f32
    %505 = vector.broadcast %cst_145 : f32 to vector<8x256xf32>
    %506 = arith.addf %505, %504 : vector<8x256xf32>
    %507 = arith.divf %505, %506 : vector<8x256xf32>
    %508 = vector.extract_strided_slice %507 {offsets = [0, 0], sizes = [8, 128], strides = [1, 1]} : vector<8x256xf32> to vector<8x128xf32>
    %509 = vector.extract_strided_slice %507 {offsets = [0, 128], sizes = [8, 128], strides = [1, 1]} : vector<8x256xf32> to vector<8x128xf32>
    %510 = vector.extract_strided_slice %500 {offsets = [0, 256], sizes = [8, 128], strides = [1, 1]} : vector<8x512xf32> to vector<8x128xf32>
    %511 = arith.addf %510, %9 : vector<8x128xf32>
    %512 = vector.extract_strided_slice %500 {offsets = [0, 384], sizes = [8, 128], strides = [1, 1]} : vector<8x512xf32> to vector<8x128xf32>
    %513 = arith.addf %512, %12 : vector<8x128xf32>
    %514 = arith.mulf %508, %513 : vector<8x128xf32>
    %515 = arith.addf %511, %514 : vector<8x128xf32>
    %516 = math.tanh %515 : vector<8x128xf32>
    %cst_146 = arith.constant 1.000000e+00 : f32
    %517 = vector.broadcast %cst_146 : f32 to vector<8x128xf32>
    %518 = arith.subf %517, %509 : vector<8x128xf32>
    %519 = arith.mulf %518, %516 : vector<8x128xf32>
    %520 = arith.mulf %509, %497 : vector<8x128xf32>
    %521 = arith.addf %519, %520 : vector<8x128xf32>
    %522 = arith.index_cast %c7_i32 : i32 to index
    %523 = memref.load %arg6[%522] : memref<8xi32, #tpu.memory_space<smem>>
    %524 = arith.index_cast %523 : i32 to index
    %c0_147 = arith.constant 0 : index
    %c0_148 = arith.constant 0 : index
    %525 = vector.load %arg15[%524, %c0_147, %c0_148] : memref<9x8x128xf32, #tpu.memory_space<vmem>>, vector<1x8x128xf32>
    %526 = vector.shape_cast %525 : vector<1x8x128xf32> to vector<8x128xf32>
    %527 = vector.shape_cast %521 : vector<8x128xf32> to vector<1x8x128xf32>
    tpu.vector_store %arg15[%524, %c0_147, %c0_148], %527 {strides = array<i32>} : memref<9x8x128xf32, #tpu.memory_space<vmem>>, vector<1x8x128xf32>,
    %528 = arith.index_cast %c7_i32 : i32 to index
    %529 = memref.load %arg3[%528] : memref<8xi32, #tpu.memory_space<smem>>
    %530 = arith.index_cast %529 : i32 to index
    %c0_149 = arith.constant 0 : index
    %c0_150 = arith.constant 0 : index
    %531 = vector.load %arg15[%530, %c0_149, %c0_150] : memref<9x8x128xf32, #tpu.memory_space<vmem>>, vector<1x8x128xf32>
    %532 = vector.shape_cast %531 : vector<1x8x128xf32> to vector<8x128xf32>
    %533 = arith.index_cast %c7_i32 : i32 to index
    %534 = memref.load %arg4[%533] : memref<8xf32, #tpu.memory_space<smem>>
    %535 = vector.broadcast %534 : f32 to vector<8x128xf32>
    %536 = arith.mulf %532, %535 : vector<8x128xf32>
    %537 = arith.addf %483, %536 : vector<8x128xf32>
    %c0_151 = arith.constant 0 : index
    %c0_152 = arith.constant 0 : index
    %538 = vector.load %arg12[%c0_151, %c0_152] : memref<128x128xf32, #tpu.memory_space<vmem>>, vector<128x128xf32>
    %cst_153 = arith.constant dense<0.000000e+00> : vector<8x128xf32>
    %539 = tpu.matmul %537, %538, %cst_153 {dimension_numbers = #tpu.dot_dimension_numbers<[1], [0], [0], [1], [0, 0, 1, 1], [], []>} : vector<8x128xf32>, vector<128x128xf32>, vector<8x128xf32> -> vector<8x128xf32>
    %540 = arith.addf %539, %15 : vector<8x128xf32>
    %541 = arith.index_cast %c7_i32 : i32 to index
    %c0_154 = arith.constant 0 : index
    %c0_155 = arith.constant 0 : index
    %542 = vector.load %arg14[%541, %c0_154, %c0_155] : memref<8x8x128xf32, #tpu.memory_space<vmem>>, vector<1x8x128xf32>
    %543 = vector.shape_cast %542 : vector<1x8x128xf32> to vector<8x128xf32>
    %544 = vector.shape_cast %540 : vector<8x128xf32> to vector<1x8x128xf32>
    tpu.vector_store %arg14[%541, %c0_154, %c0_155], %544 {strides = array<i32>} : memref<8x8x128xf32, #tpu.memory_space<vmem>>, vector<1x8x128xf32>,
    %c8_i32 = arith.constant 8 : i32
    return
  }
}

</mosaic_0001>

<bundles_post_ra>
// kernel: tpu_custom_call.1
= control target key start
LH: loop header
LB: loop body
LE: loop exit
PB: predicated region body
PF: predicated region fallthrough
CT: control target
= control target key end

     0   :  { %19 = vsyncpa [#allocation6], 0  ;;  %s7106_s0 = inlined_call_operand.hbm [shape: f32[8], index: 0, kind: input, shape index: {}]   ;;  %s7107_s1 = inlined_call_operand.vmem [shape: s32[8], index: 1, kind: input, shape index: {}]   ;;  %s7108_s2 = inlined_call_operand.vmem [shape: f32[8], index: 2, kind: input, shape index: {}]   ;;  %s7109_s3 = inlined_call_operand.vmem [shape: s32[8], index: 3, kind: input, shape index: {}]   ;;  %s7110_s4 = inlined_call_operand.vmem [shape: f32[8], index: 4, kind: input, shape index: {}]   ;;  %s7111_s5 = inlined_call_operand.vmem [shape: s32[8], index: 5, kind: input, shape index: {}]   ;;  %s7112_s6 = inlined_call_operand.vmem [shape: s32[8], index: 6, kind: input, shape index: {}]   ;;  %s7113_s7 = inlined_call_operand.vmem [shape: f32[8,128], index: 7, kind: input, shape index: {}]   ;;  %s7114_s8 = inlined_call_operand.hbm [shape: f32[256,512], index: 8, kind: input, shape index: {}]   ;;  %s7115_s9 = inlined_call_operand.vmem [shape: f32[1,256], index: 9, kind: input, shape index: {}]   ;;  %s7116_s10 = inlined_call_operand.vmem [shape: f32[1,128], index: 10, kind: input, shape index: {}]   ;;  %s7117_s11 = inlined_call_operand.vmem [shape: f32[1,128], index: 11, kind: input, shape index: {}]   ;;  %s7118_s12 = inlined_call_operand.hbm [shape: f32[128,128], index: 12, kind: input, shape index: {}]   ;;  %s7119_s13 = inlined_call_operand.vmem [shape: f32[1,128], index: 13, kind: input, shape index: {}]   ;;  %s7120_s14 = inlined_call_operand.hbm [shape: f32[8,8,128], index: 14, kind: output, shape index: {}]  }
   0x1   :  { %20 = vsyncpa [#allocation7], 0 }
   0x2   :  { %21 = vsyncpa [#allocation10], 0 }
   0x3   :  { %22 = vsyncpa [#allocation13], 0 }
   0x4   :  { %23 = vsyncpa [#allocation16], 0 }
   0x5   :  { %24 = vsyncpa [#allocation4], 0 }
   0x6   :  { %25 = vsyncpa [#allocation19], 0  ;;  %s51_s15 = sshll.u32 %s7108_s2, 4  ;;  %s52_s15 = int_to_ptr.vmem [resolvable:$true] %s51_s15 }
   0x7   :  { %26 = vsyncpa [#allocation5], 0  ;;  %s71_s18 = sshll.u32 %s7110_s4, 4  ;;  %s5377_s19 = scalar_lea.vmem %s52_s15, 16  ;;  %s72_s18 = int_to_ptr.vmem [resolvable:$true] %s71_s18 }
   0x8   :  { %p5378_p0 = scmp.ne.s32.totalorder %s52_s15, %s5377_s19  ;;  %p5382_p1 = scmp.lt.s32.totalorder %s52_s15, %s52_s15 }
   0x9   :  { %p5383_p2 = scmp.lt.s32.totalorder %s5377_s19, %s5377_s19 }
   0xb   :  { %p5384_p3 = por %p5383_p2, %p5382_p1 }
   0xd   :  { %p5385_p4 = pnand %p5384_p3, %p5378_p0 }
   0xf   :  { %5388 = shalt.err (!%p5385_p4)
}
  0x10   :  { %s5541_s20 = smov [#allocation9]   ;;  %s5389_s21 = scalar_lea.vmem %s72_s18, 16 }
  0x11   :  { %54 = dma.vmem_to_smem %s52_s15, 16, %s5541_s20, [#allocation10]  }
  0x12   :  { %p5390_p5 = scmp.ne.s32.totalorder %s72_s18, %s5389_s21  ;;  %p5394_p6 = scmp.lt.s32.totalorder %s72_s18, %s72_s18 }
  0x13   :  { %p5395_p7 = scmp.lt.s32.totalorder %s5389_s21, %s5389_s21 }
  0x15   :  { %p5396_p8 = por %p5395_p7, %p5394_p6 }
  0x17   :  { %p5397_p9 = pnand %p5396_p8, %p5390_p5 }
  0x19   :  { %5400 = shalt.err (!%p5397_p9)
}
  0x1a   :  { %s5542_s2 = smov [#allocation12]   ;;  %s41_s23 = sshll.u32 %s7107_s1, 4  ;;  %s42_s23 = int_to_ptr.vmem [resolvable:$true] %s41_s23 }
  0x1b   :  { %74 = dma.vmem_to_smem %s72_s18, 16, %s5542_s2, [#allocation13]  }
  0x1c   :  { %s5401_s26 = scalar_lea.hbm %s7106_s0, 16 }
  0x1d   :  { %p5402_p10 = scmp.ne.s32.totalorder %s7106_s0, %s5401_s26  ;;  %p5405_p11 = scmp.lt.u32.totalorder %s5401_s26, %s7106_s0 }
  0x1f   :  { %p5407_p12 = pnand %p5405_p11, %p5402_p10 }
  0x21   :  { %5410 = shalt.err (!%p5407_p12)
}
  0x22   :  { %s5543_s15 = smov [#allocation3]   ;;  %s5411_s1 = scalar_lea.vmem %s42_s23, 16 }
  0x23   :  { %34 = dma.hbm_to_smem %s7106_s0, 16, %s5543_s15, [#allocation6]  }
  0x24   :  { %p5412_p13 = scmp.ne.s32.totalorder %s42_s23, %s5411_s1  ;;  %p5416_p0 = scmp.lt.s32.totalorder %s42_s23, %s42_s23 }
  0x25   :  { %p5417_p1 = scmp.lt.s32.totalorder %s5411_s1, %s5411_s1 }
  0x27   :  { %p5418_p2 = por %p5417_p1, %p5416_p0 }
  0x29   :  { %p5419_p3 = pnand %p5418_p2, %p5412_p13 }
  0x2b   :  { %5422 = shalt.err (!%p5419_p3)
}
  0x2c   :  { %s5544_s18 = smov [#allocation8]   ;;  %s61_s21 = sshll.u32 %s7109_s3, 4  ;;  %s62_s21 = int_to_ptr.vmem [resolvable:$true] %s61_s21 }
  0x2d   :  { %44 = dma.vmem_to_smem %s42_s23, 16, %s5544_s18, [#allocation7]  }
  0x2e   :  { %s81_s22 = sshll.u32 %s7111_s5, 4  ;;  %s5423_s0 = scalar_lea.vmem %s62_s21, 16  ;;  %s82_s22 = int_to_ptr.vmem [resolvable:$true] %s81_s22 }
  0x2f   :  { %p5424_p4 = scmp.ne.s32.totalorder %s62_s21, %s5423_s0  ;;  %p5428_p5 = scmp.lt.s32.totalorder %s62_s21, %s62_s21 }
  0x30   :  { %p5429_p6 = scmp.lt.s32.totalorder %s5423_s0, %s5423_s0 }
  0x32   :  { %p5430_p7 = por %p5429_p6, %p5428_p5 }
  0x34   :  { %p5431_p8 = pnand %p5430_p7, %p5424_p4 }
  0x36   :  { %5434 = shalt.err (!%p5431_p8)
}
  0x37   :  { %s5545_s24 = smov [#allocation11]   ;;  %s5435_s23 = scalar_lea.vmem %s82_s22, 16 }
  0x38   :  { %64 = dma.vmem_to_smem %s62_s21, 16, %s5545_s24, [#allocation10]  }
  0x39   :  { %p5436_p9 = scmp.ne.s32.totalorder %s82_s22, %s5435_s23  ;;  %p5440_p10 = scmp.lt.s32.totalorder %s82_s22, %s82_s22 }
  0x3a   :  { %p5441_p11 = scmp.lt.s32.totalorder %s5435_s23, %s5435_s23 }
  0x3c   :  { %p5442_p12 = por %p5441_p11, %p5440_p10 }
  0x3e   :  { %p5443_p13 = pnand %p5442_p12, %p5436_p9 }
  0x40   :  { %5446 = shalt.err (!%p5443_p13)
}
  0x41   :  { %s5546_s3 = smov [#allocation14]   ;;  %s91_s26 = sshll.u32 %s7112_s6, 4  ;;  %s92_s26 = int_to_ptr.vmem [resolvable:$true] %s91_s26 }
  0x42   :  { %84 = dma.vmem_to_smem %s82_s22, 16, %s5546_s3, [#allocation13]  }
  0x43   :  { %s5447_s27 = scalar_lea.vmem %s92_s26, 16  ;;  %p5452_p1 = scmp.lt.s32.totalorder %s92_s26, %s92_s26 }
  0x44   :  { %p5448_p0 = scmp.ne.s32.totalorder %s92_s26, %s5447_s27  ;;  %p5453_p2 = scmp.lt.s32.totalorder %s5447_s27, %s5447_s27 }
  0x46   :  { %p5454_p3 = por %p5453_p2, %p5452_p1 }
  0x48   :  { %p5455_p4 = pnand %p5454_p3, %p5448_p0 }
  0x4a   :  { %5458 = shalt.err (!%p5455_p4)
}
  0x4b   :  { %s5547_s28 = smov [#allocation15]   ;;  %s5548_s29 = smov [#allocation17]  }
  0x4c   :  { %94 = dma.vmem_to_smem %s92_s26, 16, %s5547_s28, [#allocation16]  }
  0x4d   :  { %s102_s30 = sshll.u32 %s5548_s29, 4  ;;  %s5459_s17 = scalar_lea.hbm %s7114_s8, 16384  ;;  %s103_s30 = int_to_ptr.vmem [resolvable:$true] %s102_s30 }
  0x4e   :  { %p5460_p5 = scmp.ne.s32.totalorder %s7114_s8, %s5459_s17  ;;  %p5463_p6 = scmp.lt.u32.totalorder %s5459_s17, %s7114_s8 }
  0x50   :  { %p5465_p7 = pnand %p5463_p6, %p5460_p5 }
  0x52   :  { %5468 = shalt.err (!%p5465_p7)
}
  0x53   :  { %s5469_s20 = scalar_lea.vmem %s103_s30, 16384  ;;  %p5474_p9 = scmp.lt.s32.totalorder %s103_s30, %s103_s30 }
  0x54   :  { %p5470_p8 = scmp.ne.s32.totalorder %s103_s30, %s5469_s20  ;;  %p5475_p10 = scmp.lt.s32.totalorder %s5469_s20, %s5469_s20 }
  0x56   :  { %p5476_p11 = por %p5475_p10, %p5474_p9 }
  0x58   :  { %p5477_p12 = pnand %p5476_p11, %p5470_p8 }
  0x5a   :  { %5480 = shalt.err (!%p5477_p12)
}
  0x5b   :  { %s5549_s21 = smov 512   ;;  %s5550_s2 = smov 32  }
  0x5c   :  { %108 = dma.hbm_to_vmem [thread:$0]  %s7114_s8, 16384, %s103_s30, [#allocation4], %s5549_s21, %s5549_s21, %s5550_s2  }
  0x5d   :  { %s5551_s0 = smov [#allocation18]   ;;  %s5481_s5 = scalar_lea.hbm %s7118_s12, 2048 }
  0x5e   :  { %s120_s24 = sshll.u32 %s5551_s0, 4  ;;  %p5482_p13 = scmp.ne.s32.totalorder %s7118_s12, %s5481_s5  ;;  %s121_s24 = int_to_ptr.vmem [resolvable:$true] %s120_s24 }
  0x5f   :  { %p5485_p0 = scmp.lt.u32.totalorder %s5481_s5, %s7118_s12 }
  0x61   :  { %p5487_p1 = pnand %p5485_p0, %p5482_p13 }
  0x63   :  { %5490 = shalt.err (!%p5487_p1)
}
  0x64   :  { %s5491_s29 = scalar_lea.vmem %s121_s24, 2048  ;;  %p5496_p3 = scmp.lt.s32.totalorder %s121_s24, %s121_s24 }
  0x65   :  { %p5492_p2 = scmp.ne.s32.totalorder %s121_s24, %s5491_s29  ;;  %p5497_p4 = scmp.lt.s32.totalorder %s5491_s29, %s5491_s29 }
  0x67   :  { %p5498_p5 = por %p5497_p4, %p5496_p3 }
  0x69   :  { %p5499_p6 = pnand %p5498_p5, %p5492_p2 }
  0x6b   :  { %5502 = shalt.err (!%p5499_p6)
}
  0x6c   :  { %s5552_s8 = smov 128   ;;  %s5553_s30 = smov 8  }
  0x6d   :  { %126 = dma.hbm_to_vmem [thread:$0]  %s7118_s12, 2048, %s121_s24, [#allocation19], %s5552_s8, %s5552_s8, %s5553_s30  }
  0x6e   :  { %5525 = dma.done.wait [#allocation6], 16  }
  0x6f   :  { %5526 = vsyncadd [#allocation6], 4294967280 }
  0x70   :  { %5527 = dma.done.wait [#allocation7], 16  }
  0x71   :  { %5528 = vsyncadd [#allocation7], 4294967280 }
  0x72   :  { %5529 = dma.done.wait [#allocation10], 32  }
  0x73   :  { %5530 = vsyncadd [#allocation10], 4294967264 }
  0x74   :  { %5531 = dma.done.wait [#allocation13], 32  }
  0x75   :  { %5532 = vsyncadd [#allocation13], 4294967264 }
  0x76   :  { %5533 = dma.done.wait [#allocation16], 16  }
  0x77   :  { %5534 = vsyncadd [#allocation16], 4294967280 }
  0x78   :  { %5535 = dma.done.wait [#allocation4], 16384  }
  0x79   :  { %5536 = vsyncadd [#allocation4], 4294950912 }
  0x7a   :  { %5537 = dma.done.wait [#allocation19], 2048  }
  0x7b   :  { %5538 = vsyncadd [#allocation19], 4294965248 }
  0x7c   :  { %156 = sfence }
  0x7d   :  { %v208_v0 = vld [vmem:[#allocation17 + $0x8] sm:$0xff]  ;;  %v207_v2 = vld [vmem:[#allocation17] sm:$0xff]  ;;  %v210_v21 = vld [vmem:[#allocation17 + $0x18] sm:$0xff]  ;;  %s5767_s12 = sld [smem:[#allocation14]]  ;;  %vm5556_vm0 = vmmov 0   ;;  %s3551_s26 = sld [smem:[#allocation14 + $0x1]] }
  0x7e   :  { %v212_v1 = vld [vmem:[#allocation17 + $0x28] sm:$0xff]  ;;  %v211_v4 = vld [vmem:[#allocation17 + $0x20] sm:$0xff]  ;;  %v214_v25 = vld [vmem:[#allocation17 + $0x38] sm:$0xff]  ;;  %s5769_s17 = sld [smem:[#allocation8]]  ;;  %s3554_s27 = sld [smem:[#allocation8 + $0x1]] }
  0x7f   :  { %v5690_v3 = vpack.c.bf16 %v212_v1, %v208_v0  ;;  %v216_v5 = vld [vmem:[#allocation17 + $0x48] sm:$0xff]  ;;  %v5692_v7 = vpack.c.bf16 %v211_v4, %v207_v2  ;;  %v215_v9 = vld [vmem:[#allocation17 + $0x40] sm:$0xff]  ;;  %v5709_v27 = vpack.c.bf16 %v214_v25, %v210_v21  ;;  %v209_v28 = vld [vmem:[#allocation17 + $0x10] sm:$0xff]  ;;  %s5783_s1 = sld [smem:[#allocation3]]  ;;  %s3553_s29 = sld [smem:[#allocation3 + $0x1]] }
  0x80   :  { %v220_v6 = vld [vmem:[#allocation17 + $0x68] sm:$0xff]  ;;  %v219_v10 = vld [vmem:[#allocation17 + $0x60] sm:$0xff]  ;;  %v213_v29 = vld [vmem:[#allocation17 + $0x30] sm:$0xff]  ;;  %s5785_s18 = sld [smem:[#allocation9]]  ;;  %s3556_s15 = sld [smem:[#allocation9 + $0x1]] }
  0x81   :  { %v5694_v8 = vpack.c.bf16 %v220_v6, %v216_v5  ;;  %v224_v11 = vld [vmem:[#allocation17 + $0x88] sm:$0xff]  ;;  %4059 = vmatprep.subr.bf16.mxu0 %v5690_v3  ;;  %v5698_v13 = vpack.c.bf16 %v219_v10, %v215_v9  ;;  %v223_v15 = vld [vmem:[#allocation17 + $0x80] sm:$0xff]  ;;  %v5711_v30 = vpack.c.bf16 %v213_v29, %v209_v28  ;;  %v218_v31 = vld [vmem:[#allocation17 + $0x58] sm:$0xff]  ;;  %4123 = vmatprep.subr.bf16.mxu1 %v5709_v27  ;;  %s500_s3 = sld [smem:[#allocation15]]  ;;  %s3561_s4 = sld [smem:[#allocation11 + $0x1]] }
  0x82   :  { %v228_v12 = vld [vmem:[#allocation17 + $0xa8] sm:$0xff]  ;;  %4061 = vmatpush1.bf16.msra.mxu0 %v5692_v7  ;;  %v227_v16 = vld [vmem:[#allocation17 + $0xa0] sm:$0xff]  ;;  %v222_v32 = vld [vmem:[#allocation17 + $0x78] sm:$0xff]  ;;  %s504_s25 = sld [smem:[#allocation11]]  ;;  %s3564_s22 = sld [smem:[#allocation14 + $0x2]] }
  0x83   :  { %4063 = vmatprep.subr.bf16.mxu0 %v5694_v8  ;;  %v5701_v14 = vpack.c.bf16 %v228_v12, %v224_v11  ;;  %v232_v17 = vld [vmem:[#allocation17 + $0xc8] sm:$0xff]  ;;  %v5704_v19 = vpack.c.bf16 %v227_v16, %v223_v15  ;;  %v231_v20 = vld [vmem:[#allocation17 + $0xc0] sm:$0xff]  ;;  %v5717_v35 = vpack.c.bf16 %v222_v32, %v218_v31  ;;  %v217_v36 = vld [vmem:[#allocation17 + $0x50] sm:$0xff]  ;;  %4125 = vmatpush1.bf16.msra.mxu1 %v5711_v30  ;;  %s3545_s20 = sshll.u32 %s5767_s12, 3  ;;  %s508_s28 = sld [smem:[#allocation12]] }
  0x84   :  { %v236_v18 = vld [vmem:[#allocation17 + $0xe8] sm:$0xff]  ;;  %v235_v23 = vld [vmem:[#allocation17 + $0xe0] sm:$0xff]  ;;  %v221_v40 = vld [vmem:[#allocation17 + $0x70] sm:$0xff]  ;;  %s3546_s21 = sshll.u32 %s5769_s17, 3  ;;  %s3552_s17 = sshll.u32 %s3551_s26, 3 }
  0x85   :  { %v5707_v22 = vpack.c.bf16 %v236_v18, %v232_v17  ;;  %v240_v24 = vld [vmem:[#allocation17 + $0x108] sm:$0xff]  ;;  %v5714_v33 = vpack.c.bf16 %v235_v23, %v231_v20  ;;  %v239_v34 = vld [vmem:[#allocation17 + $0x100] sm:$0xff]  ;;  %4127 = vmatprep.subr.bf16.mxu1 %v5717_v35  ;;  %v5724_v42 = vpack.c.bf16 %v221_v40, %v217_v36  ;;  %v226_v43 = vld [vmem:[#allocation17 + $0x98] sm:$0xff]  ;;  %s201_s2 = scalar_lea.vmem [#allocation2], %s3546_s21  ;;  %s601_s6 = scalar_lea.vmem [#allocation2], %s3552_s17 }
  0x86   :  { %4065 = vmatpush1.bf16.msra.mxu0 %v5698_v13  ;;  %v244_v26 = vld [vmem:[#allocation17 + $0x128] sm:$0xff]  ;;  %v243_v38 = vld [vmem:[#allocation17 + $0x120] sm:$0xff]  ;;  %v230_v44 = vld [vmem:[#allocation17 + $0xb8] sm:$0xff]  ;;  %s3563_s0 = sld [smem:[#allocation12 + $0x1]]  ;;  %s3566_s24 = sld [smem:[#allocation3 + $0x2]] }
  0x87   :  { %4067 = vmatprep.subr.bf16.mxu0 %v5701_v14  ;;  %v5720_v37 = vpack.c.bf16 %v244_v26, %v240_v24  ;;  %v248_v39 = vld [vmem:[#allocation17 + $0x148] sm:$0xff]  ;;  %v5726_v45 = vpack.c.bf16 %v230_v44, %v226_v43  ;;  %v225_v46 = vld [vmem:[#allocation17 + $0x90] sm:$0xff]  ;;  %v5729_v48 = vpack.c.bf16 %v243_v38, %v239_v34  ;;  %v247_v49 = vld [vmem:[#allocation17 + $0x140] sm:$0xff]  ;;  %4129 = vmatpush1.bf16.msra.mxu1 %v5724_v42  ;;  %s3549_s5 = sshll.u32 %s500_s3, 3  ;;  %s3569_s23 = sld [smem:[#allocation9 + $0x2]] }
  0x88   :  { %v252_v41 = vld [vmem:[#allocation17 + $0x168] sm:$0xff]  ;;  %v229_v47 = vld [vmem:[#allocation17 + $0xb0] sm:$0xff]  ;;  %v234_v50 = vld [vmem:[#allocation17 + $0xd8] sm:$0xff]  ;;  %s502_s16 = scalar_lea.vmem [#allocation2], %s3549_s5  ;;  %s3550_s12 = sshll.u32 %s504_s25, 3 }
  0x89   :  { %v5732_v51 = vpack.c.bf16 %v252_v41, %v248_v39  ;;  %v251_v52 = vld [vmem:[#allocation17 + $0x160] sm:$0xff]  ;;  %v256_v53 = vld [vmem:[#allocation17 + $0x188] sm:$0xff]  ;;  %v5735_v54 = vpack.c.bf16 %v229_v47, %v225_v46  ;;  %v238_v55 = vld [vmem:[#allocation17 + $0xf8] sm:$0xff]  ;;  %4131 = vmatprep.subr.bf16.mxu1 %v5726_v45  ;;  %s3562_s5 = sshll.u32 %s3561_s4, 3  ;;  %s3565_s25 = sshll.u32 %s3564_s22, 3 }
  0x8a   :  { %4069 = vmatpush1.bf16.msra.mxu0 %v5704_v19  ;;  %v260_v56 = vld [vmem:[#allocation17 + $0x1a8] sm:$0xff]  ;;  %v5738_v57 = vpack.c.bf16 %v238_v55, %v234_v50  ;;  %v233_v58 = vld [vmem:[#allocation17 + $0xd0] sm:$0xff]  ;;  %v242_v60 = vld [vmem:[#allocation17 + $0x118] sm:$0xff]  ;;  %v5741_v62 = vpack.c.bf16 %v251_v52, %v247_v49  ;;  %s3577_s17 = sld [smem:[#allocation14 + $0x3]] }
  0x8b   :  { %4071 = vmatprep.subr.bf16.mxu0 %v5707_v22  ;;  %v237_v59 = vld [vmem:[#allocation17 + $0xf0] sm:$0xff]  ;;  %v246_v61 = vld [vmem:[#allocation17 + $0x138] sm:$0xff]  ;;  %v5744_v63 = vpack.c.bf16 %v260_v56, %v256_v53  ;;  %v255_v0 = vld [vmem:[#allocation17 + $0x180] sm:$0xff]  ;;  %4133 = vmatpush1.bf16.msra.mxu1 %v5735_v54 }
  0x8c   :  { %v259_v1 = vld [vmem:[#allocation17 + $0x1a0] sm:$0xff]  ;;  %v264_v2 = vld [vmem:[#allocation17 + $0x1c8] sm:$0xff]  ;;  %v5747_v4 = vpack.c.bf16 %v237_v59, %v233_v58  ;;  %4135 = vmatprep.subr.bf16.mxu1 %v5738_v57  ;;  %v5750_v6 = vpack.c.bf16 %v246_v61, %v242_v60  ;;  %v241_v9 = vld [vmem:[#allocation17 + $0x110] sm:$0xff] }
  0x8d   :  { %v268_v5 = vld [vmem:[#allocation17 + $0x1e8] sm:$0xff]  ;;  %v245_v10 = vld [vmem:[#allocation17 + $0x130] sm:$0xff]  ;;  %v250_v11 = vld [vmem:[#allocation17 + $0x158] sm:$0xff]  ;;  %v5753_v15 = vpack.c.bf16 %v259_v1, %v255_v0 }
  0x8e   :  { %4073 = vmatpush1.bf16.msra.mxu0 %v5714_v33  ;;  %v254_v12 = vld [vmem:[#allocation17 + $0x178] sm:$0xff]  ;;  %v5756_v16 = vpack.c.bf16 %v268_v5, %v264_v2  ;;  %v263_v17 = vld [vmem:[#allocation17 + $0x1c0] sm:$0xff]  ;;  %v272_v20 = vld [vmem:[#allocation17 + $0x208] sm:$0xff]  ;;  %v5759_v21 = vpack.c.bf16 %v245_v10, %v241_v9 }
  0x8f   :  { %4075 = vmatprep.subr.bf16.mxu0 %v5720_v37  ;;  %v267_v18 = vld [vmem:[#allocation17 + $0x1e0] sm:$0xff]  ;;  %4137 = vmatpush1.bf16.msra.mxu1 %v5747_v4  ;;  %v276_v23 = vld [vmem:[#allocation17 + $0x228] sm:$0xff]  ;;  %v5762_v24 = vpack.c.bf16 %v254_v12, %v250_v11  ;;  %v249_v25 = vld [vmem:[#allocation17 + $0x150] sm:$0xff] }
  0x90   :  { %4139 = vmatprep.subr.bf16.mxu1 %v5750_v6  ;;  %v253_v26 = vld [vmem:[#allocation17 + $0x170] sm:$0xff]  ;;  %v258_v28 = vld [vmem:[#allocation17 + $0x198] sm:$0xff]  ;;  %v5765_v31 = vpack.c.bf16 %v267_v18, %v263_v17  ;;  %v5772_v32 = vpack.c.bf16 %v276_v23, %v272_v20  ;;  %v271_v34 = vld [vmem:[#allocation17 + $0x200] sm:$0xff] }
  0x91   :  { %v262_v29 = vld [vmem:[#allocation17 + $0x1b8] sm:$0xff]  ;;  %v275_v36 = vld [vmem:[#allocation17 + $0x220] sm:$0xff]  ;;  %v280_v38 = vld [vmem:[#allocation17 + $0x248] sm:$0xff]  ;;  %v5775_v39 = vpack.c.bf16 %v253_v26, %v249_v25 }
  0x92   :  { %4077 = vmatpush1.bf16.msra.mxu0 %v5729_v48  ;;  %v284_v40 = vld [vmem:[#allocation17 + $0x268] sm:$0xff]  ;;  %v5778_v41 = vpack.c.bf16 %v262_v29, %v258_v28  ;;  %v257_v43 = vld [vmem:[#allocation17 + $0x190] sm:$0xff]  ;;  %v266_v46 = vld [vmem:[#allocation17 + $0x1d8] sm:$0xff]  ;;  %v5781_v49 = vpack.c.bf16 %v275_v36, %v271_v34 }
  0x93   :  { %4079 = vmatprep.subr.bf16.mxu0 %v5732_v51  ;;  %4141 = vmatpush1.bf16.msra.mxu1 %v5759_v21  ;;  %v261_v44 = vld [vmem:[#allocation17 + $0x1b0] sm:$0xff]  ;;  %v270_v47 = vld [vmem:[#allocation17 + $0x1f8] sm:$0xff]  ;;  %v279_v50 = vld [vmem:[#allocation17 + $0x240] sm:$0xff]  ;;  %v5788_v52 = vpack.c.bf16 %v284_v40, %v280_v38  ;;  %v197_v38 = vstv %s5783_s1  ;;  %v204_v40 = vstv %s5785_s18  ;;  %s3555_s1 = sshll.u32 %s3554_s27, 3  ;;  %s506_s18 = scalar_lea.vmem [#allocation2], %s3550_s12 }
  0x94   :  { %4143 = vmatprep.subr.bf16.mxu1 %v5762_v24  ;;  %v283_v53 = vld [vmem:[#allocation17 + $0x260] sm:$0xff]  ;;  %v288_v55 = vld [vmem:[#allocation17 + $0x288] sm:$0xff]  ;;  %v5791_v58 = vpack.c.bf16 %v261_v44, %v257_v43  ;;  %v5794_v59 = vpack.c.bf16 %v270_v47, %v266_v46  ;;  %v265_v60 = vld [vmem:[#allocation17 + $0x1d0] sm:$0xff]  ;;  %s608_s19 = scalar_lea.vmem [#allocation2], %s3555_s1  ;;  %s913_s27 = scalar_lea.vmem [#allocation2], %s3562_s5 }
  0x95   :  { %v292_v56 = vld [vmem:[#allocation17 + $0x2a8] sm:$0xff]  ;;  %v269_v61 = vld [vmem:[#allocation17 + $0x1f0] sm:$0xff]  ;;  %v274_v1 = vld [vmem:[#allocation17 + $0x218] sm:$0xff]  ;;  %v5800_v5 = vpack.c.bf16 %v283_v53, %v279_v50  ;;  %s3574_s12 = sld [smem:[#allocation11 + $0x2]]  ;;  %s3580_s1 = sld [smem:[#allocation8 + $0x3]] }
  0x96   :  { %4081 = vmatpush1.bf16.msra.mxu0 %v5741_v62  ;;  %7182 = vst [vmem:[#allocation29_spill] sm:$0xff] %v5791_v58  ;;  %7183 = vst [vmem:[#allocation30_spill] sm:$0xff] %v5794_v59  ;;  %v157_v0 = vld [vmem:[%s7113_s7] sm:$0xff]  ;;  %v278_v2 = vld [vmem:[#allocation17 + $0x238] sm:$0xff]  ;;  %v5805_v9 = vpack.c.bf16 %v292_v56, %v288_v55  ;;  %v5808_v17 = vpack.c.bf16 %v269_v61, %v265_v60  ;;  %s194_s7 = scalar_lea.vmem [#allocation2], %s3545_s20  ;;  %s3585_s5 = sld [smem:[#allocation15 + $0x3]] }
  0x97   :  { %4083 = vmatprep.subr.bf16.mxu0 %v5744_v63  ;;  %4145 = vmatpush1.bf16.msra.mxu1 %v5775_v39  ;;  %158 = vst [vmem:[#allocation2] sm:$0xff] %v157_v0  ;;  %v287_v10 = vld [vmem:[#allocation17 + $0x280] sm:$0xff]  ;;  %v296_v12 = vld [vmem:[#allocation17 + $0x2c8] sm:$0xff]  ;;  %v5811_v20 = vpack.c.bf16 %v278_v2, %v274_v1  ;;  %v273_v23 = vld [vmem:[#allocation17 + $0x210] sm:$0xff] }
  0x98   :  { %4147 = vmatprep.subr.bf16.mxu1 %v5778_v41  ;;  %v291_v11 = vld [vmem:[#allocation17 + $0x2a0] sm:$0xff]  ;;  %7184 = vst [vmem:[#allocation31_spill] sm:$0xff] %v5808_v17  ;;  %v300_v18 = vld [vmem:[#allocation17 + $0x2e8] sm:$0xff]  ;;  %v277_v25 = vld [vmem:[#allocation17 + $0x230] sm:$0xff] }
  0x99   :  { %7185 = vst [vmem:[#allocation32_spill] sm:$0xff] %v5811_v20  ;;  %v282_v26 = vld [vmem:[#allocation17 + $0x258] sm:$0xff]  ;;  %v5814_v29 = vpack.c.bf16 %v291_v11, %v287_v10  ;;  %v295_v34 = vld [vmem:[#allocation17 + $0x2c0] sm:$0xff]  ;;  %v5819_v43 = vpack.c.bf16 %v300_v18, %v296_v12  ;;  %v304_v44 = vld [vmem:[#allocation17 + $0x308] sm:$0xff]  ;;  %v5822_v47 = vpack.c.bf16 %v277_v25, %v273_v23 }
  0x9a   :  { %4085 = vmatpush1.bf16.msra.mxu0 %v5753_v15  ;;  %v286_v28 = vld [vmem:[#allocation17 + $0x278] sm:$0xff]  ;;  %v299_v36 = vld [vmem:[#allocation17 + $0x2e0] sm:$0xff]  ;;  %v308_v46 = vld [vmem:[#allocation17 + $0x328] sm:$0xff] }
  0x9b   :  { %4087 = vmatprep.subr.bf16.mxu0 %v5756_v16  ;;  %4149 = vmatpush1.bf16.msra.mxu1 %v5791_v58  ;;  %7186 = vst [vmem:[#allocation33_spill] sm:$0xff] %v5822_v47  ;;  %v281_v50 = vld [vmem:[#allocation17 + $0x250] sm:$0xff]  ;;  %v5825_v53 = vpack.c.bf16 %v286_v28, %v282_v26  ;;  %v290_v1 = vld [vmem:[#allocation17 + $0x298] sm:$0xff]  ;;  %v5835_v10 = vpack.c.bf16 %v299_v36, %v295_v34  ;;  %v303_v12 = vld [vmem:[#allocation17 + $0x300] sm:$0xff]  ;;  %s3575_s21 = sshll.u32 %s3574_s12, 3 }
  0x9c   :  { %4151 = vmatprep.subr.bf16.mxu1 %v5794_v59  ;;  %v285_v55 = vld [vmem:[#allocation17 + $0x270] sm:$0xff]  ;;  %v294_v2 = vld [vmem:[#allocation17 + $0x2b8] sm:$0xff]  ;;  %v5838_v11 = vpack.c.bf16 %v308_v46, %v304_v44  ;;  %v307_v18 = vld [vmem:[#allocation17 + $0x320] sm:$0xff]  ;;  %s1321_s4 = scalar_lea.vmem [#allocation2], %s3575_s21 }
  0x9d   :  { %7187 = vst [vmem:[#allocation34_spill] sm:$0xff] %v5825_v53  ;;  %v312_v23 = vld [vmem:[#allocation17 + $0x348] sm:$0xff]  ;;  %v5841_v25 = vpack.c.bf16 %v285_v55, %v281_v50  ;;  %v289_v34 = vld [vmem:[#allocation17 + $0x290] sm:$0xff]  ;;  %v302_v44 = vld [vmem:[#allocation17 + $0x2f8] sm:$0xff]  ;;  %v5851_v46 = vpack.c.bf16 %v307_v18, %v303_v12 }
  0x9e   :  { %4089 = vmatpush1.bf16.msra.mxu0 %v5765_v31  ;;  %v5829_v56 = vld [vmem:[%s194_s7] sm:$0xff]  ;;  %v293_v36 = vld [vmem:[#allocation17 + $0x2b0] sm:$0xff]  ;;  %v311_v55 = vld [vmem:[#allocation17 + $0x340] sm:$0xff]  ;;  %s3559_s7 = sld [smem:[#allocation15 + $0x1]] }
  0x9f   :  { %4091 = vmatprep.subr.bf16.mxu0 %v5772_v32  ;;  %4153 = vmatpush1.bf16.msra.mxu1 %v5808_v17  ;;  %v202_v60 = vld [vmem:[%s201_s2] sm:$0xff]  ;;  %v198_v61 = vmul.f32 %v197_v38, %v5829_v56  ;;  %7188 = vst [vmem:[#allocation35_spill] sm:$0xff] %v5841_v25  ;;  %v5846_v38 = vpack.c.bf16 %v294_v2, %v290_v1  ;;  %v306_v12 = vld [vmem:[#allocation17 + $0x318] sm:$0xff]  ;;  %v309_v17 = vld [vmem:[#allocation17 + $0x330] sm:$0xff] }
  0xa0   :  { %4155 = vmatprep.subr.bf16.mxu1 %v5811_v20  ;;  %v205_v0 = vmul.f32 %v204_v40, %v202_v60  ;;  %v316_v28 = vld [vmem:[#allocation17 + $0x368] sm:$0xff]  ;;  %v298_v40 = vld [vmem:[#allocation17 + $0x2d8] sm:$0xff]  ;;  %v315_v60 = vld [vmem:[#allocation17 + $0x360] sm:$0xff] }
  0xa1   :  { %7189 = vst [vmem:[#allocation36_spill] sm:$0xff] %v5846_v38  ;;  %v5854_v50 = vpack.c.bf16 %v316_v28, %v312_v23  ;;  %v324_v1 = vld [vmem:[#allocation17 + $0x3a8] sm:$0xff]  ;;  %v5860_v2 = vpack.c.bf16 %v302_v44, %v298_v40  ;;  %v310_v18 = vld [vmem:[#allocation17 + $0x338] sm:$0xff]  ;;  %v5863_v23 = vpack.c.bf16 %v315_v60, %v311_v55  ;;  %v305_v20 = vld [vmem:[#allocation17 + $0x310] sm:$0xff] }
  0xa2   :  { %4093 = vmatpush1.bf16.msra.mxu0 %v5781_v49  ;;  %v5843_v26 = vadd.f32 %v205_v0, %v198_v61  ;;  %v320_v61 = vld [vmem:[#allocation17 + $0x388] sm:$0xff]  ;;  %v5857_v0 = vpack.c.bf16 %v293_v36, %v289_v34  ;;  %v323_v34 = vld [vmem:[#allocation17 + $0x3a0] sm:$0xff]  ;;  %v5872_v44 = vpack.c.bf16 %v310_v18, %v306_v12  ;;  %v314_v55 = vld [vmem:[#allocation17 + $0x358] sm:$0xff] }
  0xa3   :  { %4095 = vmatprep.subr.bf16.mxu0 %v5788_v52  ;;  %4157 = vmatpush1.bf16.msra.mxu1 %v5822_v47  ;;  %7191 = vst [vmem:[#allocation38_spill] sm:$0xff] %v5860_v2  ;;  %v301_v47 = vld [vmem:[#allocation17 + $0x2f0] sm:$0xff]  ;;  %v5866_v28 = vpack.c.bf16 %v324_v1, %v320_v61  ;;  %v328_v36 = vld [vmem:[#allocation17 + $0x3c8] sm:$0xff]  ;;  %v318_v60 = vld [vmem:[#allocation17 + $0x378] sm:$0xff] }
  0xa4   :  { %4159 = vmatprep.subr.bf16.mxu1 %v5825_v53  ;;  %399 = vmatprep.mubr.f32.mxu0 %v5843_v26  ;;  %7190 = vst [vmem:[#allocation37_spill] sm:$0xff] %v5857_v0  ;;  %v297_v53 = vld [vmem:[#allocation17 + $0x2d0] sm:$0xff]  ;;  %v332_v40 = vld [vmem:[#allocation17 + $0x3e8] sm:$0xff]  ;;  %v5884_v12 = vpack.c.bf16 %v318_v60, %v314_v55  ;;  %v322_v59 = vld [vmem:[#allocation17 + $0x398] sm:$0xff]  ;;  %s3560_s2 = sshll.u32 %s3559_s7, 3  ;;  %s3578_s7 = sshll.u32 %s3577_s17, 3 }
  0xa5   :  { %470 = vmatprep.mubr.f32.mxu1 %v5843_v26  ;;  %v5878_v1 = vpack.c.bf16 %v332_v40, %v328_v36  ;;  %v313_v18 = vld [vmem:[#allocation17 + $0x350] sm:$0xff]  ;;  %v326_v58 = vld [vmem:[#allocation17 + $0x3b8] sm:$0xff]  ;;  %s909_s3 = scalar_lea.vmem [#allocation2], %s3560_s2  ;;  %s3581_s2 = sshll.u32 %s3580_s1, 3 }
  0xa6   :  { %4097 = vmatpush1.bf16.msra.mxu0 %v5800_v5  ;;  %v325_v36 = vld [vmem:[#allocation17 + $0x3b0] sm:$0xff]  ;;  %v330_v40 = vld [vmem:[#allocation17 + $0x3d8] sm:$0xff]  ;;  %s1417_s22 = scalar_lea.vmem [#allocation2], %s3578_s7 }
  0xa7   :  { %4099 = vmatprep.subr.bf16.mxu0 %v5805_v9  ;;  %4161 = vmatpush1.bf16.msra.mxu1 %v5841_v25  ;;  %v319_v25 = vld [vmem:[#allocation17 + $0x380] sm:$0xff]  ;;  %v334_v55 = vld [vmem:[#allocation17 + $0x3f8] sm:$0xff] }
  0xa8   :  { %4163 = vmatprep.subr.bf16.mxu1 %v5846_v38  ;;  %v5869_v38 = vpack.c.bf16 %v301_v47, %v297_v53  ;;  %v5875_v61 = vpack.c.bf16 %v323_v34, %v319_v25  ;;  %v331_v47 = vld [vmem:[#allocation17 + $0x3e0] sm:$0xff]  ;;  %v5881_v53 = vpack.c.bf16 %v309_v17, %v305_v20  ;;  %v5892_v17 = vpack.c.bf16 %v326_v58, %v322_v59  ;;  %v321_v20 = vld [vmem:[#allocation17 + $0x390] sm:$0xff] }
  0xa9   :  { %v5895_v60 = vpack.c.bf16 %v325_v36, %v321_v20  ;;  %v524_v59 = vld [vmem:[#allocation18 + $0x60] sm:$0xff] }
  0xaa   :  { %4101 = vmatpush1.bf16.msra.mxu0 %v5814_v29 }
  0xab   :  { %4103 = vmatprep.subr.bf16.mxu0 %v5819_v43  ;;  %4165 = vmatpush1.bf16.msra.mxu1 %v5857_v0  ;;  %v327_v0 = vld [vmem:[#allocation17 + $0x3c0] sm:$0xff] }
  0xac   :  { %4167 = vmatprep.subr.bf16.mxu1 %v5860_v2  ;;  %v317_v2 = vld [vmem:[#allocation17 + $0x370] sm:$0xff]  ;;  %v4120_v25 = vpack.c.bf16 %v331_v47, %v327_v0  ;;  %v5898_v0 = vpack.c.bf16 %v334_v55, %v330_v40 }
  0xad   :  { %v5889_v34 = vpack.c.bf16 %v317_v2, %v313_v18  ;;  %v329_v47 = vld [vmem:[#allocation17 + $0x3d0] sm:$0xff]  ;;  %v7131_v18 = vmov 0.0  }
  0xae   :  { %4105 = vmatpush1.bf16.msra.mxu0 %v5835_v10  ;;  %v333_v2 = vld [vmem:[#allocation17 + $0x3f0] sm:$0xff] }
  0xaf   :  { %4107 = vmatprep.subr.bf16.mxu0 %v5838_v11  ;;  %4169 = vmatpush1.bf16.msra.mxu1 %v5869_v38  ;;  %v5902_v58 = vpack.c.bf16 %v333_v2, %v329_v47 }
  0xb0   :  { %4171 = vmatprep.subr.bf16.mxu1 %v5872_v44 }
  0xb2   :  { %4109 = vmatpush1.bf16.msra.mxu0 %v5851_v46 }
  0xb3   :  { %4111 = vmatprep.subr.bf16.mxu0 %v5854_v50  ;;  %4173 = vmatpush1.bf16.msra.mxu1 %v5881_v53 }
  0xb4   :  { %4175 = vmatprep.subr.bf16.mxu1 %v5884_v12 }
  0xb6   :  { %4113 = vmatpush1.bf16.msra.mxu0 %v5863_v23 }
  0xb7   :  { %4115 = vmatprep.subr.bf16.mxu0 %v5866_v28  ;;  %4177 = vmatpush1.bf16.msra.mxu1 %v5889_v34 }
  0xb8   :  { %4179 = vmatprep.subr.bf16.mxu1 %v5892_v17 }
  0xba   :  { %4117 = vmatpush1.bf16.msra.mxu0 %v5875_v61 }
  0xbb   :  { %4119 = vmatprep.subr.bf16.mxu0 %v5878_v1  ;;  %4181 = vmatpush1.bf16.msra.mxu1 %v5895_v60 }
  0xbc   :  { %4183 = vmatprep.subr.bf16.mxu1 %v5898_v0 }
  0xbe   :  { %4121 = vmatpush1.bf16.msra.mxu0 %v4120_v25 }
  0xbf   :  { %4185 = vmatpush1.bf16.msra.mxu1 %v5902_v58 }
  0xc0   :  { %4211 = vmatprep.subr.bf16.mxu1 %v5690_v3  ;;  %v512_v3 = vld [vmem:[#allocation18] sm:$0xff] }
  0xc1   :  { %400 = vmatmul.mubr.f32.vlgmr.msra.gmra.mrb[0].mxu0 %v7131_v18 }
  0xc2   :  { %471 = vmatmul.mubr.f32.vlgmr.msra.gmra.mrb[0].mxu1 %v7131_v18  ;;  %3810 = vmatprep.mubr.msk.f32.mxu0 %vm5556_vm0, %v7131_v18 }
  0xc3   :  { %4213 = vmatpush1.bf16.msra.mxu1 %v5692_v7  ;;  %v513_v7 = vld [vmem:[#allocation18 + $0x8] sm:$0xff] }
  0xc4   :  { %4215 = vmatprep.subr.bf16.mxu1 %v5694_v8  ;;  %v5938_v8 = vpack.c.bf16 %v513_v7, %v512_v3 }
  0xc7   :  { %4217 = vmatpush1.bf16.msra.mxu1 %v5698_v13  ;;  %v7133_v13 = vmov 0.0|0.0  }
  0xc8   :  { %4219 = vmatprep.subr.bf16.mxu1 %v5701_v14  ;;  %4186 = vmatprep.subr.bf16.mxu0 %v7133_v13  ;;  %v514_v14 = vld [vmem:[#allocation18 + $0x10] sm:$0xff] }
  0xc9   :  { %4188 = vmatpush3.bf16.msra.mxu0 %v5938_v8 }
  0xca   :  { %4189 = vmatprep.subr.bf16.mxu0 %v7133_v13 }
  0xcb   :  { %4221 = vmatpush1.bf16.msra.mxu1 %v5704_v19  ;;  %v515_v19 = vld [vmem:[#allocation18 + $0x18] sm:$0xff] }
  0xcc   :  { %4223 = vmatprep.subr.bf16.mxu1 %v5707_v22  ;;  %v5944_v22 = vpack.c.bf16 %v515_v19, %v514_v14  ;;  %v5986_v19 = vld [vmem:[%s7117_s11] ss:$0 sm:$0xff] }
  0xce   :  { %4191 = vmatpush3.bf16.msra.mxu0 %v5944_v22 }
  0xcf   :  { %4225 = vmatpush1.bf16.msra.mxu1 %v5714_v33  ;;  %4192 = vmatprep.subr.bf16.mxu0 %v7133_v13  ;;  %v516_v33 = vld [vmem:[#allocation18 + $0x20] sm:$0xff] }
  0xd0   :  { %4227 = vmatprep.subr.bf16.mxu1 %v5720_v37  ;;  %v517_v37 = vld [vmem:[#allocation18 + $0x28] sm:$0xff] }
  0xd3   :  { %4229 = vmatpush1.bf16.msra.mxu1 %v5729_v48  ;;  %v5948_v48 = vpack.c.bf16 %v517_v37, %v516_v33 }
  0xd4   :  { %4231 = vmatprep.subr.bf16.mxu1 %v5732_v51  ;;  %v518_v51 = vld [vmem:[#allocation18 + $0x30] sm:$0xff] }
  0xd5   :  { %4194 = vmatpush3.bf16.msra.mxu0 %v5948_v48 }
  0xd6   :  { %4195 = vmatprep.subr.bf16.mxu0 %v7133_v13 }
  0xd7   :  { %4233 = vmatpush1.bf16.msra.mxu1 %v5741_v62  ;;  %v519_v62 = vld [vmem:[#allocation18 + $0x38] sm:$0xff] }
  0xd8   :  { %4235 = vmatprep.subr.bf16.mxu1 %v5744_v63  ;;  %v5952_v63 = vpack.c.bf16 %v519_v62, %v518_v51  ;;  %v5992_v51 = vld [vmem:[%s7116_s10] ss:$0 sm:$0xff] }
  0xda   :  { %4197 = vmatpush3.bf16.msra.mxu0 %v5952_v63 }
  0xdb   :  { %4237 = vmatpush1.bf16.msra.mxu1 %v5753_v15  ;;  %4198 = vmatprep.subr.bf16.mxu0 %v7133_v13  ;;  %v520_v15 = vld [vmem:[#allocation18 + $0x40] sm:$0xff] }
  0xdc   :  { %4239 = vmatprep.subr.bf16.mxu1 %v5756_v16  ;;  %v521_v16 = vld [vmem:[#allocation18 + $0x48] sm:$0xff] }
  0xdf   :  { %4241 = vmatpush1.bf16.msra.mxu1 %v5765_v31  ;;  %v5956_v31 = vpack.c.bf16 %v521_v16, %v520_v15 }
  0xe0   :  { %4243 = vmatprep.subr.bf16.mxu1 %v5772_v32  ;;  %v522_v32 = vld [vmem:[#allocation18 + $0x50] sm:$0xff] }
  0xe1   :  { %4200 = vmatpush3.bf16.msra.mxu0 %v5956_v31 }
  0xe2   :  { %4201 = vmatprep.subr.bf16.mxu0 %v7133_v13 }
  0xe3   :  { %4245 = vmatpush1.bf16.msra.mxu1 %v5781_v49  ;;  %v523_v49 = vld [vmem:[#allocation18 + $0x58] sm:$0xff] }
  0xe4   :  { %4247 = vmatprep.subr.bf16.mxu1 %v5788_v52  ;;  %v5960_v52 = vpack.c.bf16 %v523_v49, %v522_v32 }
  0xe6   :  { %4203 = vmatpush3.bf16.msra.mxu0 %v5960_v52 }
  0xe7   :  { %4249 = vmatpush1.bf16.msra.mxu1 %v5800_v5  ;;  %v525_v5 = vld [vmem:[#allocation18 + $0x68] sm:$0xff]  ;;  %4204 = vmatprep.subr.bf16.mxu0 %v7133_v13 }
  0xe8   :  { %4251 = vmatprep.subr.bf16.mxu1 %v5805_v9  ;;  %v5963_v9 = vpack.c.bf16 %v525_v5, %v524_v59 }
  0xea   :  { %4206 = vmatpush3.bf16.msra.mxu0 %v5963_v9 }
  0xeb   :  { %4253 = vmatpush1.bf16.msra.mxu1 %v5814_v29  ;;  %v526_v29 = vld [vmem:[#allocation18 + $0x70] sm:$0xff]  ;;  %4207 = vmatprep.subr.bf16.mxu0 %v7133_v13 }
  0xec   :  { %4255 = vmatprep.subr.bf16.mxu1 %v5819_v43  ;;  %v527_v43 = vld [vmem:[#allocation18 + $0x78] sm:$0xff] }
  0xef   :  { %4257 = vmatpush1.bf16.msra.mxu1 %v5835_v10  ;;  %v5969_v10 = vpack.c.bf16 %v527_v43, %v526_v29 }
  0xf0   :  { %4259 = vmatprep.subr.bf16.mxu1 %v5838_v11  ;;  %v161_v11 = vlaneseq }
  0xf1   :  { %4209 = vmatpush3.bf16.msra.mxu0 %v5969_v10 }
  0xf2   :  { %4275 = vmatprep.subr.bf16.mxu0 %v5709_v27 }
  0xf3   :  { %4261 = vmatpush1.bf16.msra.mxu1 %v5851_v46  ;;  %v162_v46 = vshrl.u32 %v161_v11, 7 }
  0xf4   :  { %4263 = vmatprep.subr.bf16.mxu1 %v5854_v50 }
  0xf5   :  { %v163_v50 = vsub.s32 0, %v162_v46 }
  0xf7   :  { %4265 = vmatpush1.bf16.msra.mxu1 %v5863_v23  ;;  %v159_v23 = vld [vmem:[%s7115_s9] sm:$0x3]  ;;  %s3567_s9 = sld [smem:[#allocation8 + $0x2]] }
  0xf8   :  { %4267 = vmatprep.subr.bf16.mxu1 %v5866_v28  ;;  %v167_v28 = vsub.s32 1, %v162_v46  ;;  %v509_v46 = vstv %s508_s28  ;;  %s1009_s28 = scalar_lea.vmem [#allocation2], %s3565_s25  ;;  %s3586_s25 = sshll.u32 %s3585_s5, 3 }
  0xf9   :  { %s1725_s12 = scalar_lea.vmem [#allocation2], %s3586_s25 }
  0xfb   :  { %4269 = vmatpush1.bf16.msra.mxu1 %v5875_v61  ;;  %v5977_v61 = vrot.slane %v159_v23, %v163_v50  ;;  %v604_v50 = vstv %s3553_s29 }
  0xfc   :  { %4271 = vmatprep.subr.bf16.mxu1 %v5878_v1 }
  0xfd   :  { %s3568_s26 = sshll.u32 %s3567_s9, 3  ;;  %s1424_s9 = scalar_lea.vmem [#allocation2], %s3581_s2 }
  0xfe   :  { %s1016_s29 = scalar_lea.vmem [#allocation2], %s3568_s26  ;;  %s3587_s26 = sld [smem:[#allocation11 + $0x3]] }
  0xff   :  { %4273 = vmatpush1.bf16.msra.mxu1 %v4120_v25  ;;  %v5979_v25 = vrot.slane %v159_v23, %v167_v28  ;;  %v611_v23 = vstv %s3556_s15  ;;  %s3572_s15 = sld [smem:[#allocation15 + $0x2]]  ;;  %s3598_s2 = sld [smem:[#allocation15 + $0x4]] }
 0x100   :  { %4338 = vmatprep.subr.bf16.mxu1 %v7133_v13 }
 0x104   :  { %s3588_s17 = sshll.u32 %s3587_s26, 3 }
 0x194   :  { %v401_v1 = vpop.f32.mrb[0].mxu0 }
 0x195   :  { %v477_v20 = vadd.f32 %v401_v1, %v5977_v61  ;;  %v403_v36 = vpop.f32.mrb[1].mxu0  ;;  %v472_v47 = vpop.f32.mrb[0].mxu1 }
 0x196   :  { %v478_v55 = vadd.f32 %v403_v36, %v5979_v25  ;;  %v474_v2 = vpop.f32.mrb[1].mxu1  ;;  %v491_v15 = vadd.f32 %v5992_v51, %v472_v47  ;;  %v1043_v47 = vld [vmem:[#allocation17 + $0xa8] sm:$0xff] }
 0x197   :  { %v3547_v40 = vmul.f32 -1.442695, %v477_v20  ;;  %v492_v37 = vadd.f32 %v5986_v19, %v474_v2 }
 0x198   :  { %v3548_v27 = vmul.f32 -1.442695, %v478_v55 }
 0x199   :  { %5291 = vpow2.f32 %v3547_v40 }
 0x19a   :  { %5293 = vpow2.f32 %v3548_v27 }
 0x1a3   :  { %v5292_v3 = vpop.eup %5291 }
 0x1a4   :  { %v485_v7 = vadd.f32 1.0, %v5292_v3  ;;  %v5294_v14 = vpop.eup %5293  ;;  %v1038_v3 = vld [vmem:[#allocation17 + $0x80] sm:$0xff] }
 0x1a5   :  { %v486_v33 = vadd.f32 1.0, %v5294_v14 }
 0x1a6   :  { %5295 = vrcp.f32 %v485_v7  ;;  %v1042_v7 = vld [vmem:[#allocation17 + $0xa0] sm:$0xff] }
 0x1a7   :  { %5297 = vrcp.f32 %v486_v33  ;;  %v6075_v14 = vpack.c.bf16 %v1042_v7, %v1038_v3  ;;  %v1047_v33 = vld [vmem:[#allocation17 + $0xc8] sm:$0xff]  ;;  %v1106_v3 = vld [vmem:[#allocation17 + $0x2a0] sm:$0xff] }
 0x1b0   :  { %v5296_v62 = vpop.eup %5295 }
 0x1b1   :  { %v493_v16 = vmul.f32 %v5296_v62, %v492_v37  ;;  %v5298_v49 = vpop.eup %5297  ;;  %v1051_v37 = vld [vmem:[#allocation17 + $0xe8] sm:$0xff] }
 0x1b2   :  { %v496_v59 = vsub.f32 1.0, %v5298_v49  ;;  %v498_v29 = vmul.f32 %v5298_v49, %v5843_v26  ;;  %v6078_v62 = vpack.c.bf16 %v1051_v37, %v1047_v33  ;;  %v1055_v49 = vld [vmem:[#allocation17 + $0x108] sm:$0xff] }
 0x1b3   :  { %v494_v32 = vadd.f32 %v493_v16, %v491_v15  ;;  %v1046_v15 = vld [vmem:[#allocation17 + $0xc0] sm:$0xff]  ;;  %v1111_v33 = vld [vmem:[#allocation17 + $0x2c8] sm:$0xff] }
 0x1b4   :  { %v1050_v16 = vld [vmem:[#allocation17 + $0xe0] sm:$0xff]  ;;  %v1115_v37 = vld [vmem:[#allocation17 + $0x2e8] sm:$0xff] }
 0x1b5   :  { %5299 = vtanh.f32 %v494_v32  ;;  %v6081_v32 = vpack.c.bf16 %v1050_v16, %v1046_v15  ;;  %v6126_v15 = vpack.c.bf16 %v1115_v37, %v1111_v33  ;;  %v1110_v16 = vld [vmem:[#allocation17 + $0x2c0] sm:$0xff] }
 0x1bf   :  { %v5300_v5 = vpop.eup %5299 }
 0x1c0   :  { %v497_v43 = vmul.f32 %v5300_v5, %v496_v59  ;;  %v1059_v59 = vld [vmem:[#allocation17 + $0x128] sm:$0xff] }
 0x1c1   :  { %v6084_v5 = vpack.c.bf16 %v1059_v59, %v1055_v49  ;;  %v1114_v49 = vld [vmem:[#allocation17 + $0x2e0] sm:$0xff] }
 0x1c2   :  { %v499_v11 = vadd.f32 %v498_v29, %v497_v43  ;;  %v1054_v29 = vld [vmem:[#allocation17 + $0x100] sm:$0xff]  ;;  %v6129_v59 = vpack.c.bf16 %v1114_v49, %v1110_v16 }
 0x1c3   :  { %v1058_v43 = vld [vmem:[#allocation17 + $0x120] sm:$0xff] }
 0x1c4   :  { %503 = vst [vmem:[%s502_s16] sm:$0xff] %v499_v11  ;;  %v6087_v11 = vpack.c.bf16 %v1058_v43, %v1054_v29  ;;  %v1119_v29 = vld [vmem:[#allocation17 + $0x308] sm:$0xff]  ;;  %s3573_s16 = sshll.u32 %s3572_s15, 3  ;;  %s3592_s15 = sld [smem:[#allocation3 + $0x4]] }
 0x1c5   :  { %v1123_v43 = vld [vmem:[#allocation17 + $0x328] sm:$0xff]  ;;  %s1317_s20 = scalar_lea.vmem [#allocation2], %s3573_s16  ;;  %s3595_s16 = sld [smem:[#allocation9 + $0x4]] }
 0x1cb   :  { %v507_v28 = vld [vmem:[%s506_s18] sm:$0xff]  ;;  %s3576_s18 = sld [smem:[#allocation12 + $0x2]] }
 0x1cc   :  { %v5996_v1 = vld [vmem:[%s601_s6] sm:$0xff]  ;;  %v510_v20 = vmul.f32 %v509_v46, %v507_v28  ;;  %v1062_v28 = vld [vmem:[#allocation17 + $0x140] sm:$0xff]  ;;  %s3579_s6 = sld [smem:[#allocation3 + $0x3]] }
 0x1cd   :  { %v609_v26 = vld [vmem:[%s608_s19] sm:$0xff]  ;;  %v605_v36 = vmul.f32 %v604_v50, %v5996_v1  ;;  %s3582_s19 = sld [smem:[#allocation9 + $0x3]] }
 0x1ce   :  { %v612_v40 = vmul.f32 %v611_v23, %v609_v26  ;;  %v511_v55 = vadd.f32 %v510_v20, %v5829_v56  ;;  %v1063_v46 = vld [vmem:[#allocation17 + $0x148] sm:$0xff]  ;;  %v1066_v26 = vld [vmem:[#allocation17 + $0x160] sm:$0xff] }
 0x1cf   :  { %v1067_v50 = vld [vmem:[#allocation17 + $0x168] sm:$0xff]  ;;  %v6093_v20 = vpack.c.bf16 %v1066_v26, %v1062_v28  ;;  %v1122_v28 = vld [vmem:[#allocation17 + $0x320] sm:$0xff] }
 0x1d0   :  { %v6000_v27 = vadd.f32 %v612_v40, %v605_v36  ;;  %3811 = vmatmul.mubr.f32.vlgmr.msra.gmra.mrb[2].mxu0 %v511_v55  ;;  %v6090_v23 = vpack.c.bf16 %v1067_v50, %v1063_v46  ;;  %v1071_v36 = vld [vmem:[#allocation17 + $0x188] sm:$0xff]  ;;  %v6132_v46 = vpack.c.bf16 %v1123_v43, %v1119_v29  ;;  %v1118_v50 = vld [vmem:[#allocation17 + $0x300] sm:$0xff] }
 0x1d1   :  { %4277 = vmatpush1.bf16.msra.mxu0 %v5711_v30  ;;  %v7192_v30 = vld [vmem:[#allocation29_spill] sm:$0xff]  ;;  %v1075_v40 = vld [vmem:[#allocation17 + $0x1a8] sm:$0xff]  ;;  %v6135_v26 = vpack.c.bf16 %v1122_v28, %v1118_v50 }
 0x1d2   :  { %806 = vmatprep.mubr.f32.mxu1 %v6000_v27  ;;  %877 = vmatprep.mubr.f32.mxu0 %v6000_v27  ;;  %v6096_v55 = vpack.c.bf16 %v1075_v40, %v1071_v36  ;;  %v1127_v36 = vld [vmem:[#allocation17 + $0x348] sm:$0xff] }
 0x1d3   :  { %4279 = vmatprep.subr.bf16.mxu0 %v5717_v35  ;;  %v7193_v35 = vld [vmem:[#allocation30_spill] sm:$0xff] }
 0x1d4   :  { %v1131_v40 = vld [vmem:[#allocation17 + $0x368] sm:$0xff] }
 0x1d5   :  { %4281 = vmatpush1.bf16.msra.mxu0 %v5724_v42  ;;  %v7194_v42 = vld [vmem:[#allocation31_spill] sm:$0xff] }
 0x1d6   :  { %4283 = vmatprep.subr.bf16.mxu0 %v5726_v45  ;;  %v7195_v45 = vld [vmem:[#allocation32_spill] sm:$0xff] }
 0x1d9   :  { %4285 = vmatpush1.bf16.msra.mxu0 %v5735_v54  ;;  %v7196_v54 = vld [vmem:[#allocation33_spill] sm:$0xff] }
 0x1da   :  { %4287 = vmatprep.subr.bf16.mxu0 %v5738_v57  ;;  %v7197_v57 = vld [vmem:[#allocation34_spill] sm:$0xff] }
 0x1dd   :  { %4289 = vmatpush1.bf16.msra.mxu0 %v5747_v4  ;;  %v7198_v4 = vld [vmem:[#allocation35_spill] sm:$0xff] }
 0x1de   :  { %4291 = vmatprep.subr.bf16.mxu0 %v5750_v6  ;;  %v7199_v6 = vld [vmem:[#allocation36_spill] sm:$0xff] }
 0x1e1   :  { %4293 = vmatpush1.bf16.msra.mxu0 %v5759_v21  ;;  %v7200_v21 = vld [vmem:[#allocation37_spill] sm:$0xff] }
 0x1e2   :  { %4295 = vmatprep.subr.bf16.mxu0 %v5762_v24  ;;  %v7201_v24 = vld [vmem:[#allocation38_spill] sm:$0xff] }
 0x1e5   :  { %4297 = vmatpush1.bf16.msra.mxu0 %v5775_v39  ;;  %v6038_v39 = vld [vmem:[%s7119_s13] ss:$0 sm:$0xff] }
 0x1e6   :  { %4299 = vmatprep.subr.bf16.mxu0 %v5778_v41 }
 0x1e9   :  { %4301 = vmatpush1.bf16.msra.mxu0 %v7192_v30  ;;  %v1070_v30 = vld [vmem:[#allocation17 + $0x180] sm:$0xff] }
 0x1ea   :  { %4303 = vmatprep.subr.bf16.mxu0 %v7193_v35  ;;  %v1074_v35 = vld [vmem:[#allocation17 + $0x1a0] sm:$0xff] }
 0x1ed   :  { %4305 = vmatpush1.bf16.msra.mxu0 %v7194_v42  ;;  %v6099_v42 = vpack.c.bf16 %v1074_v35, %v1070_v30  ;;  %v6138_v30 = vpack.c.bf16 %v1131_v40, %v1127_v36  ;;  %v1126_v35 = vld [vmem:[#allocation17 + $0x340] sm:$0xff] }
 0x1ee   :  { %4307 = vmatprep.subr.bf16.mxu0 %v7195_v45  ;;  %v1079_v45 = vld [vmem:[#allocation17 + $0x1c8] sm:$0xff] }
 0x1f1   :  { %4309 = vmatpush1.bf16.msra.mxu0 %v7196_v54  ;;  %v1083_v54 = vld [vmem:[#allocation17 + $0x1e8] sm:$0xff] }
 0x1f2   :  { %4311 = vmatprep.subr.bf16.mxu0 %v7197_v57  ;;  %v6102_v57 = vpack.c.bf16 %v1083_v54, %v1079_v45  ;;  %v1130_v45 = vld [vmem:[#allocation17 + $0x360] sm:$0xff] }
 0x1f3   :  { %v6141_v54 = vpack.c.bf16 %v1130_v45, %v1126_v35 }
 0x1f5   :  { %4313 = vmatpush1.bf16.msra.mxu0 %v7198_v4  ;;  %v1078_v4 = vld [vmem:[#allocation17 + $0x1c0] sm:$0xff] }
 0x1f6   :  { %4315 = vmatprep.subr.bf16.mxu0 %v7199_v6  ;;  %v1082_v6 = vld [vmem:[#allocation17 + $0x1e0] sm:$0xff] }
 0x1f9   :  { %4317 = vmatpush1.bf16.msra.mxu0 %v7200_v21  ;;  %v6105_v21 = vpack.c.bf16 %v1082_v6, %v1078_v4  ;;  %v1135_v4 = vld [vmem:[#allocation17 + $0x388] sm:$0xff] }
 0x1fa   :  { %4319 = vmatprep.subr.bf16.mxu0 %v7201_v24  ;;  %v1087_v24 = vld [vmem:[#allocation17 + $0x208] sm:$0xff] }
 0x1fb   :  { %v1139_v6 = vld [vmem:[#allocation17 + $0x3a8] sm:$0xff] }
 0x1fd   :  { %4321 = vmatpush1.bf16.msra.mxu0 %v5869_v38 }
 0x1fe   :  { %4323 = vmatprep.subr.bf16.mxu0 %v5872_v44  ;;  %v1023_v44 = vld [vmem:[#allocation17 + $0x8] sm:$0xff] }
 0x201   :  { %4325 = vmatpush1.bf16.msra.mxu0 %v5881_v53  ;;  %v1027_v53 = vld [vmem:[#allocation17 + $0x28] sm:$0xff] }
 0x202   :  { %4327 = vmatprep.subr.bf16.mxu0 %v5884_v12  ;;  %v1025_v12 = vld [vmem:[#allocation17 + $0x18] sm:$0xff] }
 0x205   :  { %4329 = vmatpush1.bf16.msra.mxu0 %v5889_v34  ;;  %v6058_v34 = vpack.c.bf16 %v1027_v53, %v1023_v44  ;;  %v1090_v44 = vld [vmem:[#allocation17 + $0x220] sm:$0xff] }
 0x206   :  { %4331 = vmatprep.subr.bf16.mxu0 %v5892_v17  ;;  %v1029_v17 = vld [vmem:[#allocation17 + $0x38] sm:$0xff] }
 0x209   :  { %4333 = vmatpush1.bf16.msra.mxu0 %v5895_v60  ;;  %v1022_v60 = vld [vmem:[#allocation17] sm:$0xff] }
 0x20a   :  { %4335 = vmatprep.subr.bf16.mxu0 %v5898_v0  ;;  %v1026_v0 = vld [vmem:[#allocation17 + $0x20] sm:$0xff] }
 0x20d   :  { %4337 = vmatpush1.bf16.msra.mxu0 %v5902_v58  ;;  %v6060_v58 = vpack.c.bf16 %v1029_v17, %v1025_v12  ;;  %v1095_v12 = vld [vmem:[#allocation17 + $0x248] sm:$0xff] }
 0x20e   :  { %4363 = vmatprep.subr.bf16.mxu0 %v6058_v34  ;;  %v1099_v17 = vld [vmem:[#allocation17 + $0x268] sm:$0xff] }
 0x2a3   :  { %v594_v41 = vpop.f32.mrb[2].mxu0 }
 0x2a4   :  { %v595_v56 = vadd.f32 %v6038_v39, %v594_v41  ;;  %v3812_v38 = vpop.f32.mrb[3].mxu0  ;;  %v1091_v41 = vld [vmem:[#allocation17 + $0x228] sm:$0xff] }
 0x2a5   :  { %v1086_v38 = vld [vmem:[#allocation17 + $0x200] sm:$0xff] }
 0x2a6   :  { %598 = vst [vmem:[#allocation20] sm:$0xff] %v595_v56  ;;  %807 = vmatmul.mubr.f32.vlgmr.msra.gmra.mrb[2].mxu1 %v595_v56  ;;  %878 = vmatmul.mubr.f32.vlgmr.msra.gmra.mrb[4].mxu0 %v595_v56  ;;  %v6108_v56 = vpack.c.bf16 %v1091_v41, %v1087_v24  ;;  %v6111_v53 = vpack.c.bf16 %v1090_v44, %v1086_v38  ;;  %v1134_v41 = vld [vmem:[#allocation17 + $0x380] sm:$0xff] }
 0x2a7   :  { %4340 = vmatpush3.bf16.msra.mxu1 %v5938_v8  ;;  %3845 = vmatprep.mubr.msk.f32.mxu1 %vm5556_vm0, %v7131_v18  ;;  %v6062_v8 = vpack.c.bf16 %v1026_v0, %v1022_v60  ;;  %v6114_v60 = vpack.c.bf16 %v1099_v17, %v1095_v12  ;;  %v1094_v0 = vld [vmem:[#allocation17 + $0x240] sm:$0xff]  ;;  %v6144_v24 = vpack.c.bf16 %v1139_v6, %v1135_v4  ;;  %v1143_v12 = vld [vmem:[#allocation17 + $0x3c8] sm:$0xff]  ;;  %v1084_v18 = vld [vmem:[#allocation17 + $0x1f0] sm:$0xff] }
 0x2a8   :  { %4341 = vmatprep.subr.bf16.mxu1 %v7133_v13  ;;  %v1138_v38 = vld [vmem:[#allocation17 + $0x3a0] sm:$0xff]  ;;  %v1147_v17 = vld [vmem:[#allocation17 + $0x3e8] sm:$0xff] }
 0x2a9   :  { %4365 = vmatpush1.bf16.msra.mxu0 %v6062_v8  ;;  %v6147_v44 = vpack.c.bf16 %v1138_v38, %v1134_v41 }
 0x2ab   :  { %4343 = vmatpush3.bf16.msra.mxu1 %v5944_v22  ;;  %v1031_v22 = vld [vmem:[#allocation17 + $0x48] sm:$0xff] }
 0x2ac   :  { %4344 = vmatprep.subr.bf16.mxu1 %v7133_v13 }
 0x2af   :  { %4346 = vmatpush3.bf16.msra.mxu1 %v5948_v48  ;;  %v1035_v48 = vld [vmem:[#allocation17 + $0x68] sm:$0xff] }
 0x2b0   :  { %4347 = vmatprep.subr.bf16.mxu1 %v7133_v13 }
 0x2b3   :  { %4349 = vmatpush3.bf16.msra.mxu1 %v5952_v63  ;;  %v6067_v63 = vpack.c.bf16 %v1035_v48, %v1031_v22  ;;  %v1098_v22 = vld [vmem:[#allocation17 + $0x260] sm:$0xff] }
 0x2b4   :  { %4350 = vmatprep.subr.bf16.mxu1 %v7133_v13  ;;  %v6117_v48 = vpack.c.bf16 %v1098_v22, %v1094_v0  ;;  %v6150_v0 = vpack.c.bf16 %v1147_v17, %v1143_v12 }
 0x2b5   :  { %4367 = vmatprep.subr.bf16.mxu0 %v6067_v63 }
 0x2b7   :  { %4352 = vmatpush3.bf16.msra.mxu1 %v5956_v31  ;;  %v1030_v31 = vld [vmem:[#allocation17 + $0x40] sm:$0xff] }
 0x2b8   :  { %4353 = vmatprep.subr.bf16.mxu1 %v7133_v13 }
 0x2bb   :  { %4355 = vmatpush3.bf16.msra.mxu1 %v5960_v52  ;;  %v1034_v52 = vld [vmem:[#allocation17 + $0x60] sm:$0xff] }
 0x2bc   :  { %4356 = vmatprep.subr.bf16.mxu1 %v7133_v13 }
 0x2bf   :  { %4358 = vmatpush3.bf16.msra.mxu1 %v5963_v9  ;;  %v6069_v9 = vpack.c.bf16 %v1034_v52, %v1030_v31  ;;  %v1103_v31 = vld [vmem:[#allocation17 + $0x288] sm:$0xff] }
 0x2c0   :  { %4359 = vmatprep.subr.bf16.mxu1 %v7133_v13  ;;  %v1107_v52 = vld [vmem:[#allocation17 + $0x2a8] sm:$0xff]  ;;  %v1088_v13 = vld [vmem:[#allocation17 + $0x210] sm:$0xff] }
 0x2c1   :  { %4369 = vmatpush1.bf16.msra.mxu0 %v6069_v9 }
 0x2c3   :  { %4361 = vmatpush3.bf16.msra.mxu1 %v5969_v10  ;;  %v1039_v10 = vld [vmem:[#allocation17 + $0x88] sm:$0xff] }
 0x2c4   :  { %4427 = vmatprep.subr.bf16.mxu1 %v6060_v58  ;;  %v6072_v2 = vpack.c.bf16 %v1043_v47, %v1039_v10  ;;  %v6120_v10 = vpack.c.bf16 %v1107_v52, %v1103_v31  ;;  %v1102_v47 = vld [vmem:[#allocation17 + $0x280] sm:$0xff] }
 0x2c5   :  { %v6123_v7 = vpack.c.bf16 %v1106_v3, %v1102_v47 }
 0x2c6   :  { %4371 = vmatprep.subr.bf16.mxu0 %v6072_v2 }
 0x2c7   :  { %4373 = vmatpush1.bf16.msra.mxu0 %v6075_v14 }
 0x2c8   :  { %4375 = vmatprep.subr.bf16.mxu0 %v6078_v62 }
 0x2cb   :  { %4377 = vmatpush1.bf16.msra.mxu0 %v6081_v32 }
 0x2cc   :  { %4379 = vmatprep.subr.bf16.mxu0 %v6084_v5 }
 0x2cf   :  { %4381 = vmatpush1.bf16.msra.mxu0 %v6087_v11 }
 0x2d0   :  { %4383 = vmatprep.subr.bf16.mxu0 %v6090_v23 }
 0x2d3   :  { %4385 = vmatpush1.bf16.msra.mxu0 %v6093_v20 }
 0x2d4   :  { %4387 = vmatprep.subr.bf16.mxu0 %v6096_v55 }
 0x2d7   :  { %4389 = vmatpush1.bf16.msra.mxu0 %v6099_v42 }
 0x2d8   :  { %4391 = vmatprep.subr.bf16.mxu0 %v6102_v57 }
 0x2db   :  { %4393 = vmatpush1.bf16.msra.mxu0 %v6105_v21 }
 0x2dc   :  { %4395 = vmatprep.subr.bf16.mxu0 %v6108_v56 }
 0x2df   :  { %4397 = vmatpush1.bf16.msra.mxu0 %v6111_v53 }
 0x2e0   :  { %4399 = vmatprep.subr.bf16.mxu0 %v6114_v60 }
 0x2e3   :  { %4401 = vmatpush1.bf16.msra.mxu0 %v6117_v48 }
 0x2e4   :  { %4403 = vmatprep.subr.bf16.mxu0 %v6120_v10 }
 0x2e7   :  { %4405 = vmatpush1.bf16.msra.mxu0 %v6123_v7 }
 0x2e8   :  { %4407 = vmatprep.subr.bf16.mxu0 %v6126_v15 }
 0x2eb   :  { %4409 = vmatpush1.bf16.msra.mxu0 %v6129_v59 }
 0x2ec   :  { %4411 = vmatprep.subr.bf16.mxu0 %v6132_v46 }
 0x2ef   :  { %4413 = vmatpush1.bf16.msra.mxu0 %v6135_v26 }
 0x2f0   :  { %4415 = vmatprep.subr.bf16.mxu0 %v6138_v30 }
 0x2f3   :  { %4417 = vmatpush1.bf16.msra.mxu0 %v6141_v54 }
 0x2f4   :  { %4419 = vmatprep.subr.bf16.mxu0 %v6144_v24 }
 0x2f7   :  { %4421 = vmatpush1.bf16.msra.mxu0 %v6147_v44 }
 0x2f8   :  { %4423 = vmatprep.subr.bf16.mxu0 %v6150_v0 }
 0x379   :  { %v808_v22 = vpop.f32.mrb[2].mxu1  ;;  %v879_v31 = vpop.f32.mrb[4].mxu0 }
 0x37a   :  { %v884_v52 = vadd.f32 %v808_v22, %v5977_v61  ;;  %v810_v47 = vpop.f32.mrb[3].mxu1  ;;  %v881_v3 = vpop.f32.mrb[5].mxu0  ;;  %v898_v40 = vadd.f32 %v5992_v51, %v879_v31  ;;  %v916_v22 = vstv %s3563_s0  ;;  %v1012_v31 = vstv %s3566_s24  ;;  %s3606_s0 = sld [smem:[#allocation8 + $0x5]]  ;;  %s3602_s24 = sld [smem:[#allocation12 + $0x4]] }
 0x37b   :  { %v885_v37 = vadd.f32 %v810_v47, %v5979_v25  ;;  %v899_v28 = vadd.f32 %v5986_v19, %v881_v3  ;;  %v1024_v47 = vld [vmem:[#allocation17 + $0x10] sm:$0xff] }
 0x37c   :  { %v3557_v33 = vmul.f32 -1.442695, %v884_v52  ;;  %v1019_v52 = vstv %s3569_s23  ;;  %v1028_v3 = vld [vmem:[#allocation17 + $0x30] sm:$0xff]  ;;  %s3605_s23 = sld [smem:[#allocation3 + $0x5]] }
 0x37d   :  { %v3558_v16 = vmul.f32 -1.442695, %v885_v37  ;;  %v1037_v37 = vld [vmem:[#allocation17 + $0x78] sm:$0xff] }
 0x37e   :  { %5301 = vpow2.f32 %v3557_v33  ;;  %v1033_v33 = vld [vmem:[#allocation17 + $0x58] sm:$0xff] }
 0x37f   :  { %5303 = vpow2.f32 %v3558_v16 }
 0x388   :  { %v5302_v49 = vpop.eup %5301 }
 0x389   :  { %v892_v29 = vadd.f32 1.0, %v5302_v49  ;;  %v5304_v43 = vpop.eup %5303 }
 0x38a   :  { %v893_v50 = vadd.f32 1.0, %v5304_v43 }
 0x38b   :  { %5305 = vrcp.f32 %v892_v29 }
 0x38c   :  { %5307 = vrcp.f32 %v893_v50 }
 0x395   :  { %v5306_v36 = vpop.eup %5305 }
 0x396   :  { %v900_v35 = vmul.f32 %v5306_v36, %v899_v28  ;;  %v5308_v4 = vpop.eup %5307  ;;  %v6162_v28 = vpack.c.bf16 %v1028_v3, %v1024_v47  ;;  %v1048_v3 = vld [vmem:[#allocation17 + $0xd0] sm:$0xff] }
 0x397   :  { %v903_v6 = vsub.f32 1.0, %v5308_v4  ;;  %v905_v38 = vmul.f32 %v5308_v4, %v6000_v27  ;;  %v1036_v4 = vld [vmem:[#allocation17 + $0x70] sm:$0xff] }
 0x398   :  { %v901_v45 = vadd.f32 %v900_v35, %v898_v40  ;;  %v6167_v35 = vpack.c.bf16 %v1037_v37, %v1033_v33  ;;  %v1052_v33 = vld [vmem:[#allocation17 + $0xf0] sm:$0xff]  ;;  %v1057_v37 = vld [vmem:[#allocation17 + $0x118] sm:$0xff] }
 0x39a   :  { %5309 = vtanh.f32 %v901_v45  ;;  %v1032_v45 = vld [vmem:[#allocation17 + $0x50] sm:$0xff] }
 0x3a4   :  { %v5310_v41 = vpop.eup %5309 }
 0x3a5   :  { %v904_v12 = vmul.f32 %v5310_v41, %v903_v6  ;;  %v1041_v6 = vld [vmem:[#allocation17 + $0x98] sm:$0xff] }
 0x3a6   :  { %v1045_v41 = vld [vmem:[#allocation17 + $0xb8] sm:$0xff] }
 0x3a7   :  { %v906_v17 = vadd.f32 %v905_v38, %v904_v12  ;;  %v6172_v38 = vpack.c.bf16 %v1036_v4, %v1032_v45  ;;  %v1040_v12 = vld [vmem:[#allocation17 + $0x90] sm:$0xff]  ;;  %v1069_v45 = vld [vmem:[#allocation17 + $0x178] sm:$0xff] }
 0x3a9   :  { %910 = vst [vmem:[%s909_s3] sm:$0xff] %v906_v17  ;;  %v1044_v17 = vld [vmem:[#allocation17 + $0xb0] sm:$0xff]  ;;  %s3608_s3 = sld [smem:[#allocation9 + $0x5]] }
 0x3b0   :  { %v914_v16 = vld [vmem:[%s913_s27] sm:$0xff]  ;;  %s3590_s27 = sld [smem:[#allocation14 + $0x4]] }
 0x3b1   :  { %v6159_v27 = vld [vmem:[%s1009_s28] sm:$0xff]  ;;  %v917_v29 = vmul.f32 %v916_v22, %v914_v16  ;;  %v1049_v22 = vld [vmem:[#allocation17 + $0xd8] sm:$0xff]  ;;  %s3593_s28 = sld [smem:[#allocation8 + $0x4]] }
 0x3b2   :  { %v1017_v49 = vld [vmem:[%s1016_s29] sm:$0xff]  ;;  %v1013_v43 = vmul.f32 %v1012_v31, %v6159_v27  ;;  %v1053_v31 = vld [vmem:[#allocation17 + $0xf8] sm:$0xff]  ;;  %s3589_s29 = sld [smem:[#allocation12 + $0x3]] }
 0x3b3   :  { %v1020_v50 = vmul.f32 %v1019_v52, %v1017_v49  ;;  %v918_v36 = vadd.f32 %v917_v29, %v5996_v1  ;;  %v6175_v1 = vpack.c.bf16 %v1045_v41, %v1041_v6  ;;  %v6178_v52 = vpack.c.bf16 %v1044_v17, %v1040_v12  ;;  %v1061_v16 = vld [vmem:[#allocation17 + $0x138] sm:$0xff]  ;;  %v1064_v41 = vld [vmem:[#allocation17 + $0x150] sm:$0xff] }
 0x3b4   :  { %v6181_v47 = vpack.c.bf16 %v1053_v31, %v1049_v22  ;;  %v6184_v49 = vpack.c.bf16 %v1052_v33, %v1048_v3  ;;  %v6187_v29 = vpack.c.bf16 %v1061_v16, %v1057_v37  ;;  %v1068_v12 = vld [vmem:[#allocation17 + $0x170] sm:$0xff]  ;;  %v1073_v17 = vld [vmem:[#allocation17 + $0x198] sm:$0xff] }
 0x3b5   :  { %v6165_v40 = vadd.f32 %v1020_v50, %v1013_v43  ;;  %3846 = vmatmul.mubr.f32.vlgmr.msra.gmra.mrb[4].mxu1 %v918_v36  ;;  %v1056_v43 = vld [vmem:[#allocation17 + $0x110] sm:$0xff]  ;;  %v1065_v36 = vld [vmem:[#allocation17 + $0x158] sm:$0xff]  ;;  %v6196_v31 = vpack.c.bf16 %v1068_v12, %v1064_v41 }
 0x3b6   :  { %4429 = vmatpush1.bf16.msra.mxu1 %v6162_v28  ;;  %v1060_v50 = vld [vmem:[#allocation17 + $0x130] sm:$0xff]  ;;  %v6193_v6 = vpack.c.bf16 %v1069_v45, %v1065_v36  ;;  %v1077_v22 = vld [vmem:[#allocation17 + $0x1b8] sm:$0xff]  ;;  %s3591_s1 = sshll.u32 %s3590_s27, 3  ;;  %s3607_s27 = sshll.u32 %s3606_s0, 3 }
 0x3b7   :  { %1214 = vmatprep.mubr.f32.mxu0 %v6165_v40  ;;  %1285 = vmatprep.mubr.f32.mxu1 %v6165_v40  ;;  %v6190_v4 = vpack.c.bf16 %v1060_v50, %v1056_v43  ;;  %7202 = vst [vmem:[#allocation29_spill] sm:$0xff] %v6196_v31  ;;  %v6199_v3 = vpack.c.bf16 %v1077_v22, %v1073_v17  ;;  %v1072_v33 = vld [vmem:[#allocation17 + $0x190] sm:$0xff]  ;;  %v1081_v16 = vld [vmem:[#allocation17 + $0x1d8] sm:$0xff] }
 0x3b8   :  { %4431 = vmatprep.subr.bf16.mxu1 %v6167_v35  ;;  %v1076_v37 = vld [vmem:[#allocation17 + $0x1b0] sm:$0xff]  ;;  %v1085_v43 = vld [vmem:[#allocation17 + $0x1f8] sm:$0xff] }
 0x3b9   :  { %7203 = vst [vmem:[#allocation30_spill] sm:$0xff] %v6199_v3  ;;  %v6202_v50 = vpack.c.bf16 %v1076_v37, %v1072_v33  ;;  %v6205_v36 = vpack.c.bf16 %v1085_v43, %v1081_v16  ;;  %v1080_v45 = vld [vmem:[#allocation17 + $0x1d0] sm:$0xff]  ;;  %v1089_v41 = vld [vmem:[#allocation17 + $0x218] sm:$0xff] }
 0x3ba   :  { %4433 = vmatpush1.bf16.msra.mxu1 %v6172_v38  ;;  %v1093_v12 = vld [vmem:[#allocation17 + $0x238] sm:$0xff]  ;;  %v6208_v17 = vpack.c.bf16 %v1084_v18, %v1080_v45 }
 0x3bb   :  { %4435 = vmatprep.subr.bf16.mxu1 %v6175_v1  ;;  %7204 = vst [vmem:[#allocation31_spill] sm:$0xff] %v6202_v50  ;;  %7205 = vst [vmem:[#allocation32_spill] sm:$0xff] %v6205_v36  ;;  %v6211_v22 = vpack.c.bf16 %v1093_v12, %v1089_v41  ;;  %v1097_v33 = vld [vmem:[#allocation17 + $0x258] sm:$0xff] }
 0x3bc   :  { %7206 = vst [vmem:[#allocation33_spill] sm:$0xff] %v6208_v17  ;;  %v1101_v37 = vld [vmem:[#allocation17 + $0x278] sm:$0xff] }
 0x3bd   :  { %7207 = vst [vmem:[#allocation34_spill] sm:$0xff] %v6211_v22  ;;  %v6217_v43 = vpack.c.bf16 %v1101_v37, %v1097_v33  ;;  %v1105_v18 = vld [vmem:[#allocation17 + $0x298] sm:$0xff] }
 0x3be   :  { %4437 = vmatpush1.bf16.msra.mxu1 %v6178_v52  ;;  %v1109_v45 = vld [vmem:[#allocation17 + $0x2b8] sm:$0xff] }
 0x3bf   :  { %4439 = vmatprep.subr.bf16.mxu1 %v6181_v47  ;;  %7209 = vst [vmem:[#allocation36_spill] sm:$0xff] %v6217_v43  ;;  %v6223_v12 = vpack.c.bf16 %v1109_v45, %v1105_v18 }
 0x3c1   :  { %7211 = vst [vmem:[#allocation38_spill] sm:$0xff] %v6223_v12 }
 0x3c2   :  { %4441 = vmatpush1.bf16.msra.mxu1 %v6184_v49 }
 0x3c3   :  { %4443 = vmatprep.subr.bf16.mxu1 %v6187_v29 }
 0x3c6   :  { %4445 = vmatpush1.bf16.msra.mxu1 %v6190_v4 }
 0x3c7   :  { %4447 = vmatprep.subr.bf16.mxu1 %v6193_v6 }
 0x3ca   :  { %4449 = vmatpush1.bf16.msra.mxu1 %v6196_v31  ;;  %v1092_v31 = vld [vmem:[#allocation17 + $0x230] sm:$0xff] }
 0x3cb   :  { %4451 = vmatprep.subr.bf16.mxu1 %v6199_v3  ;;  %v6214_v16 = vpack.c.bf16 %v1092_v31, %v1088_v13  ;;  %v1096_v3 = vld [vmem:[#allocation17 + $0x250] sm:$0xff]  ;;  %v1113_v13 = vld [vmem:[#allocation17 + $0x2d8] sm:$0xff] }
 0x3cc   :  { %v1117_v31 = vld [vmem:[#allocation17 + $0x2f8] sm:$0xff] }
 0x3cd   :  { %7208 = vst [vmem:[#allocation35_spill] sm:$0xff] %v6214_v16  ;;  %v6229_v37 = vpack.c.bf16 %v1117_v31, %v1113_v13 }
 0x3ce   :  { %4453 = vmatpush1.bf16.msra.mxu1 %v6202_v50  ;;  %v1100_v50 = vld [vmem:[#allocation17 + $0x270] sm:$0xff] }
 0x3cf   :  { %4455 = vmatprep.subr.bf16.mxu1 %v6205_v36  ;;  %v6220_v41 = vpack.c.bf16 %v1100_v50, %v1096_v3  ;;  %v1104_v36 = vld [vmem:[#allocation17 + $0x290] sm:$0xff]  ;;  %7213 = vst [vmem:[#allocation40_spill] sm:$0xff] %v6229_v37  ;;  %v1121_v3 = vld [vmem:[#allocation17 + $0x318] sm:$0xff] }
 0x3d0   :  { %v1125_v50 = vld [vmem:[#allocation17 + $0x338] sm:$0xff] }
 0x3d1   :  { %7210 = vst [vmem:[#allocation37_spill] sm:$0xff] %v6220_v41  ;;  %v6235_v45 = vpack.c.bf16 %v1125_v50, %v1121_v3 }
 0x3d2   :  { %4457 = vmatpush1.bf16.msra.mxu1 %v6208_v17  ;;  %v1108_v17 = vld [vmem:[#allocation17 + $0x2b0] sm:$0xff] }
 0x3d3   :  { %4459 = vmatprep.subr.bf16.mxu1 %v6211_v22  ;;  %v6226_v33 = vpack.c.bf16 %v1108_v17, %v1104_v36  ;;  %v1112_v22 = vld [vmem:[#allocation17 + $0x2d0] sm:$0xff]  ;;  %v1129_v36 = vld [vmem:[#allocation17 + $0x358] sm:$0xff] }
 0x3d4   :  { %v1133_v17 = vld [vmem:[#allocation17 + $0x378] sm:$0xff] }
 0x3d5   :  { %7212 = vst [vmem:[#allocation39_spill] sm:$0xff] %v6226_v33  ;;  %v6241_v31 = vpack.c.bf16 %v1133_v17, %v1129_v36 }
 0x3d6   :  { %4461 = vmatpush1.bf16.msra.mxu1 %v6214_v16  ;;  %v1116_v16 = vld [vmem:[#allocation17 + $0x2f0] sm:$0xff] }
 0x3d7   :  { %4463 = vmatprep.subr.bf16.mxu1 %v6217_v43  ;;  %v6232_v18 = vpack.c.bf16 %v1116_v16, %v1112_v22  ;;  %v1120_v43 = vld [vmem:[#allocation17 + $0x310] sm:$0xff]  ;;  %7216 = vst [vmem:[#allocation43_spill] sm:$0xff] %v6241_v31  ;;  %v1137_v22 = vld [vmem:[#allocation17 + $0x398] sm:$0xff] }
 0x3d8   :  { %v1141_v16 = vld [vmem:[#allocation17 + $0x3b8] sm:$0xff] }
 0x3d9   :  { %7214 = vst [vmem:[#allocation41_spill] sm:$0xff] %v6232_v18  ;;  %v6247_v50 = vpack.c.bf16 %v1141_v16, %v1137_v22  ;;  %v1144_v22 = vld [vmem:[#allocation17 + $0x3d0] sm:$0xff] }
 0x3da   :  { %4465 = vmatpush1.bf16.msra.mxu1 %v6220_v41  ;;  %v1124_v41 = vld [vmem:[#allocation17 + $0x330] sm:$0xff] }
 0x3db   :  { %4467 = vmatprep.subr.bf16.mxu1 %v6223_v12  ;;  %v6238_v13 = vpack.c.bf16 %v1124_v41, %v1120_v43  ;;  %v1128_v12 = vld [vmem:[#allocation17 + $0x350] sm:$0xff]  ;;  %v1145_v43 = vld [vmem:[#allocation17 + $0x3d8] sm:$0xff] }
 0x3dc   :  { %v1149_v41 = vld [vmem:[#allocation17 + $0x3f8] sm:$0xff] }
 0x3dd   :  { %7215 = vst [vmem:[#allocation42_spill] sm:$0xff] %v6238_v13  ;;  %v6253_v17 = vpack.c.bf16 %v1149_v41, %v1145_v43 }
 0x3de   :  { %4469 = vmatpush1.bf16.msra.mxu1 %v6226_v33  ;;  %v1132_v33 = vld [vmem:[#allocation17 + $0x370] sm:$0xff] }
 0x3df   :  { %4471 = vmatprep.subr.bf16.mxu1 %v6229_v37  ;;  %v6244_v3 = vpack.c.bf16 %v1132_v33, %v1128_v12  ;;  %v1136_v37 = vld [vmem:[#allocation17 + $0x390] sm:$0xff]  ;;  %7217 = vst [vmem:[#allocation44_spill] sm:$0xff] %v6253_v17  ;;  %v1142_v12 = vld [vmem:[#allocation17 + $0x3c0] sm:$0xff] }
 0x3e0   :  { %v1146_v33 = vld [vmem:[#allocation17 + $0x3e0] sm:$0xff] }
 0x3e1   :  { %v4424_v16 = vpack.c.bf16 %v1146_v33, %v1142_v12 }
 0x3e2   :  { %4473 = vmatpush1.bf16.msra.mxu1 %v6232_v18  ;;  %v1140_v18 = vld [vmem:[#allocation17 + $0x3b0] sm:$0xff] }
 0x3e3   :  { %4475 = vmatprep.subr.bf16.mxu1 %v6235_v45  ;;  %v6250_v36 = vpack.c.bf16 %v1140_v18, %v1136_v37  ;;  %4425 = vmatpush1.bf16.msra.mxu0 %v4424_v16  ;;  %v7218_v37 = vmov 0.0|0.0  }
 0x3e4   :  { %4490 = vmatprep.subr.bf16.mxu0 %v7218_v37 }
 0x3e6   :  { %4477 = vmatpush1.bf16.msra.mxu1 %v6238_v13 }
 0x3e7   :  { %4479 = vmatprep.subr.bf16.mxu1 %v6241_v31  ;;  %v1148_v31 = vld [vmem:[#allocation17 + $0x3f0] sm:$0xff] }
 0x3e8   :  { %v6257_v13 = vpack.c.bf16 %v1148_v31, %v1144_v22 }
 0x3ea   :  { %4481 = vmatpush1.bf16.msra.mxu1 %v6244_v3 }
 0x3eb   :  { %4483 = vmatprep.subr.bf16.mxu1 %v6247_v50 }
 0x3ee   :  { %4485 = vmatpush1.bf16.msra.mxu1 %v6250_v36 }
 0x3ef   :  { %4487 = vmatprep.subr.bf16.mxu1 %v6253_v17  ;;  %v7219_v17 = vmov 0.0  }
 0x3f2   :  { %4489 = vmatpush1.bf16.msra.mxu1 %v6257_v13 }
 0x3f3   :  { %4515 = vmatprep.subr.bf16.mxu1 %v6058_v34  ;;  %v1327_v34 = vld [vmem:[#allocation18] sm:$0xff] }
 0x488   :  { %v1001_v18 = vpop.f32.mrb[4].mxu1 }
 0x489   :  { %v1002_v43 = vadd.f32 %v6038_v39, %v1001_v18  ;;  %v3847_v41 = vpop.f32.mrb[5].mxu1 }
 0x48b   :  { %1006 = vst [vmem:[#allocation20 + $0x8] sm:$0xff] %v1002_v43  ;;  %1215 = vmatmul.mubr.f32.vlgmr.msra.gmra.mrb[6].mxu0 %v1002_v43  ;;  %1286 = vmatmul.mubr.f32.vlgmr.msra.gmra.mrb[6].mxu1 %v1002_v43 }
 0x48c   :  { %3880 = vmatprep.mubr.msk.f32.mxu0 %vm5556_vm0, %v7219_v17  ;;  %4517 = vmatpush1.bf16.msra.mxu1 %v6062_v8  ;;  %v1328_v8 = vld [vmem:[#allocation18 + $0x8] sm:$0xff] }
 0x48d   :  { %4519 = vmatprep.subr.bf16.mxu1 %v6067_v63  ;;  %v6296_v63 = vpack.c.bf16 %v1328_v8, %v1327_v34 }
 0x48f   :  { %4492 = vmatpush3.bf16.msra.mxu0 %v6296_v63 }
 0x490   :  { %4521 = vmatpush1.bf16.msra.mxu1 %v6069_v9  ;;  %4493 = vmatprep.subr.bf16.mxu0 %v7218_v37  ;;  %v1329_v9 = vld [vmem:[#allocation18 + $0x10] sm:$0xff] }
 0x491   :  { %4523 = vmatprep.subr.bf16.mxu1 %v6072_v2  ;;  %v1330_v2 = vld [vmem:[#allocation18 + $0x18] sm:$0xff] }
 0x494   :  { %4525 = vmatpush1.bf16.msra.mxu1 %v6075_v14  ;;  %v6300_v14 = vpack.c.bf16 %v1330_v2, %v1329_v9 }
 0x495   :  { %4527 = vmatprep.subr.bf16.mxu1 %v6078_v62  ;;  %v1331_v62 = vld [vmem:[#allocation18 + $0x20] sm:$0xff] }
 0x496   :  { %4495 = vmatpush3.bf16.msra.mxu0 %v6300_v14 }
 0x497   :  { %4496 = vmatprep.subr.bf16.mxu0 %v7218_v37 }
 0x498   :  { %4529 = vmatpush1.bf16.msra.mxu1 %v6081_v32  ;;  %v1332_v32 = vld [vmem:[#allocation18 + $0x28] sm:$0xff] }
 0x499   :  { %4531 = vmatprep.subr.bf16.mxu1 %v6084_v5  ;;  %v6304_v5 = vpack.c.bf16 %v1332_v32, %v1331_v62 }
 0x49b   :  { %4498 = vmatpush3.bf16.msra.mxu0 %v6304_v5 }
 0x49c   :  { %4533 = vmatpush1.bf16.msra.mxu1 %v6087_v11  ;;  %4499 = vmatprep.subr.bf16.mxu0 %v7218_v37  ;;  %v1333_v11 = vld [vmem:[#allocation18 + $0x30] sm:$0xff] }
 0x49d   :  { %4535 = vmatprep.subr.bf16.mxu1 %v6090_v23  ;;  %v1334_v23 = vld [vmem:[#allocation18 + $0x38] sm:$0xff] }
 0x4a0   :  { %4537 = vmatpush1.bf16.msra.mxu1 %v6093_v20  ;;  %v6308_v20 = vpack.c.bf16 %v1334_v23, %v1333_v11  ;;  %v1420_v11 = vstv %s3579_s6  ;;  %v1427_v23 = vstv %s3582_s19  ;;  %s1729_s6 = scalar_lea.vmem [#allocation2], %s3588_s17  ;;  %s1825_s19 = scalar_lea.vmem [#allocation2], %s3591_s1 }
 0x4a1   :  { %4539 = vmatprep.subr.bf16.mxu1 %v6096_v55  ;;  %v1335_v55 = vld [vmem:[#allocation18 + $0x40] sm:$0xff]  ;;  %s3613_s17 = sld [smem:[#allocation11 + $0x5]]  ;;  %s3616_s1 = sld [smem:[#allocation14 + $0x6]] }
 0x4a2   :  { %4501 = vmatpush3.bf16.msra.mxu0 %v6308_v20 }
 0x4a3   :  { %4502 = vmatprep.subr.bf16.mxu0 %v7218_v37 }
 0x4a4   :  { %4541 = vmatpush1.bf16.msra.mxu1 %v6099_v42  ;;  %v1336_v42 = vld [vmem:[#allocation18 + $0x48] sm:$0xff] }
 0x4a5   :  { %4543 = vmatprep.subr.bf16.mxu1 %v6102_v57  ;;  %v6312_v57 = vpack.c.bf16 %v1336_v42, %v1335_v55 }
 0x4a7   :  { %4504 = vmatpush3.bf16.msra.mxu0 %v6312_v57  ;;  %s3614_s7 = sshll.u32 %s3613_s17, 3 }
 0x4a8   :  { %4545 = vmatpush1.bf16.msra.mxu1 %v6105_v21  ;;  %4505 = vmatprep.subr.bf16.mxu0 %v7218_v37  ;;  %v1337_v21 = vld [vmem:[#allocation18 + $0x50] sm:$0xff] }
 0x4a9   :  { %4547 = vmatprep.subr.bf16.mxu1 %v6108_v56  ;;  %v1338_v56 = vld [vmem:[#allocation18 + $0x58] sm:$0xff] }
 0x4ac   :  { %4549 = vmatpush1.bf16.msra.mxu1 %v6111_v53  ;;  %v1339_v53 = vld [vmem:[#allocation18 + $0x60] sm:$0xff] }
 0x4ad   :  { %4551 = vmatprep.subr.bf16.mxu1 %v6114_v60  ;;  %v6316_v60 = vpack.c.bf16 %v1338_v56, %v1337_v21 }
 0x4af   :  { %4507 = vmatpush3.bf16.msra.mxu0 %v6316_v60 }
 0x4b0   :  { %4553 = vmatpush1.bf16.msra.mxu1 %v6117_v48  ;;  %v1340_v48 = vld [vmem:[#allocation18 + $0x68] sm:$0xff]  ;;  %4508 = vmatprep.subr.bf16.mxu0 %v7218_v37 }
 0x4b1   :  { %4555 = vmatprep.subr.bf16.mxu1 %v6120_v10  ;;  %v6319_v10 = vpack.c.bf16 %v1340_v48, %v1339_v53 }
 0x4b3   :  { %4510 = vmatpush3.bf16.msra.mxu0 %v6319_v10 }
 0x4b4   :  { %4557 = vmatpush1.bf16.msra.mxu1 %v6123_v7  ;;  %v1341_v7 = vld [vmem:[#allocation18 + $0x70] sm:$0xff]  ;;  %4511 = vmatprep.subr.bf16.mxu0 %v7218_v37 }
 0x4b5   :  { %4559 = vmatprep.subr.bf16.mxu1 %v6126_v15  ;;  %v1342_v15 = vld [vmem:[#allocation18 + $0x78] sm:$0xff] }
 0x4b8   :  { %4561 = vmatpush1.bf16.msra.mxu1 %v6129_v59  ;;  %v6323_v59 = vpack.c.bf16 %v1342_v15, %v1341_v7  ;;  %v7231_v15 = vld [vmem:[#allocation40_spill] sm:$0xff] }
 0x4b9   :  { %4563 = vmatprep.subr.bf16.mxu1 %v6132_v46 }
 0x4ba   :  { %4513 = vmatpush3.bf16.msra.mxu0 %v6323_v59 }
 0x4bb   :  { %4579 = vmatprep.subr.bf16.mxu0 %v6060_v58 }
 0x4bc   :  { %4565 = vmatpush1.bf16.msra.mxu1 %v6135_v26 }
 0x4bd   :  { %4567 = vmatprep.subr.bf16.mxu1 %v6138_v30 }
 0x4c0   :  { %4569 = vmatpush1.bf16.msra.mxu1 %v6141_v54 }
 0x4c1   :  { %4571 = vmatprep.subr.bf16.mxu1 %v6144_v24 }
 0x4c4   :  { %4573 = vmatpush1.bf16.msra.mxu1 %v6147_v44 }
 0x4c5   :  { %4575 = vmatprep.subr.bf16.mxu1 %v6150_v0 }
 0x4c8   :  { %4577 = vmatpush1.bf16.msra.mxu1 %v4424_v16 }
 0x4c9   :  { %4642 = vmatprep.subr.bf16.mxu1 %v7218_v37 }
 0x55e   :  { %v1216_v46 = vpop.f32.mrb[6].mxu0  ;;  %v1287_v26 = vpop.f32.mrb[6].mxu1 }
 0x55f   :  { %v1292_v30 = vadd.f32 %v1216_v46, %v5977_v61  ;;  %v1218_v54 = vpop.f32.mrb[7].mxu0  ;;  %v1289_v24 = vpop.f32.mrb[7].mxu1  ;;  %v1306_v43 = vadd.f32 %v5992_v51, %v1287_v26  ;;  %v1324_v51 = vstv %s3576_s18  ;;  %v7232_v46 = vld [vmem:[#allocation41_spill] sm:$0xff]  ;;  %v7233_v26 = vld [vmem:[#allocation42_spill] sm:$0xff]  ;;  %s3594_s18 = sshll.u32 %s3593_s28, 3 }
 0x560   :  { %v1293_v0 = vadd.f32 %v1218_v54, %v5979_v25  ;;  %v1307_v18 = vadd.f32 %v5986_v19, %v1289_v24  ;;  %v7235_v54 = vld [vmem:[#allocation44_spill] sm:$0xff] }
 0x561   :  { %v3570_v44 = vmul.f32 -1.442695, %v1292_v30  ;;  %v7234_v30 = vld [vmem:[#allocation43_spill] sm:$0xff] }
 0x562   :  { %v3571_v31 = vmul.f32 -1.442695, %v1293_v0 }
 0x563   :  { %5311 = vpow2.f32 %v3570_v44 }
 0x564   :  { %5313 = vpow2.f32 %v3571_v31 }
 0x56d   :  { %v5312_v12 = vpop.eup %5311 }
 0x56e   :  { %v1300_v33 = vadd.f32 1.0, %v5312_v12  ;;  %v5314_v22 = vpop.eup %5313  ;;  %v1855_v12 = vld [vmem:[#allocation17 + $0x88] sm:$0xff] }
 0x56f   :  { %v1301_v16 = vadd.f32 1.0, %v5314_v22 }
 0x570   :  { %5315 = vrcp.f32 %v1300_v33  ;;  %v1859_v33 = vld [vmem:[#allocation17 + $0xa8] sm:$0xff] }
 0x571   :  { %5317 = vrcp.f32 %v1301_v16  ;;  %v6404_v22 = vpack.c.bf16 %v1859_v33, %v1855_v12  ;;  %v1854_v16 = vld [vmem:[#allocation17 + $0x80] sm:$0xff]  ;;  %v1927_v33 = vld [vmem:[#allocation17 + $0x2c8] sm:$0xff] }
 0x57a   :  { %v5316_v58 = vpop.eup %5315 }
 0x57b   :  { %v1308_v41 = vmul.f32 %v5316_v58, %v1307_v18  ;;  %v5318_v8 = vpop.eup %5317  ;;  %v1858_v18 = vld [vmem:[#allocation17 + $0xa0] sm:$0xff] }
 0x57c   :  { %v1311_v9 = vsub.f32 1.0, %v5318_v8  ;;  %v1313_v62 = vmul.f32 %v5318_v8, %v6165_v40  ;;  %v6407_v58 = vpack.c.bf16 %v1858_v18, %v1854_v16  ;;  %v1862_v8 = vld [vmem:[#allocation17 + $0xc0] sm:$0xff]  ;;  %v1931_v16 = vld [vmem:[#allocation17 + $0x2e8] sm:$0xff] }
 0x57d   :  { %v1309_v34 = vadd.f32 %v1308_v41, %v1306_v43  ;;  %v1863_v43 = vld [vmem:[#allocation17 + $0xc8] sm:$0xff]  ;;  %v6458_v18 = vpack.c.bf16 %v1931_v16, %v1927_v33 }
 0x57e   :  { %v1867_v41 = vld [vmem:[#allocation17 + $0xe8] sm:$0xff] }
 0x57f   :  { %5319 = vtanh.f32 %v1309_v34  ;;  %v6410_v34 = vpack.c.bf16 %v1867_v41, %v1863_v43  ;;  %v1926_v43 = vld [vmem:[#allocation17 + $0x2c0] sm:$0xff] }
 0x580   :  { %v1930_v41 = vld [vmem:[#allocation17 + $0x2e0] sm:$0xff] }
 0x589   :  { %v5320_v2 = vpop.eup %5319 }
 0x58a   :  { %v1312_v32 = vmul.f32 %v5320_v2, %v1311_v9  ;;  %v1866_v9 = vld [vmem:[#allocation17 + $0xe0] sm:$0xff] }
 0x58b   :  { %v6413_v2 = vpack.c.bf16 %v1866_v9, %v1862_v8  ;;  %v6461_v8 = vpack.c.bf16 %v1930_v41, %v1926_v43  ;;  %v1935_v9 = vld [vmem:[#allocation17 + $0x308] sm:$0xff] }
 0x58c   :  { %v1314_v19 = vadd.f32 %v1313_v62, %v1312_v32  ;;  %v1871_v62 = vld [vmem:[#allocation17 + $0x108] sm:$0xff] }
 0x58d   :  { %v1875_v32 = vld [vmem:[#allocation17 + $0x128] sm:$0xff] }
 0x58e   :  { %1318 = vst [vmem:[%s1317_s20] sm:$0xff] %v1314_v19  ;;  %v6416_v19 = vpack.c.bf16 %v1875_v32, %v1871_v62  ;;  %v1939_v62 = vld [vmem:[#allocation17 + $0x328] sm:$0xff]  ;;  %s1832_s20 = scalar_lea.vmem [#allocation2], %s3594_s18  ;;  %s3619_s18 = sld [smem:[#allocation8 + $0x6]] }
 0x58f   :  { %v6464_v32 = vpack.c.bf16 %v1939_v62, %v1935_v9  ;;  %v6491_v9 = vld [vmem:[%s7117_s11] ss:$0 sm:$0xff] }
 0x595   :  { %v1322_v55 = vld [vmem:[%s1321_s4] sm:$0xff]  ;;  %s3599_s4 = sshll.u32 %s3598_s2, 3  ;;  %s3617_s2 = sshll.u32 %s3616_s1, 3 }
 0x596   :  { %v6333_v42 = vld [vmem:[%s1417_s22] sm:$0xff]  ;;  %v1325_v21 = vmul.f32 %v1324_v51, %v1322_v55  ;;  %v1870_v51 = vld [vmem:[#allocation17 + $0x100] sm:$0xff]  ;;  %s3600_s22 = sld [smem:[#allocation11 + $0x4]]  ;;  %s2133_s5 = scalar_lea.vmem [#allocation2], %s3599_s4 }
 0x597   :  { %v1425_v40 = vld [vmem:[%s1424_s9] sm:$0xff]  ;;  %v1421_v56 = vmul.f32 %v1420_v11, %v6333_v42  ;;  %v1874_v11 = vld [vmem:[#allocation17 + $0x120] sm:$0xff]  ;;  %s3603_s9 = sld [smem:[#allocation14 + $0x5]]  ;;  %s3620_s4 = sshll.u32 %s3619_s18, 3 }
 0x598   :  { %v1428_v53 = vmul.f32 %v1427_v23, %v1425_v40  ;;  %v1326_v48 = vadd.f32 %v1325_v21, %v6159_v27  ;;  %v7220_v27 = vld [vmem:[#allocation29_spill] sm:$0xff]  ;;  %v6419_v23 = vpack.c.bf16 %v1874_v11, %v1870_v51  ;;  %v1879_v55 = vld [vmem:[#allocation17 + $0x148] sm:$0xff]  ;;  %s2648_s0 = scalar_lea.vmem [#allocation2], %s3620_s4  ;;  %s3641_s4 = sld [smem:[#allocation12 + $0x7]] }
 0x599   :  { %v1883_v40 = vld [vmem:[#allocation17 + $0x168] sm:$0xff]  ;;  %v1934_v51 = vld [vmem:[#allocation17 + $0x300] sm:$0xff] }
 0x59a   :  { %v6337_v7 = vadd.f32 %v1428_v53, %v1421_v56  ;;  %3881 = vmatmul.mubr.f32.vlgmr.msra.gmra.mrb[8].mxu0 %v1326_v48  ;;  %v6422_v21 = vpack.c.bf16 %v1883_v40, %v1879_v55  ;;  %v1878_v56 = vld [vmem:[#allocation17 + $0x140] sm:$0xff]  ;;  %v1943_v40 = vld [vmem:[#allocation17 + $0x348] sm:$0xff] }
 0x59b   :  { %4581 = vmatpush1.bf16.msra.mxu0 %v6162_v28  ;;  %v7221_v28 = vld [vmem:[#allocation30_spill] sm:$0xff]  ;;  %v1882_v53 = vld [vmem:[#allocation17 + $0x160] sm:$0xff] }
 0x59c   :  { %1622 = vmatprep.mubr.f32.mxu1 %v6337_v7  ;;  %1693 = vmatprep.mubr.f32.mxu0 %v6337_v7  ;;  %v6425_v48 = vpack.c.bf16 %v1882_v53, %v1878_v56  ;;  %v1938_v11 = vld [vmem:[#allocation17 + $0x320] sm:$0xff]  ;;  %v1947_v56 = vld [vmem:[#allocation17 + $0x368] sm:$0xff]  ;;  %s3601_s25 = sshll.u32 %s3600_s22, 3  ;;  %s2545_s22 = scalar_lea.vmem [#allocation2], %s3614_s7 }
 0x59d   :  { %4583 = vmatprep.subr.bf16.mxu0 %v6167_v35  ;;  %v7222_v35 = vld [vmem:[#allocation31_spill] sm:$0xff]  ;;  %v6467_v55 = vpack.c.bf16 %v1938_v11, %v1934_v51  ;;  %v6470_v53 = vpack.c.bf16 %v1947_v56, %v1943_v40  ;;  %v6497_v11 = vld [vmem:[%s7116_s10] ss:$0 sm:$0xff]  ;;  %s3604_s26 = sshll.u32 %s3603_s9, 3  ;;  %s2137_s28 = scalar_lea.vmem [#allocation2], %s3601_s25 }
 0x59e   :  { %s2641_s9 = scalar_lea.vmem [#allocation2], %s3617_s2  ;;  %s3624_s25 = sld [smem:[#allocation15 + $0x6]] }
 0x59f   :  { %4585 = vmatpush1.bf16.msra.mxu0 %v6172_v38  ;;  %v7223_v38 = vld [vmem:[#allocation32_spill] sm:$0xff]  ;;  %s3639_s7 = sld [smem:[#allocation11 + $0x7]] }
 0x5a0   :  { %4587 = vmatprep.subr.bf16.mxu0 %v6175_v1  ;;  %v7224_v1 = vld [vmem:[#allocation33_spill] sm:$0xff] }
 0x5a3   :  { %4589 = vmatpush1.bf16.msra.mxu0 %v6178_v52  ;;  %v7225_v52 = vld [vmem:[#allocation34_spill] sm:$0xff] }
 0x5a4   :  { %4591 = vmatprep.subr.bf16.mxu0 %v6181_v47  ;;  %v7226_v47 = vld [vmem:[#allocation35_spill] sm:$0xff] }
 0x5a7   :  { %4593 = vmatpush1.bf16.msra.mxu0 %v6184_v49  ;;  %v7227_v49 = vld [vmem:[#allocation36_spill] sm:$0xff] }
 0x5a8   :  { %4595 = vmatprep.subr.bf16.mxu0 %v6187_v29  ;;  %v7228_v29 = vld [vmem:[#allocation37_spill] sm:$0xff] }
 0x5ab   :  { %4597 = vmatpush1.bf16.msra.mxu0 %v6190_v4  ;;  %v7229_v4 = vld [vmem:[#allocation38_spill] sm:$0xff] }
 0x5ac   :  { %4599 = vmatprep.subr.bf16.mxu0 %v6193_v6  ;;  %v7230_v6 = vld [vmem:[#allocation39_spill] sm:$0xff] }
 0x5af   :  { %4601 = vmatpush1.bf16.msra.mxu0 %v7220_v27  ;;  %v1887_v27 = vld [vmem:[#allocation17 + $0x188] sm:$0xff] }
 0x5b0   :  { %4603 = vmatprep.subr.bf16.mxu0 %v7221_v28  ;;  %v1891_v28 = vld [vmem:[#allocation17 + $0x1a8] sm:$0xff] }
 0x5b3   :  { %4605 = vmatpush1.bf16.msra.mxu0 %v7222_v35  ;;  %v6428_v35 = vpack.c.bf16 %v1891_v28, %v1887_v27  ;;  %v1942_v27 = vld [vmem:[#allocation17 + $0x340] sm:$0xff] }
 0x5b4   :  { %4607 = vmatprep.subr.bf16.mxu0 %v7223_v38  ;;  %v1886_v38 = vld [vmem:[#allocation17 + $0x180] sm:$0xff] }
 0x5b5   :  { %v1946_v28 = vld [vmem:[#allocation17 + $0x360] sm:$0xff] }
 0x5b7   :  { %4609 = vmatpush1.bf16.msra.mxu0 %v7224_v1  ;;  %v1890_v1 = vld [vmem:[#allocation17 + $0x1a0] sm:$0xff] }
 0x5b8   :  { %4611 = vmatprep.subr.bf16.mxu0 %v7225_v52  ;;  %v6431_v52 = vpack.c.bf16 %v1890_v1, %v1886_v38  ;;  %v6473_v38 = vpack.c.bf16 %v1946_v28, %v1942_v27  ;;  %v1951_v1 = vld [vmem:[#allocation17 + $0x388] sm:$0xff] }
 0x5bb   :  { %4613 = vmatpush1.bf16.msra.mxu0 %v7226_v47  ;;  %v1895_v47 = vld [vmem:[#allocation17 + $0x1c8] sm:$0xff] }
 0x5bc   :  { %4615 = vmatprep.subr.bf16.mxu0 %v7227_v49  ;;  %v1899_v49 = vld [vmem:[#allocation17 + $0x1e8] sm:$0xff] }
 0x5bf   :  { %4617 = vmatpush1.bf16.msra.mxu0 %v7228_v29  ;;  %v6434_v29 = vpack.c.bf16 %v1899_v49, %v1895_v47  ;;  %v1955_v47 = vld [vmem:[#allocation17 + $0x3a8] sm:$0xff] }
 0x5c0   :  { %4619 = vmatprep.subr.bf16.mxu0 %v7229_v4  ;;  %v1894_v4 = vld [vmem:[#allocation17 + $0x1c0] sm:$0xff]  ;;  %v6476_v49 = vpack.c.bf16 %v1955_v47, %v1951_v1 }
 0x5c3   :  { %4621 = vmatpush1.bf16.msra.mxu0 %v7230_v6  ;;  %v1898_v6 = vld [vmem:[#allocation17 + $0x1e0] sm:$0xff] }
 0x5c4   :  { %4623 = vmatprep.subr.bf16.mxu0 %v7231_v15  ;;  %v6437_v15 = vpack.c.bf16 %v1898_v6, %v1894_v4  ;;  %v1950_v4 = vld [vmem:[#allocation17 + $0x380] sm:$0xff] }
 0x5c5   :  { %v1954_v6 = vld [vmem:[#allocation17 + $0x3a0] sm:$0xff] }
 0x5c7   :  { %4625 = vmatpush1.bf16.msra.mxu0 %v7232_v46  ;;  %v1903_v46 = vld [vmem:[#allocation17 + $0x208] sm:$0xff] }
 0x5c8   :  { %4627 = vmatprep.subr.bf16.mxu0 %v6235_v45  ;;  %v1843_v45 = vld [vmem:[#allocation17 + $0x28] sm:$0xff] }
 0x5cb   :  { %4629 = vmatpush1.bf16.msra.mxu0 %v7233_v26  ;;  %v1907_v26 = vld [vmem:[#allocation17 + $0x228] sm:$0xff] }
 0x5cc   :  { %4631 = vmatprep.subr.bf16.mxu0 %v7234_v30  ;;  %v6440_v30 = vpack.c.bf16 %v1907_v26, %v1903_v46  ;;  %v6479_v46 = vpack.c.bf16 %v1954_v6, %v1950_v4  ;;  %v1959_v26 = vld [vmem:[#allocation17 + $0x3c8] sm:$0xff] }
 0x5cf   :  { %4633 = vmatpush1.bf16.msra.mxu0 %v6244_v3 }
 0x5d0   :  { %4635 = vmatprep.subr.bf16.mxu0 %v6247_v50  ;;  %v1845_v50 = vld [vmem:[#allocation17 + $0x38] sm:$0xff] }
 0x5d3   :  { %4637 = vmatpush1.bf16.msra.mxu0 %v6250_v36  ;;  %v1838_v36 = vld [vmem:[#allocation17] sm:$0xff] }
 0x5d4   :  { %4639 = vmatprep.subr.bf16.mxu0 %v7235_v54  ;;  %v1902_v54 = vld [vmem:[#allocation17 + $0x200] sm:$0xff] }
 0x5d7   :  { %4641 = vmatpush1.bf16.msra.mxu0 %v6257_v13  ;;  %v1841_v13 = vld [vmem:[#allocation17 + $0x18] sm:$0xff] }
 0x66d   :  { %v1409_v24 = vpop.f32.mrb[8].mxu0 }
 0x66e   :  { %v1410_v44 = vadd.f32 %v6038_v39, %v1409_v24  ;;  %v3882_v0 = vpop.f32.mrb[9].mxu0  ;;  %v1839_v39 = vld [vmem:[#allocation17 + $0x8] sm:$0xff]  ;;  %v1906_v24 = vld [vmem:[#allocation17 + $0x220] sm:$0xff] }
 0x66f   :  { %v6390_v3 = vpack.c.bf16 %v1843_v45, %v1839_v39  ;;  %v1911_v0 = vld [vmem:[#allocation17 + $0x248] sm:$0xff] }
 0x670   :  { %1414 = vst [vmem:[#allocation20 + $0x10] sm:$0xff] %v1410_v44  ;;  %1623 = vmatmul.mubr.f32.vlgmr.msra.gmra.mrb[8].mxu1 %v1410_v44  ;;  %1694 = vmatmul.mubr.f32.vlgmr.msra.gmra.mrb[10].mxu0 %v1410_v44  ;;  %v6443_v44 = vpack.c.bf16 %v1906_v24, %v1902_v54  ;;  %v1915_v39 = vld [vmem:[#allocation17 + $0x268] sm:$0xff] }
 0x671   :  { %4644 = vmatpush3.bf16.msra.mxu1 %v6296_v63  ;;  %3915 = vmatprep.mubr.msk.f32.mxu1 %vm5556_vm0, %v7219_v17  ;;  %v1842_v63 = vld [vmem:[#allocation17 + $0x20] sm:$0xff]  ;;  %v6446_v45 = vpack.c.bf16 %v1915_v39, %v1911_v0  ;;  %v1963_v54 = vld [vmem:[#allocation17 + $0x3e8] sm:$0xff] }
 0x672   :  { %4645 = vmatprep.subr.bf16.mxu1 %v7218_v37  ;;  %4667 = vmatprep.subr.bf16.mxu0 %v6390_v3  ;;  %v6482_v24 = vpack.c.bf16 %v1963_v54, %v1959_v26  ;;  %v1732_v54 = vstv %s3589_s29  ;;  %s2233_s29 = scalar_lea.vmem [#allocation2], %s3604_s26  ;;  %s3625_s26 = sshll.u32 %s3624_s25, 3 }
 0x675   :  { %4647 = vmatpush3.bf16.msra.mxu1 %v6300_v14  ;;  %v6392_v14 = vpack.c.bf16 %v1845_v50, %v1841_v13  ;;  %v1910_v13 = vld [vmem:[#allocation17 + $0x240] sm:$0xff] }
 0x676   :  { %4648 = vmatprep.subr.bf16.mxu1 %v7218_v37  ;;  %v1914_v50 = vld [vmem:[#allocation17 + $0x260] sm:$0xff] }
 0x679   :  { %4650 = vmatpush3.bf16.msra.mxu1 %v6304_v5  ;;  %v6394_v5 = vpack.c.bf16 %v1842_v63, %v1838_v36  ;;  %v6449_v36 = vpack.c.bf16 %v1914_v50, %v1910_v13  ;;  %v1919_v63 = vld [vmem:[#allocation17 + $0x288] sm:$0xff] }
 0x67a   :  { %4651 = vmatprep.subr.bf16.mxu1 %v7218_v37 }
 0x67b   :  { %4669 = vmatpush1.bf16.msra.mxu0 %v6394_v5 }
 0x67d   :  { %4653 = vmatpush3.bf16.msra.mxu1 %v6308_v20  ;;  %v1847_v20 = vld [vmem:[#allocation17 + $0x48] sm:$0xff] }
 0x67e   :  { %4654 = vmatprep.subr.bf16.mxu1 %v7218_v37 }
 0x681   :  { %4656 = vmatpush3.bf16.msra.mxu1 %v6312_v57  ;;  %v1851_v57 = vld [vmem:[#allocation17 + $0x68] sm:$0xff] }
 0x682   :  { %4657 = vmatprep.subr.bf16.mxu1 %v7218_v37 }
 0x685   :  { %4659 = vmatpush3.bf16.msra.mxu1 %v6316_v60  ;;  %v6399_v60 = vpack.c.bf16 %v1851_v57, %v1847_v20  ;;  %v1923_v20 = vld [vmem:[#allocation17 + $0x2a8] sm:$0xff] }
 0x686   :  { %4660 = vmatprep.subr.bf16.mxu1 %v7218_v37  ;;  %v6452_v57 = vpack.c.bf16 %v1923_v20, %v1919_v63 }
 0x687   :  { %4671 = vmatprep.subr.bf16.mxu0 %v6399_v60 }
 0x689   :  { %4662 = vmatpush3.bf16.msra.mxu1 %v6319_v10  ;;  %v1846_v10 = vld [vmem:[#allocation17 + $0x40] sm:$0xff] }
 0x68a   :  { %4663 = vmatprep.subr.bf16.mxu1 %v7218_v37 }
 0x68d   :  { %4665 = vmatpush3.bf16.msra.mxu1 %v6323_v59  ;;  %v1850_v59 = vld [vmem:[#allocation17 + $0x60] sm:$0xff] }
 0x68e   :  { %4731 = vmatprep.subr.bf16.mxu1 %v6392_v14  ;;  %v6401_v31 = vpack.c.bf16 %v1850_v59, %v1846_v10  ;;  %v1918_v10 = vld [vmem:[#allocation17 + $0x280] sm:$0xff] }
 0x68f   :  { %v1922_v59 = vld [vmem:[#allocation17 + $0x2a0] sm:$0xff] }
 0x690   :  { %4673 = vmatpush1.bf16.msra.mxu0 %v6401_v31  ;;  %v6455_v12 = vpack.c.bf16 %v1922_v59, %v1918_v10 }
 0x691   :  { %4675 = vmatprep.subr.bf16.mxu0 %v6404_v22 }
 0x694   :  { %4677 = vmatpush1.bf16.msra.mxu0 %v6407_v58 }
 0x695   :  { %4679 = vmatprep.subr.bf16.mxu0 %v6410_v34 }
 0x698   :  { %4681 = vmatpush1.bf16.msra.mxu0 %v6413_v2 }
 0x699   :  { %4683 = vmatprep.subr.bf16.mxu0 %v6416_v19 }
 0x69c   :  { %4685 = vmatpush1.bf16.msra.mxu0 %v6419_v23 }
 0x69d   :  { %4687 = vmatprep.subr.bf16.mxu0 %v6422_v21 }
 0x6a0   :  { %4689 = vmatpush1.bf16.msra.mxu0 %v6425_v48 }
 0x6a1   :  { %4691 = vmatprep.subr.bf16.mxu0 %v6428_v35 }
 0x6a4   :  { %4693 = vmatpush1.bf16.msra.mxu0 %v6431_v52 }
 0x6a5   :  { %4695 = vmatprep.subr.bf16.mxu0 %v6434_v29 }
 0x6a8   :  { %4697 = vmatpush1.bf16.msra.mxu0 %v6437_v15 }
 0x6a9   :  { %4699 = vmatprep.subr.bf16.mxu0 %v6440_v30 }
 0x6ac   :  { %4701 = vmatpush1.bf16.msra.mxu0 %v6443_v44 }
 0x6ad   :  { %4703 = vmatprep.subr.bf16.mxu0 %v6446_v45 }
 0x6b0   :  { %4705 = vmatpush1.bf16.msra.mxu0 %v6449_v36 }
 0x6b1   :  { %4707 = vmatprep.subr.bf16.mxu0 %v6452_v57 }
 0x6b4   :  { %4709 = vmatpush1.bf16.msra.mxu0 %v6455_v12 }
 0x6b5   :  { %4711 = vmatprep.subr.bf16.mxu0 %v6458_v18 }
 0x6b8   :  { %4713 = vmatpush1.bf16.msra.mxu0 %v6461_v8 }
 0x6b9   :  { %4715 = vmatprep.subr.bf16.mxu0 %v6464_v32 }
 0x6bc   :  { %4717 = vmatpush1.bf16.msra.mxu0 %v6467_v55 }
 0x6bd   :  { %4719 = vmatprep.subr.bf16.mxu0 %v6470_v53 }
 0x6c0   :  { %4721 = vmatpush1.bf16.msra.mxu0 %v6473_v38 }
 0x6c1   :  { %4723 = vmatprep.subr.bf16.mxu0 %v6476_v49 }
 0x6c4   :  { %4725 = vmatpush1.bf16.msra.mxu0 %v6479_v46 }
 0x6c5   :  { %4727 = vmatprep.subr.bf16.mxu0 %v6482_v24 }
 0x743   :  { %v1624_v0 = vpop.f32.mrb[8].mxu1  ;;  %v1695_v39 = vpop.f32.mrb[10].mxu0 }
 0x744   :  { %v1700_v13 = vadd.f32 %v1624_v0, %v5977_v61  ;;  %v1626_v50 = vpop.f32.mrb[9].mxu1  ;;  %v1697_v63 = vpop.f32.mrb[11].mxu0  ;;  %v1714_v40 = vadd.f32 %v6497_v11, %v1695_v39  ;;  %v1828_v0 = vstv %s3592_s15  ;;  %v1835_v39 = vstv %s3595_s16  ;;  %s2240_s15 = scalar_lea.vmem [#allocation2], %s3607_s27  ;;  %s3611_s16 = sld [smem:[#allocation15 + $0x5]] }
 0x745   :  { %v1701_v10 = vadd.f32 %v1626_v50, %v5979_v25  ;;  %v1715_v62 = vadd.f32 %v6491_v9, %v1697_v63  ;;  %v1844_v50 = vld [vmem:[#allocation17 + $0x30] sm:$0xff]  ;;  %v1849_v63 = vld [vmem:[#allocation17 + $0x58] sm:$0xff]  ;;  %s3626_s27 = sld [smem:[#allocation11 + $0x6]] }
 0x746   :  { %v3583_v20 = vmul.f32 -1.442695, %v1700_v13  ;;  %v1840_v13 = vld [vmem:[#allocation17 + $0x10] sm:$0xff] }
 0x747   :  { %v3584_v59 = vmul.f32 -1.442695, %v1701_v10 }
 0x748   :  { %5321 = vpow2.f32 %v3583_v20  ;;  %v1853_v20 = vld [vmem:[#allocation17 + $0x78] sm:$0xff] }
 0x749   :  { %5323 = vpow2.f32 %v3584_v59 }
 0x752   :  { %v5322_v33 = vpop.eup %5321 }
 0x753   :  { %v1708_v16 = vadd.f32 1.0, %v5322_v33  ;;  %v5324_v43 = vpop.eup %5323 }
 0x754   :  { %v1709_v41 = vadd.f32 1.0, %v5324_v43 }
 0x755   :  { %5325 = vrcp.f32 %v1708_v16 }
 0x756   :  { %5327 = vrcp.f32 %v1709_v41  ;;  %v6504_v41 = vpack.c.bf16 %v1844_v50, %v1840_v13  ;;  %v1864_v13 = vld [vmem:[#allocation17 + $0xd0] sm:$0xff] }
 0x757   :  { %v1868_v50 = vld [vmem:[#allocation17 + $0xf0] sm:$0xff] }
 0x75f   :  { %v5326_v51 = vpop.eup %5325 }
 0x760   :  { %v1716_v56 = vmul.f32 %v5326_v51, %v1715_v62  ;;  %v5328_v28 = vpop.eup %5327 }
 0x761   :  { %v1719_v1 = vsub.f32 1.0, %v5328_v28  ;;  %v1721_v4 = vmul.f32 %v5328_v28, %v6337_v7  ;;  %v1857_v28 = vld [vmem:[#allocation17 + $0x98] sm:$0xff] }
 0x762   :  { %v1717_v27 = vadd.f32 %v1716_v56, %v1714_v40  ;;  %v6509_v40 = vpack.c.bf16 %v1853_v20, %v1849_v63  ;;  %v1848_v56 = vld [vmem:[#allocation17 + $0x50] sm:$0xff]  ;;  %v1873_v63 = vld [vmem:[#allocation17 + $0x118] sm:$0xff] }
 0x763   :  { %v1877_v20 = vld [vmem:[#allocation17 + $0x138] sm:$0xff] }
 0x764   :  { %5329 = vtanh.f32 %v1717_v27  ;;  %v1852_v27 = vld [vmem:[#allocation17 + $0x70] sm:$0xff] }
 0x76e   :  { %v5330_v47 = vpop.eup %5329 }
 0x76f   :  { %v1720_v6 = vmul.f32 %v5330_v47, %v1719_v1  ;;  %v1861_v1 = vld [vmem:[#allocation17 + $0xb8] sm:$0xff]  ;;  %v6514_v47 = vpack.c.bf16 %v1852_v27, %v1848_v56 }
 0x771   :  { %v1722_v26 = vadd.f32 %v1721_v4, %v1720_v6  ;;  %v1856_v4 = vld [vmem:[#allocation17 + $0x90] sm:$0xff] }
 0x772   :  { %v1860_v6 = vld [vmem:[#allocation17 + $0xb0] sm:$0xff] }
 0x773   :  { %1726 = vst [vmem:[%s1725_s12] sm:$0xff] %v1722_v26  ;;  %v1865_v26 = vld [vmem:[#allocation17 + $0xd8] sm:$0xff]  ;;  %s3612_s12 = sshll.u32 %s3611_s16, 3  ;;  %s2949_s16 = scalar_lea.vmem [#allocation2], %s3625_s26 }
 0x774   :  { %s2541_s21 = scalar_lea.vmem [#allocation2], %s3612_s12  ;;  %s3627_s12 = sshll.u32 %s3626_s27, 3 }
 0x775   :  { %s2953_s18 = scalar_lea.vmem [#allocation2], %s3627_s12 }
 0x77a   :  { %v1730_v10 = vld [vmem:[%s1729_s6] sm:$0xff]  ;;  %s3615_s6 = sld [smem:[#allocation12 + $0x5]] }
 0x77b   :  { %v6501_v7 = vld [vmem:[%s1825_s19] sm:$0xff]  ;;  %v1733_v33 = vmul.f32 %v1732_v54, %v1730_v10  ;;  %v1869_v54 = vld [vmem:[#allocation17 + $0xf8] sm:$0xff]  ;;  %v6526_v10 = vpack.c.bf16 %v1868_v50, %v1864_v13  ;;  %v1888_v13 = vld [vmem:[#allocation17 + $0x190] sm:$0xff]  ;;  %s3618_s19 = sld [smem:[#allocation3 + $0x6]] }
 0x77c   :  { %v1833_v59 = vld [vmem:[%s1832_s20] sm:$0xff]  ;;  %v1829_v16 = vmul.f32 %v1828_v0, %v6501_v7  ;;  %v6520_v0 = vpack.c.bf16 %v1860_v6, %v1856_v4  ;;  %v1889_v4 = vld [vmem:[#allocation17 + $0x198] sm:$0xff]  ;;  %v1892_v50 = vld [vmem:[#allocation17 + $0x1b0] sm:$0xff]  ;;  %s3621_s20 = sld [smem:[#allocation9 + $0x6]] }
 0x77d   :  { %v1836_v43 = vmul.f32 %v1835_v39, %v1833_v59  ;;  %v1734_v62 = vadd.f32 %v1733_v33, %v6333_v42  ;;  %v6517_v42 = vpack.c.bf16 %v1861_v1, %v1857_v28  ;;  %v6523_v39 = vpack.c.bf16 %v1869_v54, %v1865_v26  ;;  %v1872_v33 = vld [vmem:[#allocation17 + $0x110] sm:$0xff]  ;;  %v1893_v6 = vld [vmem:[#allocation17 + $0x1b8] sm:$0xff] }
 0x77e   :  { %v6529_v59 = vpack.c.bf16 %v1877_v20, %v1873_v63  ;;  %v1880_v28 = vld [vmem:[#allocation17 + $0x150] sm:$0xff]  ;;  %v6541_v54 = vpack.c.bf16 %v1893_v6, %v1889_v4  ;;  %v1897_v63 = vld [vmem:[#allocation17 + $0x1d8] sm:$0xff] }
 0x77f   :  { %v6507_v51 = vadd.f32 %v1836_v43, %v1829_v16  ;;  %3916 = vmatmul.mubr.f32.vlgmr.msra.gmra.mrb[10].mxu1 %v1734_v62  ;;  %v1876_v16 = vld [vmem:[#allocation17 + $0x130] sm:$0xff]  ;;  %v1881_v43 = vld [vmem:[#allocation17 + $0x158] sm:$0xff] }
 0x780   :  { %4733 = vmatpush1.bf16.msra.mxu1 %v6504_v41  ;;  %v1885_v62 = vld [vmem:[#allocation17 + $0x178] sm:$0xff]  ;;  %v6532_v56 = vpack.c.bf16 %v1876_v16, %v1872_v33  ;;  %v1884_v1 = vld [vmem:[#allocation17 + $0x170] sm:$0xff]  ;;  %7238 = vst [vmem:[#allocation31_spill] sm:$0xff] %v6541_v54  ;;  %v6544_v33 = vpack.c.bf16 %v1892_v50, %v1888_v13 }
 0x781   :  { %2030 = vmatprep.mubr.f32.mxu0 %v6507_v51  ;;  %2101 = vmatprep.mubr.f32.mxu1 %v6507_v51  ;;  %v6535_v27 = vpack.c.bf16 %v1885_v62, %v1881_v43  ;;  %v6538_v26 = vpack.c.bf16 %v1884_v1, %v1880_v28  ;;  %v1901_v20 = vld [vmem:[#allocation17 + $0x1f8] sm:$0xff]  ;;  %v1896_v43 = vld [vmem:[#allocation17 + $0x1d0] sm:$0xff] }
 0x782   :  { %4735 = vmatprep.subr.bf16.mxu1 %v6509_v40  ;;  %7239 = vst [vmem:[#allocation32_spill] sm:$0xff] %v6544_v33  ;;  %v6547_v16 = vpack.c.bf16 %v1901_v20, %v1897_v63  ;;  %v1900_v62 = vld [vmem:[#allocation17 + $0x1f0] sm:$0xff]  ;;  %v1905_v28 = vld [vmem:[#allocation17 + $0x218] sm:$0xff] }
 0x783   :  { %7236 = vst [vmem:[#allocation29_spill] sm:$0xff] %v6535_v27  ;;  %7237 = vst [vmem:[#allocation30_spill] sm:$0xff] %v6538_v26  ;;  %v1909_v1 = vld [vmem:[#allocation17 + $0x238] sm:$0xff]  ;;  %v6550_v4 = vpack.c.bf16 %v1900_v62, %v1896_v43 }
 0x784   :  { %4737 = vmatpush1.bf16.msra.mxu1 %v6514_v47  ;;  %7240 = vst [vmem:[#allocation33_spill] sm:$0xff] %v6547_v16  ;;  %v6553_v6 = vpack.c.bf16 %v1909_v1, %v1905_v28  ;;  %v1913_v13 = vld [vmem:[#allocation17 + $0x258] sm:$0xff] }
 0x785   :  { %4739 = vmatprep.subr.bf16.mxu1 %v6517_v42  ;;  %7241 = vst [vmem:[#allocation34_spill] sm:$0xff] %v6550_v4  ;;  %v1917_v50 = vld [vmem:[#allocation17 + $0x278] sm:$0xff] }
 0x786   :  { %7242 = vst [vmem:[#allocation35_spill] sm:$0xff] %v6553_v6  ;;  %v6559_v20 = vpack.c.bf16 %v1917_v50, %v1913_v13  ;;  %v1921_v43 = vld [vmem:[#allocation17 + $0x298] sm:$0xff] }
 0x787   :  { %v1925_v62 = vld [vmem:[#allocation17 + $0x2b8] sm:$0xff] }
 0x788   :  { %4741 = vmatpush1.bf16.msra.mxu1 %v6520_v0  ;;  %7244 = vst [vmem:[#allocation37_spill] sm:$0xff] %v6559_v20  ;;  %v6565_v1 = vpack.c.bf16 %v1925_v62, %v1921_v43 }
 0x789   :  { %4743 = vmatprep.subr.bf16.mxu1 %v6523_v39 }
 0x78a   :  { %7246 = vst [vmem:[#allocation39_spill] sm:$0xff] %v6565_v1 }
 0x78c   :  { %4745 = vmatpush1.bf16.msra.mxu1 %v6526_v10 }
 0x78d   :  { %4747 = vmatprep.subr.bf16.mxu1 %v6529_v59 }
 0x790   :  { %4749 = vmatpush1.bf16.msra.mxu1 %v6532_v56 }
 0x791   :  { %4751 = vmatprep.subr.bf16.mxu1 %v6535_v27  ;;  %v1904_v27 = vld [vmem:[#allocation17 + $0x210] sm:$0xff] }
 0x794   :  { %4753 = vmatpush1.bf16.msra.mxu1 %v6538_v26  ;;  %v1908_v26 = vld [vmem:[#allocation17 + $0x230] sm:$0xff] }
 0x795   :  { %4755 = vmatprep.subr.bf16.mxu1 %v6541_v54  ;;  %v6556_v63 = vpack.c.bf16 %v1908_v26, %v1904_v27  ;;  %v1912_v54 = vld [vmem:[#allocation17 + $0x250] sm:$0xff]  ;;  %v1929_v27 = vld [vmem:[#allocation17 + $0x2d8] sm:$0xff] }
 0x796   :  { %v1933_v26 = vld [vmem:[#allocation17 + $0x2f8] sm:$0xff] }
 0x797   :  { %7243 = vst [vmem:[#allocation36_spill] sm:$0xff] %v6556_v63  ;;  %v6571_v50 = vpack.c.bf16 %v1933_v26, %v1929_v27 }
 0x798   :  { %4757 = vmatpush1.bf16.msra.mxu1 %v6544_v33  ;;  %v1916_v33 = vld [vmem:[#allocation17 + $0x270] sm:$0xff] }
 0x799   :  { %4759 = vmatprep.subr.bf16.mxu1 %v6547_v16  ;;  %v6562_v28 = vpack.c.bf16 %v1916_v33, %v1912_v54  ;;  %v1920_v16 = vld [vmem:[#allocation17 + $0x290] sm:$0xff]  ;;  %7248 = vst [vmem:[#allocation41_spill] sm:$0xff] %v6571_v50  ;;  %v1937_v54 = vld [vmem:[#allocation17 + $0x318] sm:$0xff] }
 0x79a   :  { %v1941_v33 = vld [vmem:[#allocation17 + $0x338] sm:$0xff] }
 0x79b   :  { %7245 = vst [vmem:[#allocation38_spill] sm:$0xff] %v6562_v28  ;;  %v6577_v62 = vpack.c.bf16 %v1941_v33, %v1937_v54 }
 0x79c   :  { %4761 = vmatpush1.bf16.msra.mxu1 %v6550_v4  ;;  %v1924_v4 = vld [vmem:[#allocation17 + $0x2b0] sm:$0xff] }
 0x79d   :  { %4763 = vmatprep.subr.bf16.mxu1 %v6553_v6  ;;  %v6568_v13 = vpack.c.bf16 %v1924_v4, %v1920_v16  ;;  %v1928_v6 = vld [vmem:[#allocation17 + $0x2d0] sm:$0xff]  ;;  %v1945_v16 = vld [vmem:[#allocation17 + $0x358] sm:$0xff] }
 0x79e   :  { %v1949_v4 = vld [vmem:[#allocation17 + $0x378] sm:$0xff] }
 0x79f   :  { %7247 = vst [vmem:[#allocation40_spill] sm:$0xff] %v6568_v13  ;;  %v6583_v26 = vpack.c.bf16 %v1949_v4, %v1945_v16 }
 0x7a0   :  { %4765 = vmatpush1.bf16.msra.mxu1 %v6556_v63  ;;  %v1932_v63 = vld [vmem:[#allocation17 + $0x2f0] sm:$0xff] }
 0x7a1   :  { %4767 = vmatprep.subr.bf16.mxu1 %v6559_v20  ;;  %v6574_v43 = vpack.c.bf16 %v1932_v63, %v1928_v6  ;;  %v1936_v20 = vld [vmem:[#allocation17 + $0x310] sm:$0xff]  ;;  %7251 = vst [vmem:[#allocation44_spill] sm:$0xff] %v6583_v26  ;;  %v1953_v6 = vld [vmem:[#allocation17 + $0x398] sm:$0xff] }
 0x7a2   :  { %v1957_v63 = vld [vmem:[#allocation17 + $0x3b8] sm:$0xff] }
 0x7a3   :  { %7249 = vst [vmem:[#allocation42_spill] sm:$0xff] %v6574_v43  ;;  %v6589_v33 = vpack.c.bf16 %v1957_v63, %v1953_v6  ;;  %v1960_v6 = vld [vmem:[#allocation17 + $0x3d0] sm:$0xff] }
 0x7a4   :  { %4769 = vmatpush1.bf16.msra.mxu1 %v6562_v28  ;;  %v1940_v28 = vld [vmem:[#allocation17 + $0x330] sm:$0xff] }
 0x7a5   :  { %4771 = vmatprep.subr.bf16.mxu1 %v6565_v1  ;;  %v6580_v27 = vpack.c.bf16 %v1940_v28, %v1936_v20  ;;  %v1944_v1 = vld [vmem:[#allocation17 + $0x350] sm:$0xff]  ;;  %v1961_v20 = vld [vmem:[#allocation17 + $0x3d8] sm:$0xff] }
 0x7a6   :  { %v1965_v28 = vld [vmem:[#allocation17 + $0x3f8] sm:$0xff] }
 0x7a7   :  { %7250 = vst [vmem:[#allocation43_spill] sm:$0xff] %v6580_v27  ;;  %v6595_v4 = vpack.c.bf16 %v1965_v28, %v1961_v20 }
 0x7a8   :  { %4773 = vmatpush1.bf16.msra.mxu1 %v6568_v13  ;;  %v1948_v13 = vld [vmem:[#allocation17 + $0x370] sm:$0xff] }
 0x7a9   :  { %4775 = vmatprep.subr.bf16.mxu1 %v6571_v50  ;;  %v6586_v54 = vpack.c.bf16 %v1948_v13, %v1944_v1  ;;  %v1952_v50 = vld [vmem:[#allocation17 + $0x390] sm:$0xff]  ;;  %v1958_v1 = vld [vmem:[#allocation17 + $0x3c0] sm:$0xff] }
 0x7aa   :  { %v1962_v13 = vld [vmem:[#allocation17 + $0x3e0] sm:$0xff] }
 0x7ab   :  { %v4728_v63 = vpack.c.bf16 %v1962_v13, %v1958_v1 }
 0x7ac   :  { %4777 = vmatpush1.bf16.msra.mxu1 %v6574_v43  ;;  %v1956_v43 = vld [vmem:[#allocation17 + $0x3b0] sm:$0xff] }
 0x7ad   :  { %4779 = vmatprep.subr.bf16.mxu1 %v6577_v62  ;;  %v6592_v16 = vpack.c.bf16 %v1956_v43, %v1952_v50  ;;  %4729 = vmatpush1.bf16.msra.mxu0 %v4728_v63  ;;  %v6607_v43 = vld [vmem:[%s7119_s13] ss:$0 sm:$0xff] }
 0x7ae   :  { %4794 = vmatprep.subr.bf16.mxu0 %v7218_v37 }
 0x7b0   :  { %4781 = vmatpush1.bf16.msra.mxu1 %v6580_v27 }
 0x7b1   :  { %4783 = vmatprep.subr.bf16.mxu1 %v6583_v26  ;;  %v1964_v26 = vld [vmem:[#allocation17 + $0x3f0] sm:$0xff] }
 0x7b2   :  { %v6599_v27 = vpack.c.bf16 %v1964_v26, %v1960_v6 }
 0x7b4   :  { %4785 = vmatpush1.bf16.msra.mxu1 %v6586_v54 }
 0x7b5   :  { %4787 = vmatprep.subr.bf16.mxu1 %v6589_v33 }
 0x7b8   :  { %4789 = vmatpush1.bf16.msra.mxu1 %v6592_v16 }
 0x7b9   :  { %4791 = vmatprep.subr.bf16.mxu1 %v6595_v4 }
 0x7bc   :  { %4793 = vmatpush1.bf16.msra.mxu1 %v6599_v27 }
 0x7bd   :  { %4819 = vmatprep.subr.bf16.mxu1 %v6390_v3  ;;  %v2143_v3 = vld [vmem:[#allocation18] sm:$0xff] }
 0x852   :  { %v1817_v50 = vpop.f32.mrb[10].mxu1 }
 0x853   :  { %v1818_v20 = vadd.f32 %v6607_v43, %v1817_v50  ;;  %v3917_v28 = vpop.f32.mrb[11].mxu1 }
 0x855   :  { %1822 = vst [vmem:[#allocation20 + $0x18] sm:$0xff] %v1818_v20  ;;  %2031 = vmatmul.mubr.f32.vlgmr.msra.gmra.mrb[12].mxu0 %v1818_v20  ;;  %2102 = vmatmul.mubr.f32.vlgmr.msra.gmra.mrb[12].mxu1 %v1818_v20 }
 0x856   :  { %3950 = vmatprep.mubr.msk.f32.mxu0 %vm5556_vm0, %v7219_v17  ;;  %4821 = vmatpush1.bf16.msra.mxu1 %v6394_v5  ;;  %v2144_v5 = vld [vmem:[#allocation18 + $0x8] sm:$0xff] }
 0x857   :  { %4823 = vmatprep.subr.bf16.mxu1 %v6399_v60  ;;  %v6643_v60 = vpack.c.bf16 %v2144_v5, %v2143_v3 }
 0x859   :  { %4796 = vmatpush3.bf16.msra.mxu0 %v6643_v60 }
 0x85a   :  { %4825 = vmatpush1.bf16.msra.mxu1 %v6401_v31  ;;  %4797 = vmatprep.subr.bf16.mxu0 %v7218_v37  ;;  %v2145_v31 = vld [vmem:[#allocation18 + $0x10] sm:$0xff] }
 0x85b   :  { %4827 = vmatprep.subr.bf16.mxu1 %v6404_v22  ;;  %v2146_v22 = vld [vmem:[#allocation18 + $0x18] sm:$0xff] }
 0x85e   :  { %4829 = vmatpush1.bf16.msra.mxu1 %v6407_v58  ;;  %v6647_v58 = vpack.c.bf16 %v2146_v22, %v2145_v31 }
 0x85f   :  { %4831 = vmatprep.subr.bf16.mxu1 %v6410_v34  ;;  %v2147_v34 = vld [vmem:[#allocation18 + $0x20] sm:$0xff] }
 0x860   :  { %4799 = vmatpush3.bf16.msra.mxu0 %v6647_v58 }
 0x861   :  { %4800 = vmatprep.subr.bf16.mxu0 %v7218_v37 }
 0x862   :  { %4833 = vmatpush1.bf16.msra.mxu1 %v6413_v2  ;;  %v2148_v2 = vld [vmem:[#allocation18 + $0x28] sm:$0xff] }
 0x863   :  { %4835 = vmatprep.subr.bf16.mxu1 %v6416_v19  ;;  %v6651_v19 = vpack.c.bf16 %v2148_v2, %v2147_v34 }
 0x865   :  { %4802 = vmatpush3.bf16.msra.mxu0 %v6651_v19 }
 0x866   :  { %4837 = vmatpush1.bf16.msra.mxu1 %v6419_v23  ;;  %4803 = vmatprep.subr.bf16.mxu0 %v7218_v37  ;;  %v2149_v23 = vld [vmem:[#allocation18 + $0x30] sm:$0xff] }
 0x867   :  { %4839 = vmatprep.subr.bf16.mxu1 %v6422_v21  ;;  %v2150_v21 = vld [vmem:[#allocation18 + $0x38] sm:$0xff] }
 0x86a   :  { %4841 = vmatpush1.bf16.msra.mxu1 %v6425_v48  ;;  %v6655_v48 = vpack.c.bf16 %v2150_v21, %v2149_v23  ;;  %v2140_v21 = vstv %s3602_s24  ;;  %s5557_s24 = smov [#allocation20]  }
 0x86b   :  { %4843 = vmatprep.subr.bf16.mxu1 %v6428_v35  ;;  %v2151_v35 = vld [vmem:[#allocation18 + $0x40] sm:$0xff] }
 0x86c   :  { %4805 = vmatpush3.bf16.msra.mxu0 %v6655_v48 }
 0x86d   :  { %4806 = vmatprep.subr.bf16.mxu0 %v7218_v37 }
 0x86e   :  { %4845 = vmatpush1.bf16.msra.mxu1 %v6431_v52  ;;  %v2152_v52 = vld [vmem:[#allocation18 + $0x48] sm:$0xff] }
 0x86f   :  { %4847 = vmatprep.subr.bf16.mxu1 %v6434_v29  ;;  %v6659_v29 = vpack.c.bf16 %v2152_v52, %v2151_v35  ;;  %v2236_v35 = vstv %s3605_s23  ;;  %v2243_v52 = vstv %s3608_s3  ;;  %s3460_s23 = sshll.u32 %s5557_s24, 4  ;;  %s3461_s23 = int_to_ptr.vmem [resolvable:$true] %s3460_s23 }
 0x870   :  { %s5503_s3 = scalar_lea.vmem %s3461_s23, 1024  ;;  %p5508_p8 = scmp.lt.s32.totalorder %s3461_s23, %s3461_s23 }
 0x871   :  { %4808 = vmatpush3.bf16.msra.mxu0 %v6659_v29  ;;  %p5504_p7 = scmp.ne.s32.totalorder %s3461_s23, %s5503_s3  ;;  %p5509_p9 = scmp.lt.s32.totalorder %s5503_s3, %s5503_s3 }
 0x872   :  { %4849 = vmatpush1.bf16.msra.mxu1 %v6437_v15  ;;  %4809 = vmatprep.subr.bf16.mxu0 %v7218_v37  ;;  %v2153_v15 = vld [vmem:[#allocation18 + $0x50] sm:$0xff] }
 0x873   :  { %4851 = vmatprep.subr.bf16.mxu1 %v6440_v30  ;;  %v2154_v30 = vld [vmem:[#allocation18 + $0x58] sm:$0xff]  ;;  %p5510_p10 = por %p5509_p9, %p5508_p8 }
 0x875   :  { %p5511_p11 = pnand %p5510_p10, %p5504_p7 }
 0x876   :  { %4853 = vmatpush1.bf16.msra.mxu1 %v6443_v44  ;;  %v2155_v44 = vld [vmem:[#allocation18 + $0x60] sm:$0xff] }
 0x877   :  { %4855 = vmatprep.subr.bf16.mxu1 %v6446_v45  ;;  %v6663_v45 = vpack.c.bf16 %v2154_v30, %v2153_v15 }
 0x879   :  { %4811 = vmatpush3.bf16.msra.mxu0 %v6663_v45 }
 0x87a   :  { %4857 = vmatpush1.bf16.msra.mxu1 %v6449_v36  ;;  %v2156_v36 = vld [vmem:[#allocation18 + $0x68] sm:$0xff]  ;;  %4812 = vmatprep.subr.bf16.mxu0 %v7218_v37 }
 0x87b   :  { %4859 = vmatprep.subr.bf16.mxu1 %v6452_v57  ;;  %v6666_v57 = vpack.c.bf16 %v2156_v36, %v2155_v44 }
 0x87d   :  { %4814 = vmatpush3.bf16.msra.mxu0 %v6666_v57 }
 0x87e   :  { %4861 = vmatpush1.bf16.msra.mxu1 %v6455_v12  ;;  %v2157_v12 = vld [vmem:[#allocation18 + $0x70] sm:$0xff]  ;;  %4815 = vmatprep.subr.bf16.mxu0 %v7218_v37 }
 0x87f   :  { %4863 = vmatprep.subr.bf16.mxu1 %v6458_v18  ;;  %v2158_v18 = vld [vmem:[#allocation18 + $0x78] sm:$0xff] }
 0x882   :  { %4865 = vmatpush1.bf16.msra.mxu1 %v6461_v8  ;;  %v6670_v8 = vpack.c.bf16 %v2158_v18, %v2157_v12 }
 0x883   :  { %4867 = vmatprep.subr.bf16.mxu1 %v6464_v32 }
 0x884   :  { %4817 = vmatpush3.bf16.msra.mxu0 %v6670_v8 }
 0x885   :  { %4883 = vmatprep.subr.bf16.mxu0 %v6392_v14 }
 0x886   :  { %4869 = vmatpush1.bf16.msra.mxu1 %v6467_v55 }
 0x887   :  { %4871 = vmatprep.subr.bf16.mxu1 %v6470_v53 }
 0x88a   :  { %4873 = vmatpush1.bf16.msra.mxu1 %v6473_v38 }
 0x88b   :  { %4875 = vmatprep.subr.bf16.mxu1 %v6476_v49 }
 0x88e   :  { %4877 = vmatpush1.bf16.msra.mxu1 %v6479_v46 }
 0x88f   :  { %4879 = vmatprep.subr.bf16.mxu1 %v6482_v24 }
 0x892   :  { %4881 = vmatpush1.bf16.msra.mxu1 %v4728_v63 }
 0x893   :  { %4946 = vmatprep.subr.bf16.mxu1 %v7218_v37 }
 0x928   :  { %v2032_v32 = vpop.f32.mrb[12].mxu0  ;;  %v2103_v55 = vpop.f32.mrb[12].mxu1 }
 0x929   :  { %v2108_v53 = vadd.f32 %v2032_v32, %v5977_v61  ;;  %v2034_v38 = vpop.f32.mrb[13].mxu0  ;;  %v2105_v49 = vpop.f32.mrb[13].mxu1  ;;  %v2122_v20 = vadd.f32 %v6497_v11, %v2103_v55  ;;  %v7253_v55 = vld [vmem:[#allocation30_spill] sm:$0xff] }
 0x92a   :  { %v2109_v24 = vadd.f32 %v2034_v38, %v5979_v25  ;;  %v2123_v50 = vadd.f32 %v6491_v9, %v2105_v49  ;;  %v7264_v38 = vld [vmem:[#allocation41_spill] sm:$0xff]  ;;  %v7265_v49 = vld [vmem:[#allocation42_spill] sm:$0xff] }
 0x92b   :  { %v3596_v46 = vmul.f32 -1.442695, %v2108_v53  ;;  %v7263_v53 = vld [vmem:[#allocation40_spill] sm:$0xff] }
 0x92c   :  { %v3597_v26 = vmul.f32 -1.442695, %v2109_v24  ;;  %v7267_v24 = vld [vmem:[#allocation44_spill] sm:$0xff] }
 0x92d   :  { %5331 = vpow2.f32 %v3596_v46  ;;  %v7266_v46 = vld [vmem:[#allocation43_spill] sm:$0xff] }
 0x92e   :  { %5333 = vpow2.f32 %v3597_v26 }
 0x937   :  { %v5332_v1 = vpop.eup %5331 }
 0x938   :  { %v2116_v13 = vadd.f32 1.0, %v5332_v1  ;;  %v5334_v6 = vpop.eup %5333 }
 0x939   :  { %v2117_v63 = vadd.f32 1.0, %v5334_v6 }
 0x93a   :  { %5335 = vrcp.f32 %v2116_v13 }
 0x93b   :  { %5337 = vrcp.f32 %v2117_v63  ;;  %v2671_v63 = vld [vmem:[#allocation17 + $0x88] sm:$0xff] }
 0x944   :  { %v5336_v14 = vpop.eup %5335 }
 0x945   :  { %v2124_v28 = vmul.f32 %v5336_v14, %v2123_v50  ;;  %v5338_v5 = vpop.eup %5337  ;;  %v2675_v50 = vld [vmem:[#allocation17 + $0xa8] sm:$0xff] }
 0x946   :  { %v2127_v31 = vsub.f32 1.0, %v5338_v5  ;;  %v2129_v34 = vmul.f32 %v5338_v5, %v6507_v51  ;;  %v6751_v14 = vpack.c.bf16 %v2675_v50, %v2671_v63  ;;  %v2679_v5 = vld [vmem:[#allocation17 + $0xc8] sm:$0xff]  ;;  %v2734_v50 = vld [vmem:[#allocation17 + $0x280] sm:$0xff] }
 0x947   :  { %v2125_v3 = vadd.f32 %v2124_v28, %v2122_v20  ;;  %v2670_v20 = vld [vmem:[#allocation17 + $0x80] sm:$0xff] }
 0x948   :  { %v2674_v28 = vld [vmem:[#allocation17 + $0xa0] sm:$0xff] }
 0x949   :  { %5339 = vtanh.f32 %v2125_v3  ;;  %v6754_v3 = vpack.c.bf16 %v2674_v28, %v2670_v20  ;;  %v2738_v20 = vld [vmem:[#allocation17 + $0x2a0] sm:$0xff] }
 0x94a   :  { %v6802_v28 = vpack.c.bf16 %v2738_v20, %v2734_v50 }
 0x953   :  { %v5340_v22 = vpop.eup %5339 }
 0x954   :  { %v2128_v2 = vmul.f32 %v5340_v22, %v2127_v31  ;;  %v2683_v31 = vld [vmem:[#allocation17 + $0xe8] sm:$0xff] }
 0x955   :  { %v6757_v22 = vpack.c.bf16 %v2683_v31, %v2679_v5  ;;  %v2743_v5 = vld [vmem:[#allocation17 + $0x2c8] sm:$0xff] }
 0x956   :  { %v2130_v23 = vadd.f32 %v2129_v34, %v2128_v2  ;;  %v2678_v34 = vld [vmem:[#allocation17 + $0xc0] sm:$0xff]  ;;  %v2747_v31 = vld [vmem:[#allocation17 + $0x2e8] sm:$0xff] }
 0x957   :  { %v2682_v2 = vld [vmem:[#allocation17 + $0xe0] sm:$0xff] }
 0x958   :  { %2134 = vst [vmem:[%s2133_s5] sm:$0xff] %v2130_v23  ;;  %v6760_v23 = vpack.c.bf16 %v2682_v2, %v2678_v34  ;;  %v6805_v34 = vpack.c.bf16 %v2747_v31, %v2743_v5  ;;  %v2742_v2 = vld [vmem:[#allocation17 + $0x2c0] sm:$0xff] }
 0x95f   :  { %v2138_v15 = vld [vmem:[%s2137_s28] sm:$0xff]  ;;  %s3632_s28 = sld [smem:[#allocation8 + $0x7]] }
 0x960   :  { %v6680_v30 = vld [vmem:[%s2233_s29] sm:$0xff]  ;;  %v2141_v44 = vmul.f32 %v2140_v21, %v2138_v15  ;;  %v2686_v15 = vld [vmem:[#allocation17 + $0x100] sm:$0xff]  ;;  %s3628_s29 = sld [smem:[#allocation12 + $0x6]] }
 0x961   :  { %v2241_v51 = vld [vmem:[%s2240_s15] sm:$0xff]  ;;  %v2237_v36 = vmul.f32 %v2236_v35, %v6680_v30  ;;  %s3634_s15 = sld [smem:[#allocation9 + $0x7]] }
 0x962   :  { %v2244_v12 = vmul.f32 %v2243_v52, %v2241_v51  ;;  %v2142_v18 = vadd.f32 %v2141_v44, %v6501_v7  ;;  %v7252_v7 = vld [vmem:[#allocation29_spill] sm:$0xff]  ;;  %v2687_v21 = vld [vmem:[#allocation17 + $0x108] sm:$0xff] }
 0x963   :  { %v2691_v35 = vld [vmem:[#allocation17 + $0x128] sm:$0xff]  ;;  %v2690_v51 = vld [vmem:[#allocation17 + $0x120] sm:$0xff] }
 0x964   :  { %v6684_v32 = vadd.f32 %v2244_v12, %v2237_v36  ;;  %3951 = vmatmul.mubr.f32.vlgmr.msra.gmra.mrb[14].mxu0 %v2142_v18  ;;  %v6763_v52 = vpack.c.bf16 %v2691_v35, %v2687_v21  ;;  %v6766_v44 = vpack.c.bf16 %v2690_v51, %v2686_v15  ;;  %v2695_v36 = vld [vmem:[#allocation17 + $0x148] sm:$0xff]  ;;  %v2746_v21 = vld [vmem:[#allocation17 + $0x2e0] sm:$0xff] }
 0x965   :  { %4885 = vmatpush1.bf16.msra.mxu0 %v6504_v41  ;;  %v7254_v41 = vld [vmem:[#allocation31_spill] sm:$0xff]  ;;  %v2699_v12 = vld [vmem:[#allocation17 + $0x168] sm:$0xff]  ;;  %v6808_v35 = vpack.c.bf16 %v2746_v21, %v2742_v2  ;;  %s3633_s1 = sshll.u32 %s3632_s28, 3 }
 0x966   :  { %2438 = vmatprep.mubr.f32.mxu1 %v6684_v32  ;;  %2509 = vmatprep.mubr.f32.mxu0 %v6684_v32  ;;  %v6769_v18 = vpack.c.bf16 %v2699_v12, %v2695_v36  ;;  %v2751_v15 = vld [vmem:[#allocation17 + $0x308] sm:$0xff]  ;;  %v2750_v12 = vld [vmem:[#allocation17 + $0x300] sm:$0xff] }
 0x967   :  { %4887 = vmatprep.subr.bf16.mxu0 %v6509_v40  ;;  %v7255_v40 = vld [vmem:[#allocation32_spill] sm:$0xff]  ;;  %v2755_v51 = vld [vmem:[#allocation17 + $0x328] sm:$0xff] }
 0x968   :  { %v6811_v36 = vpack.c.bf16 %v2755_v51, %v2751_v15 }
 0x969   :  { %4889 = vmatpush1.bf16.msra.mxu0 %v6514_v47  ;;  %v7256_v47 = vld [vmem:[#allocation33_spill] sm:$0xff] }
 0x96a   :  { %4891 = vmatprep.subr.bf16.mxu0 %v6517_v42  ;;  %v7257_v42 = vld [vmem:[#allocation34_spill] sm:$0xff] }
 0x96d   :  { %4893 = vmatpush1.bf16.msra.mxu0 %v6520_v0  ;;  %v7258_v0 = vld [vmem:[#allocation35_spill] sm:$0xff] }
 0x96e   :  { %4895 = vmatprep.subr.bf16.mxu0 %v6523_v39  ;;  %v7259_v39 = vld [vmem:[#allocation36_spill] sm:$0xff] }
 0x971   :  { %4897 = vmatpush1.bf16.msra.mxu0 %v6526_v10  ;;  %v7260_v10 = vld [vmem:[#allocation37_spill] sm:$0xff] }
 0x972   :  { %4899 = vmatprep.subr.bf16.mxu0 %v6529_v59  ;;  %v7261_v59 = vld [vmem:[#allocation38_spill] sm:$0xff] }
 0x975   :  { %4901 = vmatpush1.bf16.msra.mxu0 %v6532_v56  ;;  %v7262_v56 = vld [vmem:[#allocation39_spill] sm:$0xff] }
 0x976   :  { %4903 = vmatprep.subr.bf16.mxu0 %v7252_v7  ;;  %v2694_v7 = vld [vmem:[#allocation17 + $0x140] sm:$0xff] }
 0x979   :  { %4905 = vmatpush1.bf16.msra.mxu0 %v7253_v55  ;;  %v2698_v55 = vld [vmem:[#allocation17 + $0x160] sm:$0xff] }
 0x97a   :  { %4907 = vmatprep.subr.bf16.mxu0 %v7254_v41  ;;  %v6772_v41 = vpack.c.bf16 %v2698_v55, %v2694_v7  ;;  %v2754_v7 = vld [vmem:[#allocation17 + $0x320] sm:$0xff] }
 0x97b   :  { %v6814_v55 = vpack.c.bf16 %v2754_v7, %v2750_v12 }
 0x97d   :  { %4909 = vmatpush1.bf16.msra.mxu0 %v7255_v40  ;;  %v2703_v40 = vld [vmem:[#allocation17 + $0x188] sm:$0xff] }
 0x97e   :  { %4911 = vmatprep.subr.bf16.mxu0 %v7256_v47  ;;  %v2707_v47 = vld [vmem:[#allocation17 + $0x1a8] sm:$0xff] }
 0x981   :  { %4913 = vmatpush1.bf16.msra.mxu0 %v7257_v42  ;;  %v6775_v42 = vpack.c.bf16 %v2707_v47, %v2703_v40  ;;  %v2759_v40 = vld [vmem:[#allocation17 + $0x348] sm:$0xff] }
 0x982   :  { %4915 = vmatprep.subr.bf16.mxu0 %v7258_v0  ;;  %v2702_v0 = vld [vmem:[#allocation17 + $0x180] sm:$0xff]  ;;  %v2763_v47 = vld [vmem:[#allocation17 + $0x368] sm:$0xff] }
 0x985   :  { %4917 = vmatpush1.bf16.msra.mxu0 %v7259_v39  ;;  %v2706_v39 = vld [vmem:[#allocation17 + $0x1a0] sm:$0xff] }
 0x986   :  { %4919 = vmatprep.subr.bf16.mxu0 %v7260_v10  ;;  %v6778_v10 = vpack.c.bf16 %v2706_v39, %v2702_v0  ;;  %v6817_v0 = vpack.c.bf16 %v2763_v47, %v2759_v40  ;;  %v2758_v39 = vld [vmem:[#allocation17 + $0x340] sm:$0xff] }
 0x989   :  { %4921 = vmatpush1.bf16.msra.mxu0 %v7261_v59  ;;  %v2711_v59 = vld [vmem:[#allocation17 + $0x1c8] sm:$0xff] }
 0x98a   :  { %4923 = vmatprep.subr.bf16.mxu0 %v7262_v56  ;;  %v2715_v56 = vld [vmem:[#allocation17 + $0x1e8] sm:$0xff] }
 0x98d   :  { %4925 = vmatpush1.bf16.msra.mxu0 %v7263_v53  ;;  %v6781_v53 = vpack.c.bf16 %v2715_v56, %v2711_v59  ;;  %v2762_v59 = vld [vmem:[#allocation17 + $0x360] sm:$0xff] }
 0x98e   :  { %4927 = vmatprep.subr.bf16.mxu0 %v7264_v38  ;;  %v2710_v38 = vld [vmem:[#allocation17 + $0x1c0] sm:$0xff]  ;;  %v6820_v56 = vpack.c.bf16 %v2762_v59, %v2758_v39 }
 0x991   :  { %4929 = vmatpush1.bf16.msra.mxu0 %v7265_v49  ;;  %v2714_v49 = vld [vmem:[#allocation17 + $0x1e0] sm:$0xff] }
 0x992   :  { %4931 = vmatprep.subr.bf16.mxu0 %v6577_v62  ;;  %v2655_v62 = vld [vmem:[#allocation17 + $0x8] sm:$0xff] }
 0x995   :  { %4933 = vmatpush1.bf16.msra.mxu0 %v7266_v46  ;;  %v6784_v46 = vpack.c.bf16 %v2714_v49, %v2710_v38  ;;  %v2767_v38 = vld [vmem:[#allocation17 + $0x388] sm:$0xff] }
 0x996   :  { %4935 = vmatprep.subr.bf16.mxu0 %v7267_v24  ;;  %v2719_v24 = vld [vmem:[#allocation17 + $0x208] sm:$0xff] }
 0x997   :  { %v2771_v49 = vld [vmem:[#allocation17 + $0x3a8] sm:$0xff] }
 0x999   :  { %4937 = vmatpush1.bf16.msra.mxu0 %v6586_v54  ;;  %v2657_v54 = vld [vmem:[#allocation17 + $0x18] sm:$0xff] }
 0x99a   :  { %4939 = vmatprep.subr.bf16.mxu0 %v6589_v33 }
 0x99d   :  { %4941 = vmatpush1.bf16.msra.mxu0 %v6592_v16  ;;  %v2661_v16 = vld [vmem:[#allocation17 + $0x38] sm:$0xff] }
 0x99e   :  { %4943 = vmatprep.subr.bf16.mxu0 %v6595_v4  ;;  %v2654_v4 = vld [vmem:[#allocation17] sm:$0xff] }
 0x9a1   :  { %4945 = vmatpush1.bf16.msra.mxu0 %v6599_v27  ;;  %v2659_v27 = vld [vmem:[#allocation17 + $0x28] sm:$0xff] }
 0x9a2   :  { %v6737_v33 = vpack.c.bf16 %v2659_v27, %v2655_v62  ;;  %v2722_v62 = vld [vmem:[#allocation17 + $0x220] sm:$0xff] }
 0x9a4   :  { %4971 = vmatprep.subr.bf16.mxu0 %v6737_v33 }
 0xa37   :  { %v2225_v26 = vpop.f32.mrb[14].mxu0 }
 0xa38   :  { %v2226_v1 = vadd.f32 %v6607_v43, %v2225_v26  ;;  %v3952_v13 = vpop.f32.mrb[15].mxu0  ;;  %v2723_v26 = vld [vmem:[#allocation17 + $0x228] sm:$0xff] }
 0xa39   :  { %v2718_v13 = vld [vmem:[#allocation17 + $0x200] sm:$0xff] }
 0xa3a   :  { %2230 = vst [vmem:[#allocation20 + $0x20] sm:$0xff] %v2226_v1  ;;  %2439 = vmatmul.mubr.f32.vlgmr.msra.gmra.mrb[14].mxu1 %v2226_v1  ;;  %2510 = vmatmul.mubr.f32.vlgmr.msra.gmra.mrb[16].mxu0 %v2226_v1  ;;  %v6787_v1 = vpack.c.bf16 %v2723_v26, %v2719_v24  ;;  %v6790_v27 = vpack.c.bf16 %v2722_v62, %v2718_v13  ;;  %v2766_v26 = vld [vmem:[#allocation17 + $0x380] sm:$0xff] }
 0xa3b   :  { %4948 = vmatpush3.bf16.msra.mxu1 %v6643_v60  ;;  %3985 = vmatprep.mubr.msk.f32.mxu1 %vm5556_vm0, %v7219_v17  ;;  %v2658_v60 = vld [vmem:[#allocation17 + $0x20] sm:$0xff]  ;;  %v6823_v24 = vpack.c.bf16 %v2771_v49, %v2767_v38 }
 0xa3c   :  { %4949 = vmatprep.subr.bf16.mxu1 %v7218_v37  ;;  %v2770_v13 = vld [vmem:[#allocation17 + $0x3a0] sm:$0xff] }
 0xa3d   :  { %v6826_v62 = vpack.c.bf16 %v2770_v13, %v2766_v26 }
 0xa3f   :  { %4951 = vmatpush3.bf16.msra.mxu1 %v6647_v58  ;;  %v6739_v58 = vpack.c.bf16 %v2661_v16, %v2657_v54  ;;  %v2727_v54 = vld [vmem:[#allocation17 + $0x248] sm:$0xff] }
 0xa40   :  { %4952 = vmatprep.subr.bf16.mxu1 %v7218_v37  ;;  %v2731_v16 = vld [vmem:[#allocation17 + $0x268] sm:$0xff] }
 0xa43   :  { %4954 = vmatpush3.bf16.msra.mxu1 %v6651_v19  ;;  %v6741_v19 = vpack.c.bf16 %v2658_v60, %v2654_v4  ;;  %v6793_v4 = vpack.c.bf16 %v2731_v16, %v2727_v54  ;;  %v2726_v60 = vld [vmem:[#allocation17 + $0x240] sm:$0xff]  ;;  %v2775_v54 = vld [vmem:[#allocation17 + $0x3c8] sm:$0xff] }
 0xa44   :  { %4955 = vmatprep.subr.bf16.mxu1 %v7218_v37  ;;  %v2779_v16 = vld [vmem:[#allocation17 + $0x3e8] sm:$0xff] }
 0xa45   :  { %4973 = vmatpush1.bf16.msra.mxu0 %v6741_v19 }
 0xa47   :  { %4957 = vmatpush3.bf16.msra.mxu1 %v6655_v48  ;;  %v2663_v48 = vld [vmem:[#allocation17 + $0x48] sm:$0xff] }
 0xa48   :  { %4958 = vmatprep.subr.bf16.mxu1 %v7218_v37 }
 0xa4b   :  { %4960 = vmatpush3.bf16.msra.mxu1 %v6659_v29  ;;  %v2667_v29 = vld [vmem:[#allocation17 + $0x68] sm:$0xff] }
 0xa4c   :  { %4961 = vmatprep.subr.bf16.mxu1 %v7218_v37 }
 0xa4f   :  { %4963 = vmatpush3.bf16.msra.mxu1 %v6663_v45  ;;  %v6746_v45 = vpack.c.bf16 %v2667_v29, %v2663_v48  ;;  %v2730_v48 = vld [vmem:[#allocation17 + $0x260] sm:$0xff] }
 0xa50   :  { %4964 = vmatprep.subr.bf16.mxu1 %v7218_v37  ;;  %v6796_v29 = vpack.c.bf16 %v2730_v48, %v2726_v60  ;;  %v6829_v60 = vpack.c.bf16 %v2779_v16, %v2775_v54  ;;  %v2644_v16 = vstv %s3618_s19  ;;  %s3056_s19 = scalar_lea.vmem [#allocation2], %s3633_s1 }
 0xa51   :  { %4975 = vmatprep.subr.bf16.mxu0 %v6746_v45 }
 0xa53   :  { %4966 = vmatpush3.bf16.msra.mxu1 %v6666_v57  ;;  %v2662_v57 = vld [vmem:[#allocation17 + $0x40] sm:$0xff] }
 0xa54   :  { %4967 = vmatprep.subr.bf16.mxu1 %v7218_v37 }
 0xa57   :  { %4969 = vmatpush3.bf16.msra.mxu1 %v6670_v8  ;;  %v2666_v8 = vld [vmem:[#allocation17 + $0x60] sm:$0xff] }
 0xa58   :  { %5035 = vmatprep.subr.bf16.mxu1 %v6739_v58  ;;  %v6748_v6 = vpack.c.bf16 %v2666_v8, %v2662_v57  ;;  %v2735_v57 = vld [vmem:[#allocation17 + $0x288] sm:$0xff] }
 0xa59   :  { %v2739_v8 = vld [vmem:[#allocation17 + $0x2a8] sm:$0xff] }
 0xa5a   :  { %4977 = vmatpush1.bf16.msra.mxu0 %v6748_v6  ;;  %v6799_v63 = vpack.c.bf16 %v2739_v8, %v2735_v57 }
 0xa5b   :  { %4979 = vmatprep.subr.bf16.mxu0 %v6751_v14 }
 0xa5e   :  { %4981 = vmatpush1.bf16.msra.mxu0 %v6754_v3 }
 0xa5f   :  { %4983 = vmatprep.subr.bf16.mxu0 %v6757_v22 }
 0xa62   :  { %4985 = vmatpush1.bf16.msra.mxu0 %v6760_v23 }
 0xa63   :  { %4987 = vmatprep.subr.bf16.mxu0 %v6763_v52 }
 0xa66   :  { %4989 = vmatpush1.bf16.msra.mxu0 %v6766_v44 }
 0xa67   :  { %4991 = vmatprep.subr.bf16.mxu0 %v6769_v18 }
 0xa6a   :  { %4993 = vmatpush1.bf16.msra.mxu0 %v6772_v41 }
 0xa6b   :  { %4995 = vmatprep.subr.bf16.mxu0 %v6775_v42 }
 0xa6e   :  { %4997 = vmatpush1.bf16.msra.mxu0 %v6778_v10 }
 0xa6f   :  { %4999 = vmatprep.subr.bf16.mxu0 %v6781_v53 }
 0xa72   :  { %5001 = vmatpush1.bf16.msra.mxu0 %v6784_v46 }
 0xa73   :  { %5003 = vmatprep.subr.bf16.mxu0 %v6787_v1 }
 0xa76   :  { %5005 = vmatpush1.bf16.msra.mxu0 %v6790_v27 }
 0xa77   :  { %5007 = vmatprep.subr.bf16.mxu0 %v6793_v4 }
 0xa7a   :  { %5009 = vmatpush1.bf16.msra.mxu0 %v6796_v29 }
 0xa7b   :  { %5011 = vmatprep.subr.bf16.mxu0 %v6799_v63 }
 0xa7e   :  { %5013 = vmatpush1.bf16.msra.mxu0 %v6802_v28 }
 0xa7f   :  { %5015 = vmatprep.subr.bf16.mxu0 %v6805_v34 }
 0xa82   :  { %5017 = vmatpush1.bf16.msra.mxu0 %v6808_v35 }
 0xa83   :  { %5019 = vmatprep.subr.bf16.mxu0 %v6811_v36 }
 0xa86   :  { %5021 = vmatpush1.bf16.msra.mxu0 %v6814_v55 }
 0xa87   :  { %5023 = vmatprep.subr.bf16.mxu0 %v6817_v0 }
 0xa8a   :  { %5025 = vmatpush1.bf16.msra.mxu0 %v6820_v56 }
 0xa8b   :  { %5027 = vmatprep.subr.bf16.mxu0 %v6823_v24 }
 0xa8e   :  { %5029 = vmatpush1.bf16.msra.mxu0 %v6826_v62 }
 0xa8f   :  { %5031 = vmatprep.subr.bf16.mxu0 %v6829_v60 }
 0xb0d   :  { %v2440_v48 = vpop.f32.mrb[14].mxu1  ;;  %v2511_v57 = vpop.f32.mrb[16].mxu0 }
 0xb0e   :  { %v2516_v8 = vadd.f32 %v2440_v48, %v5977_v61  ;;  %v2442_v50 = vpop.f32.mrb[15].mxu1  ;;  %v2513_v20 = vpop.f32.mrb[17].mxu0  ;;  %v2530_v47 = vadd.f32 %v6497_v11, %v2511_v57  ;;  %v2548_v11 = vstv %s3615_s6  ;;  %v2651_v48 = vstv %s3621_s20  ;;  %v2656_v57 = vld [vmem:[#allocation17 + $0x10] sm:$0xff] }
 0xb0f   :  { %v2517_v31 = vadd.f32 %v2442_v50, %v5979_v25  ;;  %v2531_v7 = vadd.f32 %v6491_v9, %v2513_v20  ;;  %v2665_v50 = vld [vmem:[#allocation17 + $0x58] sm:$0xff] }
 0xb10   :  { %v3609_v5 = vmul.f32 -1.442695, %v2516_v8  ;;  %v2660_v8 = vld [vmem:[#allocation17 + $0x30] sm:$0xff]  ;;  %v2669_v20 = vld [vmem:[#allocation17 + $0x78] sm:$0xff] }
 0xb11   :  { %v3610_v2 = vmul.f32 -1.442695, %v2517_v31 }
 0xb12   :  { %5341 = vpow2.f32 %v3609_v5 }
 0xb13   :  { %5343 = vpow2.f32 %v3610_v2 }
 0xb1c   :  { %v5342_v21 = vpop.eup %5341 }
 0xb1d   :  { %v2524_v15 = vadd.f32 1.0, %v5342_v21  ;;  %v5344_v51 = vpop.eup %5343 }
 0xb1e   :  { %v2525_v12 = vadd.f32 1.0, %v5344_v51  ;;  %v6841_v51 = vpack.c.bf16 %v2660_v8, %v2656_v57  ;;  %v2684_v57 = vld [vmem:[#allocation17 + $0xf0] sm:$0xff]  ;;  %v2689_v8 = vld [vmem:[#allocation17 + $0x118] sm:$0xff] }
 0xb1f   :  { %5345 = vrcp.f32 %v2524_v15 }
 0xb20   :  { %5347 = vrcp.f32 %v2525_v12 }
 0xb29   :  { %v5346_v40 = vpop.eup %5345 }
 0xb2a   :  { %v2532_v39 = vmul.f32 %v5346_v40, %v2531_v7  ;;  %v5348_v38 = vpop.eup %5347  ;;  %v6846_v40 = vpack.c.bf16 %v2669_v20, %v2665_v50  ;;  %v2693_v50 = vld [vmem:[#allocation17 + $0x138] sm:$0xff] }
 0xb2b   :  { %v2535_v49 = vsub.f32 1.0, %v5348_v38  ;;  %v2537_v13 = vmul.f32 %v5348_v38, %v6684_v32  ;;  %v2677_v38 = vld [vmem:[#allocation17 + $0xb8] sm:$0xff] }
 0xb2c   :  { %v2533_v59 = vadd.f32 %v2532_v39, %v2530_v47  ;;  %v2664_v47 = vld [vmem:[#allocation17 + $0x50] sm:$0xff] }
 0xb2d   :  { %v2668_v39 = vld [vmem:[#allocation17 + $0x70] sm:$0xff] }
 0xb2e   :  { %5349 = vtanh.f32 %v2533_v59  ;;  %v2673_v59 = vld [vmem:[#allocation17 + $0x98] sm:$0xff] }
 0xb38   :  { %v5350_v26 = vpop.eup %5349 }
 0xb39   :  { %v2536_v54 = vmul.f32 %v5350_v26, %v2535_v49  ;;  %v6851_v49 = vpack.c.bf16 %v2668_v39, %v2664_v47  ;;  %v2672_v26 = vld [vmem:[#allocation17 + $0x90] sm:$0xff] }
 0xb3a   :  { %v2696_v39 = vld [vmem:[#allocation17 + $0x150] sm:$0xff] }
 0xb3b   :  { %v2538_v9 = vadd.f32 %v2537_v13, %v2536_v54  ;;  %v2676_v13 = vld [vmem:[#allocation17 + $0xb0] sm:$0xff]  ;;  %v2681_v54 = vld [vmem:[#allocation17 + $0xd8] sm:$0xff] }
 0xb3d   :  { %2542 = vst [vmem:[%s2541_s21] sm:$0xff] %v2538_v9  ;;  %v2685_v9 = vld [vmem:[#allocation17 + $0xf8] sm:$0xff] }
 0xb44   :  { %v2546_v5 = vld [vmem:[%s2545_s22] sm:$0xff] }
 0xb45   :  { %v6838_v32 = vld [vmem:[%s2641_s9] sm:$0xff]  ;;  %v2549_v2 = vmul.f32 %v2548_v11, %v2546_v5  ;;  %v6857_v11 = vpack.c.bf16 %v2676_v13, %v2672_v26  ;;  %v6866_v5 = vpack.c.bf16 %v2693_v50, %v2689_v8  ;;  %v2709_v26 = vld [vmem:[#allocation17 + $0x1b8] sm:$0xff]  ;;  %s3640_s9 = sshll.u32 %s3639_s7, 3 }
 0xb46   :  { %v2649_v31 = vld [vmem:[%s2648_s0] sm:$0xff]  ;;  %v2645_v21 = vmul.f32 %v2644_v16, %v6838_v32  ;;  %v6860_v16 = vpack.c.bf16 %v2685_v9, %v2681_v54  ;;  %v2704_v9 = vld [vmem:[#allocation17 + $0x190] sm:$0xff]  ;;  %v2717_v8 = vld [vmem:[#allocation17 + $0x1f8] sm:$0xff]  ;;  %s3361_s0 = scalar_lea.vmem [#allocation2], %s3640_s9 }
 0xb47   :  { %v2652_v15 = vmul.f32 %v2651_v48, %v2649_v31  ;;  %v2550_v12 = vadd.f32 %v2549_v2, %v6680_v30  ;;  %v6854_v30 = vpack.c.bf16 %v2677_v38, %v2673_v59  ;;  %v2680_v48 = vld [vmem:[#allocation17 + $0xd0] sm:$0xff]  ;;  %v2705_v38 = vld [vmem:[#allocation17 + $0x198] sm:$0xff] }
 0xb48   :  { %v6863_v20 = vpack.c.bf16 %v2684_v57, %v2680_v48  ;;  %v2688_v31 = vld [vmem:[#allocation17 + $0x110] sm:$0xff]  ;;  %v6878_v54 = vpack.c.bf16 %v2709_v26, %v2705_v38  ;;  %v2713_v57 = vld [vmem:[#allocation17 + $0x1d8] sm:$0xff] }
 0xb49   :  { %v6844_v7 = vadd.f32 %v2652_v15, %v2645_v21  ;;  %3986 = vmatmul.mubr.f32.vlgmr.msra.gmra.mrb[16].mxu1 %v2550_v12  ;;  %v2692_v2 = vld [vmem:[#allocation17 + $0x130] sm:$0xff]  ;;  %v2697_v21 = vld [vmem:[#allocation17 + $0x158] sm:$0xff] }
 0xb4a   :  { %5037 = vmatpush1.bf16.msra.mxu1 %v6841_v51  ;;  %v2701_v15 = vld [vmem:[#allocation17 + $0x178] sm:$0xff]  ;;  %v6869_v12 = vpack.c.bf16 %v2692_v2, %v2688_v31  ;;  %v2700_v59 = vld [vmem:[#allocation17 + $0x170] sm:$0xff]  ;;  %7269 = vst [vmem:[#allocation30_spill] sm:$0xff] %v6878_v54  ;;  %v6884_v31 = vpack.c.bf16 %v2717_v8, %v2713_v57 }
 0xb4b   :  { %2846 = vmatprep.mubr.f32.mxu0 %v6844_v7  ;;  %2917 = vmatprep.mubr.f32.mxu1 %v6844_v7  ;;  %v6872_v47 = vpack.c.bf16 %v2701_v15, %v2697_v21  ;;  %v6875_v13 = vpack.c.bf16 %v2700_v59, %v2696_v39  ;;  %v2708_v48 = vld [vmem:[#allocation17 + $0x1b0] sm:$0xff]  ;;  %v2721_v15 = vld [vmem:[#allocation17 + $0x218] sm:$0xff] }
 0xb4c   :  { %5039 = vmatprep.subr.bf16.mxu1 %v6846_v40  ;;  %v6881_v50 = vpack.c.bf16 %v2708_v48, %v2704_v9  ;;  %7271 = vst [vmem:[#allocation32_spill] sm:$0xff] %v6884_v31  ;;  %v2712_v2 = vld [vmem:[#allocation17 + $0x1d0] sm:$0xff]  ;;  %v2725_v39 = vld [vmem:[#allocation17 + $0x238] sm:$0xff] }
 0xb4d   :  { %7268 = vst [vmem:[#allocation29_spill] sm:$0xff] %v6875_v13  ;;  %v2716_v21 = vld [vmem:[#allocation17 + $0x1f0] sm:$0xff]  ;;  %v6890_v38 = vpack.c.bf16 %v2725_v39, %v2721_v15  ;;  %v2729_v9 = vld [vmem:[#allocation17 + $0x258] sm:$0xff] }
 0xb4e   :  { %5041 = vmatpush1.bf16.msra.mxu1 %v6851_v49  ;;  %7270 = vst [vmem:[#allocation31_spill] sm:$0xff] %v6881_v50  ;;  %v6887_v59 = vpack.c.bf16 %v2716_v21, %v2712_v2  ;;  %v2720_v26 = vld [vmem:[#allocation17 + $0x210] sm:$0xff]  ;;  %v2733_v48 = vld [vmem:[#allocation17 + $0x278] sm:$0xff] }
 0xb4f   :  { %5043 = vmatprep.subr.bf16.mxu1 %v6854_v30  ;;  %7273 = vst [vmem:[#allocation34_spill] sm:$0xff] %v6890_v38  ;;  %v6896_v8 = vpack.c.bf16 %v2733_v48, %v2729_v9  ;;  %v2737_v2 = vld [vmem:[#allocation17 + $0x298] sm:$0xff] }
 0xb50   :  { %7272 = vst [vmem:[#allocation33_spill] sm:$0xff] %v6887_v59  ;;  %v2741_v21 = vld [vmem:[#allocation17 + $0x2b8] sm:$0xff] }
 0xb51   :  { %7275 = vst [vmem:[#allocation36_spill] sm:$0xff] %v6896_v8  ;;  %v6902_v39 = vpack.c.bf16 %v2741_v21, %v2737_v2 }
 0xb52   :  { %5045 = vmatpush1.bf16.msra.mxu1 %v6857_v11 }
 0xb53   :  { %5047 = vmatprep.subr.bf16.mxu1 %v6860_v16  ;;  %7277 = vst [vmem:[#allocation38_spill] sm:$0xff] %v6902_v39 }
 0xb56   :  { %5049 = vmatpush1.bf16.msra.mxu1 %v6863_v20 }
 0xb57   :  { %5051 = vmatprep.subr.bf16.mxu1 %v6866_v5 }
 0xb5a   :  { %5053 = vmatpush1.bf16.msra.mxu1 %v6869_v12 }
 0xb5b   :  { %5055 = vmatprep.subr.bf16.mxu1 %v6872_v47 }
 0xb5e   :  { %5057 = vmatpush1.bf16.msra.mxu1 %v6875_v13  ;;  %v2724_v13 = vld [vmem:[#allocation17 + $0x230] sm:$0xff] }
 0xb5f   :  { %5059 = vmatprep.subr.bf16.mxu1 %v6878_v54  ;;  %v6893_v57 = vpack.c.bf16 %v2724_v13, %v2720_v26  ;;  %v2728_v54 = vld [vmem:[#allocation17 + $0x250] sm:$0xff]  ;;  %v2745_v13 = vld [vmem:[#allocation17 + $0x2d8] sm:$0xff] }
 0xb60   :  { %v2749_v26 = vld [vmem:[#allocation17 + $0x2f8] sm:$0xff] }
 0xb61   :  { %7274 = vst [vmem:[#allocation35_spill] sm:$0xff] %v6893_v57  ;;  %v6908_v48 = vpack.c.bf16 %v2749_v26, %v2745_v13 }
 0xb62   :  { %5061 = vmatpush1.bf16.msra.mxu1 %v6881_v50  ;;  %v2732_v50 = vld [vmem:[#allocation17 + $0x270] sm:$0xff] }
 0xb63   :  { %5063 = vmatprep.subr.bf16.mxu1 %v6884_v31  ;;  %v6899_v15 = vpack.c.bf16 %v2732_v50, %v2728_v54  ;;  %v2736_v31 = vld [vmem:[#allocation17 + $0x290] sm:$0xff]  ;;  %7279 = vst [vmem:[#allocation40_spill] sm:$0xff] %v6908_v48  ;;  %v2753_v54 = vld [vmem:[#allocation17 + $0x318] sm:$0xff] }
 0xb64   :  { %v2757_v50 = vld [vmem:[#allocation17 + $0x338] sm:$0xff] }
 0xb65   :  { %7276 = vst [vmem:[#allocation37_spill] sm:$0xff] %v6899_v15  ;;  %v6914_v21 = vpack.c.bf16 %v2757_v50, %v2753_v54 }
 0xb66   :  { %5065 = vmatpush1.bf16.msra.mxu1 %v6887_v59  ;;  %v2740_v59 = vld [vmem:[#allocation17 + $0x2b0] sm:$0xff] }
 0xb67   :  { %5067 = vmatprep.subr.bf16.mxu1 %v6890_v38  ;;  %v6905_v9 = vpack.c.bf16 %v2740_v59, %v2736_v31  ;;  %v2744_v38 = vld [vmem:[#allocation17 + $0x2d0] sm:$0xff]  ;;  %v2761_v31 = vld [vmem:[#allocation17 + $0x358] sm:$0xff] }
 0xb68   :  { %v2765_v59 = vld [vmem:[#allocation17 + $0x378] sm:$0xff] }
 0xb69   :  { %7278 = vst [vmem:[#allocation39_spill] sm:$0xff] %v6905_v9  ;;  %v6920_v26 = vpack.c.bf16 %v2765_v59, %v2761_v31 }
 0xb6a   :  { %5069 = vmatpush1.bf16.msra.mxu1 %v6893_v57  ;;  %v2748_v57 = vld [vmem:[#allocation17 + $0x2f0] sm:$0xff] }
 0xb6b   :  { %5071 = vmatprep.subr.bf16.mxu1 %v6896_v8  ;;  %v6911_v2 = vpack.c.bf16 %v2748_v57, %v2744_v38  ;;  %v2752_v8 = vld [vmem:[#allocation17 + $0x310] sm:$0xff]  ;;  %7282 = vst [vmem:[#allocation43_spill] sm:$0xff] %v6920_v26  ;;  %v2769_v38 = vld [vmem:[#allocation17 + $0x398] sm:$0xff] }
 0xb6c   :  { %v2773_v57 = vld [vmem:[#allocation17 + $0x3b8] sm:$0xff] }
 0xb6d   :  { %7280 = vst [vmem:[#allocation41_spill] sm:$0xff] %v6911_v2  ;;  %v6926_v50 = vpack.c.bf16 %v2773_v57, %v2769_v38  ;;  %v2776_v38 = vld [vmem:[#allocation17 + $0x3d0] sm:$0xff] }
 0xb6e   :  { %5073 = vmatpush1.bf16.msra.mxu1 %v6899_v15  ;;  %v2756_v15 = vld [vmem:[#allocation17 + $0x330] sm:$0xff] }
 0xb6f   :  { %5075 = vmatprep.subr.bf16.mxu1 %v6902_v39  ;;  %v6917_v13 = vpack.c.bf16 %v2756_v15, %v2752_v8  ;;  %v2760_v39 = vld [vmem:[#allocation17 + $0x350] sm:$0xff]  ;;  %v2777_v8 = vld [vmem:[#allocation17 + $0x3d8] sm:$0xff] }
 0xb70   :  { %v2781_v15 = vld [vmem:[#allocation17 + $0x3f8] sm:$0xff] }
 0xb71   :  { %7281 = vst [vmem:[#allocation42_spill] sm:$0xff] %v6917_v13  ;;  %v6932_v59 = vpack.c.bf16 %v2781_v15, %v2777_v8 }
 0xb72   :  { %5077 = vmatpush1.bf16.msra.mxu1 %v6905_v9  ;;  %v2764_v9 = vld [vmem:[#allocation17 + $0x370] sm:$0xff] }
 0xb73   :  { %5079 = vmatprep.subr.bf16.mxu1 %v6908_v48  ;;  %v6923_v54 = vpack.c.bf16 %v2764_v9, %v2760_v39  ;;  %v2768_v48 = vld [vmem:[#allocation17 + $0x390] sm:$0xff]  ;;  %v2774_v39 = vld [vmem:[#allocation17 + $0x3c0] sm:$0xff] }
 0xb74   :  { %v2778_v9 = vld [vmem:[#allocation17 + $0x3e0] sm:$0xff] }
 0xb75   :  { %v5032_v57 = vpack.c.bf16 %v2778_v9, %v2774_v39 }
 0xb76   :  { %5081 = vmatpush1.bf16.msra.mxu1 %v6911_v2  ;;  %v2772_v2 = vld [vmem:[#allocation17 + $0x3b0] sm:$0xff] }
 0xb77   :  { %5083 = vmatprep.subr.bf16.mxu1 %v6914_v21  ;;  %v6929_v31 = vpack.c.bf16 %v2772_v2, %v2768_v48  ;;  %5033 = vmatpush1.bf16.msra.mxu0 %v5032_v57 }
 0xb78   :  { %5098 = vmatprep.subr.bf16.mxu0 %v7218_v37 }
 0xb7a   :  { %5085 = vmatpush1.bf16.msra.mxu1 %v6917_v13 }
 0xb7b   :  { %5087 = vmatprep.subr.bf16.mxu1 %v6920_v26  ;;  %v2780_v26 = vld [vmem:[#allocation17 + $0x3f0] sm:$0xff] }
 0xb7c   :  { %v6936_v13 = vpack.c.bf16 %v2780_v26, %v2776_v38 }
 0xb7e   :  { %5089 = vmatpush1.bf16.msra.mxu1 %v6923_v54 }
 0xb7f   :  { %5091 = vmatprep.subr.bf16.mxu1 %v6926_v50 }
 0xb82   :  { %5093 = vmatpush1.bf16.msra.mxu1 %v6929_v31 }
 0xb83   :  { %5095 = vmatprep.subr.bf16.mxu1 %v6932_v59 }
 0xb86   :  { %5097 = vmatpush1.bf16.msra.mxu1 %v6936_v13 }
 0xb87   :  { %5123 = vmatprep.subr.bf16.mxu1 %v6737_v33  ;;  %v2960_v33 = vld [vmem:[#allocation18 + $0x8] sm:$0xff] }
 0xc1c   :  { %v2633_v48 = vpop.f32.mrb[16].mxu1 }
 0xc1d   :  { %v2634_v2 = vadd.f32 %v6607_v43, %v2633_v48  ;;  %v3987_v8 = vpop.f32.mrb[17].mxu1  ;;  %v2959_v43 = vld [vmem:[#allocation18] sm:$0xff]  ;;  %v7018_v48 = vld [vmem:[%s7116_s10] ss:$0 sm:$0xff]  ;;  %s3631_s10 = sld [smem:[#allocation3 + $0x7]] }
 0xc1f   :  { %2638 = vst [vmem:[#allocation20 + $0x28] sm:$0xff] %v2634_v2  ;;  %2847 = vmatmul.mubr.f32.vlgmr.msra.gmra.mrb[18].mxu0 %v2634_v2  ;;  %2918 = vmatmul.mubr.f32.vlgmr.msra.gmra.mrb[18].mxu1 %v2634_v2 }
 0xc20   :  { %4020 = vmatprep.mubr.msk.f32.mxu0 %vm5556_vm0, %v7219_v17  ;;  %5125 = vmatpush1.bf16.msra.mxu1 %v6741_v19  ;;  %v6975_v19 = vpack.c.bf16 %v2960_v33, %v2959_v43 }
 0xc21   :  { %5127 = vmatprep.subr.bf16.mxu1 %v6746_v45  ;;  %v2961_v45 = vld [vmem:[#allocation18 + $0x10] sm:$0xff] }
 0xc22   :  { %5100 = vmatpush3.bf16.msra.mxu0 %v6975_v19 }
 0xc23   :  { %5101 = vmatprep.subr.bf16.mxu0 %v7218_v37 }
 0xc24   :  { %5129 = vmatpush1.bf16.msra.mxu1 %v6748_v6  ;;  %v2962_v6 = vld [vmem:[#allocation18 + $0x18] sm:$0xff] }
 0xc25   :  { %5131 = vmatprep.subr.bf16.mxu1 %v6751_v14  ;;  %v6979_v14 = vpack.c.bf16 %v2962_v6, %v2961_v45 }
 0xc27   :  { %5103 = vmatpush3.bf16.msra.mxu0 %v6979_v14 }
 0xc28   :  { %5133 = vmatpush1.bf16.msra.mxu1 %v6754_v3  ;;  %5104 = vmatprep.subr.bf16.mxu0 %v7218_v37  ;;  %v2963_v3 = vld [vmem:[#allocation18 + $0x20] sm:$0xff] }
 0xc29   :  { %5135 = vmatprep.subr.bf16.mxu1 %v6757_v22  ;;  %v2964_v22 = vld [vmem:[#allocation18 + $0x28] sm:$0xff] }
 0xc2c   :  { %5137 = vmatpush1.bf16.msra.mxu1 %v6760_v23  ;;  %v6983_v23 = vpack.c.bf16 %v2964_v22, %v2963_v3 }
 0xc2d   :  { %5139 = vmatprep.subr.bf16.mxu1 %v6763_v52  ;;  %v2965_v52 = vld [vmem:[#allocation18 + $0x30] sm:$0xff] }
 0xc2e   :  { %5106 = vmatpush3.bf16.msra.mxu0 %v6983_v23 }
 0xc2f   :  { %5107 = vmatprep.subr.bf16.mxu0 %v7218_v37 }
 0xc30   :  { %5141 = vmatpush1.bf16.msra.mxu1 %v6766_v44  ;;  %v2966_v44 = vld [vmem:[#allocation18 + $0x38] sm:$0xff] }
 0xc31   :  { %5143 = vmatprep.subr.bf16.mxu1 %v6769_v18  ;;  %v6987_v18 = vpack.c.bf16 %v2966_v44, %v2965_v52  ;;  %v2956_v44 = vstv %s3628_s29 }
 0xc33   :  { %5109 = vmatpush3.bf16.msra.mxu0 %v6987_v18 }
 0xc34   :  { %5145 = vmatpush1.bf16.msra.mxu1 %v6772_v41  ;;  %5110 = vmatprep.subr.bf16.mxu0 %v7218_v37  ;;  %v2967_v41 = vld [vmem:[#allocation18 + $0x40] sm:$0xff] }
 0xc35   :  { %5147 = vmatprep.subr.bf16.mxu1 %v6775_v42  ;;  %v2968_v42 = vld [vmem:[#allocation18 + $0x48] sm:$0xff] }
 0xc38   :  { %5149 = vmatpush1.bf16.msra.mxu1 %v6778_v10  ;;  %v6991_v10 = vpack.c.bf16 %v2968_v42, %v2967_v41  ;;  %v3052_v41 = vstv %s3631_s10  ;;  %v3059_v42 = vstv %s3634_s15 }
 0xc39   :  { %5151 = vmatprep.subr.bf16.mxu1 %v6781_v53  ;;  %v2969_v53 = vld [vmem:[#allocation18 + $0x50] sm:$0xff] }
 0xc3a   :  { %5112 = vmatpush3.bf16.msra.mxu0 %v6991_v10 }
 0xc3b   :  { %5113 = vmatprep.subr.bf16.mxu0 %v7218_v37 }
 0xc3c   :  { %5153 = vmatpush1.bf16.msra.mxu1 %v6784_v46  ;;  %v2970_v46 = vld [vmem:[#allocation18 + $0x58] sm:$0xff] }
 0xc3d   :  { %5155 = vmatprep.subr.bf16.mxu1 %v6787_v1  ;;  %v2971_v1 = vld [vmem:[#allocation18 + $0x60] sm:$0xff] }
 0xc40   :  { %5157 = vmatpush1.bf16.msra.mxu1 %v6790_v27  ;;  %v6995_v27 = vpack.c.bf16 %v2970_v46, %v2969_v53 }
 0xc41   :  { %5159 = vmatprep.subr.bf16.mxu1 %v6793_v4  ;;  %v2972_v4 = vld [vmem:[#allocation18 + $0x68] sm:$0xff] }
 0xc42   :  { %5115 = vmatpush3.bf16.msra.mxu0 %v6995_v27 }
 0xc43   :  { %5116 = vmatprep.subr.bf16.mxu0 %v7218_v37 }
 0xc44   :  { %5161 = vmatpush1.bf16.msra.mxu1 %v6796_v29  ;;  %v6998_v29 = vpack.c.bf16 %v2972_v4, %v2971_v1 }
 0xc45   :  { %5163 = vmatprep.subr.bf16.mxu1 %v6799_v63  ;;  %v2973_v63 = vld [vmem:[#allocation18 + $0x70] sm:$0xff] }
 0xc46   :  { %5118 = vmatpush3.bf16.msra.mxu0 %v6998_v29 }
 0xc47   :  { %5119 = vmatprep.subr.bf16.mxu0 %v7218_v37 }
 0xc48   :  { %5165 = vmatpush1.bf16.msra.mxu1 %v6802_v28  ;;  %v2974_v28 = vld [vmem:[#allocation18 + $0x78] sm:$0xff] }
 0xc49   :  { %5167 = vmatprep.subr.bf16.mxu1 %v6805_v34  ;;  %v7002_v34 = vpack.c.bf16 %v2974_v28, %v2973_v63 }
 0xc4b   :  { %5121 = vmatpush3.bf16.msra.mxu0 %v7002_v34 }
 0xc4c   :  { %5169 = vmatpush1.bf16.msra.mxu1 %v6808_v35  ;;  %5187 = vmatprep.subr.bf16.mxu0 %v6739_v58  ;;  %v7012_v58 = vld [vmem:[%s7117_s11] ss:$0 sm:$0xff]  ;;  %s3629_s11 = sld [smem:[#allocation14 + $0x7]] }
 0xc4d   :  { %5171 = vmatprep.subr.bf16.mxu1 %v6811_v36 }
 0xc50   :  { %5173 = vmatpush1.bf16.msra.mxu1 %v6814_v55 }
 0xc51   :  { %5175 = vmatprep.subr.bf16.mxu1 %v6817_v0 }
 0xc52   :  { %s3630_s17 = sshll.u32 %s3629_s11, 3 }
 0xc53   :  { %s3049_s6 = scalar_lea.vmem [#allocation2], %s3630_s17 }
 0xc54   :  { %5177 = vmatpush1.bf16.msra.mxu1 %v6820_v56 }
 0xc55   :  { %5179 = vmatprep.subr.bf16.mxu1 %v6823_v24 }
 0xc58   :  { %5181 = vmatpush1.bf16.msra.mxu1 %v6826_v62 }
 0xc59   :  { %5183 = vmatprep.subr.bf16.mxu1 %v6829_v60 }
 0xc5c   :  { %5185 = vmatpush1.bf16.msra.mxu1 %v5032_v57 }
 0xc5d   :  { %5250 = vmatprep.subr.bf16.mxu1 %v7218_v37 }
 0xcf2   :  { %v2848_v35 = vpop.f32.mrb[18].mxu0  ;;  %v2919_v36 = vpop.f32.mrb[18].mxu1 }
 0xcf3   :  { %v2924_v55 = vadd.f32 %v2848_v35, %v5977_v61  ;;  %v2850_v0 = vpop.f32.mrb[19].mxu0  ;;  %v2921_v56 = vpop.f32.mrb[19].mxu1  ;;  %v2938_v2 = vadd.f32 %v7018_v48, %v2919_v36  ;;  %v7294_v36 = vld [vmem:[#allocation40_spill] sm:$0xff] }
 0xcf4   :  { %v2925_v62 = vadd.f32 %v2850_v0, %v5979_v25  ;;  %v2939_v38 = vadd.f32 %v7012_v58, %v2921_v56  ;;  %v7296_v0 = vld [vmem:[#allocation42_spill] sm:$0xff]  ;;  %v7297_v56 = vld [vmem:[#allocation43_spill] sm:$0xff] }
 0xcf5   :  { %v3622_v24 = vmul.f32 -1.442695, %v2924_v55  ;;  %v7295_v55 = vld [vmem:[#allocation41_spill] sm:$0xff] }
 0xcf6   :  { %v3623_v60 = vmul.f32 -1.442695, %v2925_v62  ;;  %v7064_v62 = vld [vmem:[%s7119_s13] ss:$0 sm:$0xff]  ;;  %s3637_s13 = sld [smem:[#allocation15 + $0x7]] }
 0xcf7   :  { %5351 = vpow2.f32 %v3622_v24 }
 0xcf8   :  { %5353 = vpow2.f32 %v3623_v60 }
 0xcfc   :  { %s3638_s2 = sshll.u32 %s3637_s13, 3 }
 0xcfd   :  { %s3357_s22 = scalar_lea.vmem [#allocation2], %s3638_s2 }
 0xd01   :  { %v5352_v26 = vpop.eup %5351 }
 0xd02   :  { %v2932_v15 = vadd.f32 1.0, %v5352_v26  ;;  %v5354_v39 = vpop.eup %5353 }
 0xd03   :  { %v2933_v9 = vadd.f32 1.0, %v5354_v39 }
 0xd04   :  { %5355 = vrcp.f32 %v2932_v15 }
 0xd05   :  { %5357 = vrcp.f32 %v2933_v9 }
 0xd0e   :  { %v5356_v57 = vpop.eup %5355 }
 0xd0f   :  { %v2940_v8 = vmul.f32 %v5356_v57, %v2939_v38  ;;  %v5358_v33 = vpop.eup %5357 }
 0xd10   :  { %v2943_v45 = vsub.f32 1.0, %v5358_v33  ;;  %v2945_v3 = vmul.f32 %v5358_v33, %v6844_v7 }
 0xd11   :  { %v2941_v43 = vadd.f32 %v2940_v8, %v2938_v2 }
 0xd13   :  { %5359 = vtanh.f32 %v2941_v43 }
 0xd1d   :  { %v5360_v6 = vpop.eup %5359 }
 0xd1e   :  { %v2944_v22 = vmul.f32 %v5360_v6, %v2943_v45 }
 0xd20   :  { %v2946_v52 = vadd.f32 %v2945_v3, %v2944_v22 }
 0xd22   :  { %2950 = vst [vmem:[%s2949_s16] sm:$0xff] %v2946_v52 }
 0xd29   :  { %v2954_v53 = vld [vmem:[%s2953_s18] sm:$0xff] }
 0xd2a   :  { %v7022_v46 = vld [vmem:[%s3049_s6] sm:$0xff]  ;;  %v2957_v1 = vmul.f32 %v2956_v44, %v2954_v53 }
 0xd2b   :  { %v3057_v7 = vld [vmem:[%s3056_s19] sm:$0xff]  ;;  %v3053_v4 = vmul.f32 %v3052_v41, %v7022_v46 }
 0xd2c   :  { %v3060_v63 = vmul.f32 %v3059_v42, %v3057_v7  ;;  %v2958_v28 = vadd.f32 %v2957_v1, %v6838_v32  ;;  %v7283_v32 = vld [vmem:[#allocation29_spill] sm:$0xff] }
 0xd2e   :  { %v7026_v35 = vadd.f32 %v3060_v63, %v3053_v4  ;;  %4021 = vmatmul.mubr.f32.vlgmr.msra.gmra.mrb[20].mxu0 %v2958_v28 }
 0xd2f   :  { %5189 = vmatpush1.bf16.msra.mxu0 %v6841_v51  ;;  %v7284_v51 = vld [vmem:[#allocation30_spill] sm:$0xff] }
 0xd30   :  { %3254 = vmatprep.mubr.f32.mxu1 %v7026_v35  ;;  %3325 = vmatprep.mubr.f32.mxu0 %v7026_v35 }
 0xd31   :  { %5191 = vmatprep.subr.bf16.mxu0 %v6846_v40  ;;  %v7285_v40 = vld [vmem:[#allocation31_spill] sm:$0xff] }
 0xd33   :  { %5193 = vmatpush1.bf16.msra.mxu0 %v6851_v49  ;;  %v7286_v49 = vld [vmem:[#allocation32_spill] sm:$0xff] }
 0xd34   :  { %5195 = vmatprep.subr.bf16.mxu0 %v6854_v30  ;;  %v7287_v30 = vld [vmem:[#allocation33_spill] sm:$0xff] }
 0xd37   :  { %5197 = vmatpush1.bf16.msra.mxu0 %v6857_v11  ;;  %v7288_v11 = vld [vmem:[#allocation34_spill] sm:$0xff] }
 0xd38   :  { %5199 = vmatprep.subr.bf16.mxu0 %v6860_v16  ;;  %v7289_v16 = vld [vmem:[#allocation35_spill] sm:$0xff] }
 0xd3b   :  { %5201 = vmatpush1.bf16.msra.mxu0 %v6863_v20  ;;  %v7290_v20 = vld [vmem:[#allocation36_spill] sm:$0xff] }
 0xd3c   :  { %5203 = vmatprep.subr.bf16.mxu0 %v6866_v5  ;;  %v7291_v5 = vld [vmem:[#allocation37_spill] sm:$0xff] }
 0xd3f   :  { %5205 = vmatpush1.bf16.msra.mxu0 %v6869_v12  ;;  %v7292_v12 = vld [vmem:[#allocation38_spill] sm:$0xff] }
 0xd40   :  { %5207 = vmatprep.subr.bf16.mxu0 %v6872_v47  ;;  %v7293_v47 = vld [vmem:[#allocation39_spill] sm:$0xff] }
 0xd43   :  { %5209 = vmatpush1.bf16.msra.mxu0 %v7283_v32 }
 0xd44   :  { %5211 = vmatprep.subr.bf16.mxu0 %v7284_v51 }
 0xd47   :  { %5213 = vmatpush1.bf16.msra.mxu0 %v7285_v40 }
 0xd48   :  { %5215 = vmatprep.subr.bf16.mxu0 %v7286_v49 }
 0xd4b   :  { %5217 = vmatpush1.bf16.msra.mxu0 %v7287_v30 }
 0xd4c   :  { %5219 = vmatprep.subr.bf16.mxu0 %v7288_v11 }
 0xd4f   :  { %5221 = vmatpush1.bf16.msra.mxu0 %v7289_v16 }
 0xd50   :  { %5223 = vmatprep.subr.bf16.mxu0 %v7290_v20 }
 0xd53   :  { %5225 = vmatpush1.bf16.msra.mxu0 %v7291_v5 }
 0xd54   :  { %5227 = vmatprep.subr.bf16.mxu0 %v7292_v12 }
 0xd57   :  { %5229 = vmatpush1.bf16.msra.mxu0 %v7293_v47 }
 0xd58   :  { %5231 = vmatprep.subr.bf16.mxu0 %v7294_v36 }
 0xd5b   :  { %5233 = vmatpush1.bf16.msra.mxu0 %v7295_v55 }
 0xd5c   :  { %5235 = vmatprep.subr.bf16.mxu0 %v6914_v21 }
 0xd5f   :  { %5237 = vmatpush1.bf16.msra.mxu0 %v7296_v0 }
 0xd60   :  { %5239 = vmatprep.subr.bf16.mxu0 %v7297_v56 }
 0xd63   :  { %5241 = vmatpush1.bf16.msra.mxu0 %v6923_v54 }
 0xd64   :  { %5243 = vmatprep.subr.bf16.mxu0 %v6926_v50 }
 0xd67   :  { %5245 = vmatpush1.bf16.msra.mxu0 %v6929_v31 }
 0xd68   :  { %5247 = vmatprep.subr.bf16.mxu0 %v6932_v59 }
 0xd6b   :  { %5249 = vmatpush1.bf16.msra.mxu0 %v6936_v13 }
 0xe01   :  { %v3041_v24 = vpop.f32.mrb[20].mxu0 }
 0xe02   :  { %v3042_v21 = vadd.f32 %v7064_v62, %v3041_v24  ;;  %v4022_v60 = vpop.f32.mrb[21].mxu0 }
 0xe04   :  { %3046 = vst [vmem:[#allocation20 + $0x30] sm:$0xff] %v3042_v21  ;;  %3255 = vmatmul.mubr.f32.vlgmr.msra.gmra.mrb[20].mxu1 %v3042_v21  ;;  %3326 = vmatmul.mubr.f32.vlgmr.msra.gmra.mrb[22].mxu0 %v3042_v21 }
 0xe05   :  { %5252 = vmatpush3.bf16.msra.mxu1 %v6975_v19  ;;  %4055 = vmatprep.mubr.msk.f32.mxu1 %vm5556_vm0, %v7219_v17 }
 0xe06   :  { %5253 = vmatprep.subr.bf16.mxu1 %v7218_v37 }
 0xe09   :  { %5255 = vmatpush3.bf16.msra.mxu1 %v6979_v14 }
 0xe0a   :  { %5256 = vmatprep.subr.bf16.mxu1 %v7218_v37 }
 0xe0d   :  { %5258 = vmatpush3.bf16.msra.mxu1 %v6983_v23 }
 0xe0e   :  { %5259 = vmatprep.subr.bf16.mxu1 %v7218_v37 }
 0xe11   :  { %5261 = vmatpush3.bf16.msra.mxu1 %v6987_v18 }
 0xe12   :  { %5262 = vmatprep.subr.bf16.mxu1 %v7218_v37 }
 0xe15   :  { %5264 = vmatpush3.bf16.msra.mxu1 %v6991_v10 }
 0xe16   :  { %5265 = vmatprep.subr.bf16.mxu1 %v7218_v37 }
 0xe19   :  { %5267 = vmatpush3.bf16.msra.mxu1 %v6995_v27 }
 0xe1a   :  { %5268 = vmatprep.subr.bf16.mxu1 %v7218_v37 }
 0xe1d   :  { %5270 = vmatpush3.bf16.msra.mxu1 %v6998_v29 }
 0xe1e   :  { %5271 = vmatprep.subr.bf16.mxu1 %v7218_v37 }
 0xe21   :  { %5273 = vmatpush3.bf16.msra.mxu1 %v7002_v34 }
 0xed7   :  { %v3256_v17 = vpop.f32.mrb[20].mxu1  ;;  %v3327_v13 = vpop.f32.mrb[22].mxu0 }
 0xed8   :  { %v3332_v54 = vadd.f32 %v3256_v17, %v5977_v61  ;;  %v3258_v50 = vpop.f32.mrb[21].mxu1  ;;  %v3329_v31 = vpop.f32.mrb[23].mxu0  ;;  %v3346_v34 = vadd.f32 %v7018_v48, %v3327_v13 }
 0xed9   :  { %v3333_v19 = vadd.f32 %v3258_v50, %v5979_v25  ;;  %v3347_v37 = vadd.f32 %v7012_v58, %v3329_v31  ;;  %v3364_v58 = vstv %s3641_s4 }
 0xeda   :  { %v3635_v59 = vmul.f32 -1.442695, %v3332_v54 }
 0xedb   :  { %v3636_v14 = vmul.f32 -1.442695, %v3333_v19 }
 0xedc   :  { %5361 = vpow2.f32 %v3635_v59 }
 0xedd   :  { %5363 = vpow2.f32 %v3636_v14 }
 0xee6   :  { %v5362_v23 = vpop.eup %5361 }
 0xee7   :  { %v3340_v18 = vadd.f32 1.0, %v5362_v23  ;;  %v5364_v10 = vpop.eup %5363 }
 0xee8   :  { %v3341_v27 = vadd.f32 1.0, %v5364_v10 }
 0xee9   :  { %5365 = vrcp.f32 %v3340_v18 }
 0xeea   :  { %5367 = vrcp.f32 %v3341_v27 }
 0xef3   :  { %v5366_v29 = vpop.eup %5365 }
 0xef4   :  { %v3348_v61 = vmul.f32 %v5366_v29, %v3347_v37  ;;  %v5368_v15 = vpop.eup %5367 }
 0xef5   :  { %v3351_v25 = vsub.f32 1.0, %v5368_v15  ;;  %v3353_v9 = vmul.f32 %v5368_v15, %v7026_v35 }
 0xef6   :  { %v3349_v26 = vadd.f32 %v3348_v61, %v3346_v34 }
 0xef8   :  { %5369 = vtanh.f32 %v3349_v26 }
 0xf02   :  { %v5370_v39 = vpop.eup %5369 }
 0xf03   :  { %v3352_v38 = vmul.f32 %v5370_v39, %v3351_v25 }
 0xf05   :  { %v3354_v57 = vadd.f32 %v3353_v9, %v3352_v38 }
 0xf07   :  { %3358 = vst [vmem:[%s3357_s22] sm:$0xff] %v3354_v57 }
 0xf0e   :  { %v3362_v48 = vld [vmem:[%s3361_s0] sm:$0xff] }
 0xf0f   :  { %v3365_v2 = vmul.f32 %v3364_v58, %v3362_v48 }
 0xf11   :  { %v3366_v8 = vadd.f32 %v3365_v2, %v7022_v46 }
 0xf13   :  { %4056 = vmatmul.mubr.f32.vlgmr.msra.gmra.mrb[22].mxu1 %v3366_v8 }
 0xfe6   :  { %v3449_v43 = vpop.f32.mrb[22].mxu1 }
 0xfe7   :  { %v3450_v33 = vadd.f32 %v7064_v62, %v3449_v43  ;;  %v4057_v45 = vpop.f32.mrb[23].mxu1 }
 0xfe9   :  { %3454 = vst [vmem:[#allocation20 + $0x38] sm:$0xff] %v3450_v33 }
 0xfea   :  { %5514 = shalt.err (!%p5511_p11)
}
 0xfeb   :  { %s5515_s26 = scalar_lea.hbm %s7120_s14, 1024 }
 0xfec   :  { %p5516_p12 = scmp.ne.s32.totalorder %s7120_s14, %s5515_s26  ;;  %p5519_p13 = scmp.lt.u32.totalorder %s5515_s26, %s7120_s14 }
 0xfee   :  { %p5521_p0 = pnand %p5519_p13, %p5516_p12 }
 0xff0   :  { %5524 = shalt.err (!%p5521_p0)
}
 0xff1   :  { %3466 = dma.vmem_to_hbm [thread:$0]  %s3461_s23, 1024, %s7120_s14, [#allocation5], %s5552_s8, %s5552_s8, %s5553_s30  }
 0xff2   :  { %5539 = dma.done.wait [#allocation5], 1024  }
 0xff3   :  { %5540 = vsyncadd [#allocation5], 4294966272 }
 0xff4   :  { %3470 = vsyncpa [#allocation4], 1 }
 0xff5   :  { %3471 = vsyncpa [#allocation19], 1 }
 0xff6   :  { %3472 = vsyncpa [#allocation5], 1 }
 0xff7   :  { %3473 = vsyncpa [#allocation6], 1 }
 0xff8   :  { %3474 = vsyncpa [#allocation7], 1 }
 0xff9   :  { %3475 = vsyncpa [#allocation10], 1 }
 0xffa   :  { %3476 = vsyncpa [#allocation13], 1 }
 0xffb   :  { %3477 = vsyncpa [#allocation16], 1 }

</bundles_post_ra>
